<compile_context>
chip_gen: v5e
topology: v5e:2x2
jax: 0.10.0
libtpu: 0.0.40
codegen_flags: <defaults>
</compile_context>

<pallas_src>
import jax
import jax.numpy as jnp
from jax import lax
from jax.experimental import pallas as pl
from jax.experimental.pallas import tpu as pltpu


def _round_up(x, m):
    return ((x + m - 1) // m) * m


# ---------------------------------------------------------------------------
# Kernel (one program = one batch tile of BT rows, full sequence)
# ---------------------------------------------------------------------------
def shakespeare_lstm_kernel(x_ref,                       # (T*BT, E)  embedded inputs, time-major
                            wih1_ref, whh1_ref, b1_ref,  # (E,4H) (H,4H) (1,4H)
                            wih2_ref, whh2_ref, b2_ref,  # (H,4H) (H,4H) (1,4H)
                            wd_ref, bd_ref,              # (H,Vp) (1,Vp)
                            logits_ref, hn_ref, cn_ref,  # (T*BT,Vp) (BT,H) (BT,H)
                            xp_s, seq_s):                # (T*BT,4H) (T*BT,H)
    BT, H = hn_ref.shape
    T = x_ref.shape[0] // BT

    # ---- hoisted layer-1 input projection for ALL timesteps (one MXU matmul, bias folded) ----
    xp_s[...] = jnp.dot(x_ref[...], wih1_ref[...],
                        preferred_element_type=jnp.float32) + b1_ref[...]

    def lstm_step(t, h, c, whh_ref):
        # Static (unrolled) sublane-aligned row offset into the hoisted projections.
        r0 = pl.multiple_of(t * BT, BT)
        gx = xp_s[pl.ds(r0, BT), :]            # issue the load before the recurrent dot
        # Recurrent matmul reads whh straight from its VMEM ref each step (no hoisted
        # long-lived value -> no spill traffic on the serial chain).
        gates = gx + jnp.dot(h, whh_ref[...], preferred_element_type=jnp.float32)
        i = jax.nn.sigmoid(gates[:, 0 * H:1 * H])
        f = jax.nn.sigmoid(gates[:, 1 * H:2 * H])
        g = jnp.tanh(gates[:, 2 * H:3 * H])
        o = jax.nn.sigmoid(gates[:, 3 * H:4 * H])
        c_new = f * c + i * g
        h_new = o * jnp.tanh(c_new)
        seq_s[pl.ds(r0, BT), :] = h_new        # store is off the serial h/c chain
        return h_new, c_new

    zero = jnp.zeros((BT, H), jnp.float32)

    # ---- LSTM layer 1 (zero initial state); h/c live in vregs as loop carries ----
    h1, c1 = lax.fori_loop(
        0, T, lambda t, hc: lstm_step(t, hc[0], hc[1], whh1_ref), (zero, zero),
        unroll=True)

    # ---- hoisted layer-2 input projection of the whole layer-1 sequence (one matmul) ----
    xp_s[...] = jnp.dot(seq_s[...], wih2_ref[...],
                        preferred_element_type=jnp.float32) + b2_ref[...]

    # ---- LSTM layer 2; initial state = layer-1 final state (PyTorch forward semantics) ----
    h2, c2 = lax.fori_loop(
        0, T, lambda t, hc: lstm_step(t, hc[0], hc[1], whh2_ref), (h1, c1),
        unroll=True)

    # ---- dense head: one lane-dense MXU matmul + single unmasked slab store ----
    logits_ref[...] = jnp.dot(seq_s[...], wd_ref[...],
                              preferred_element_type=jnp.float32) + bd_ref[...]
    hn_ref[...] = h2
    cn_ref[...] = c2


# ---------------------------------------------------------------------------
# Wrapper
# ---------------------------------------------------------------------------
def shakespeare_lstm_forward(tokens, params, *, batch_tile=8):
    """tokens: (B, T) int32.  Returns (logits (B,T,V), ((1,B,H) h_n, (1,B,H) c_n))."""
    B, T = tokens.shape
    V, E = params["emb"].shape
    H = params["whh1"].shape[0]

    BT = batch_tile
    Bp = _round_up(B, BT)          # sublane-aligned, tiled batch
    NB = Bp // BT                  # grid size (parallel -> both v7x TCs when NB >= 2)
    Vp = _round_up(V, 128)         # lane-dense logits / dense head

    # Embedding gather in the wrapper (glue), time-major, batch padded, grouped by batch tile.
    x = jnp.transpose(params["emb"][tokens], (1, 0, 2))        # (T, B, E)
    x = jnp.pad(x, ((0, 0), (0, Bp - B), (0, 0)))              # (T, Bp, E)
    x = x.reshape(T, NB, BT, E).transpose(1, 0, 2, 3).reshape(NB, T * BT, E)

    wd = jnp.pad(params["wd"], ((0, 0), (0, Vp - V)))          # (H, Vp)
    bd = jnp.pad(params["bd"], ((0, 0), (0, Vp - V)))          # (1, Vp)

    def full(shape):               # whole-array block, same for every grid step
        return pl.BlockSpec(shape, lambda b: (0,) * len(shape))

    logits, h_n, c_n = pl.pallas_call(
        shakespeare_lstm_kernel,
        grid=(NB,),
        in_specs=[
            pl.BlockSpec((None, T * BT, E), lambda b: (b, 0, 0)),
            full((E, 4 * H)), full((H, 4 * H)), full((1, 4 * H)),
            full((H, 4 * H)), full((H, 4 * H)), full((1, 4 * H)),
            full((H, Vp)), full((1, Vp)),
        ],
        out_specs=(
            pl.BlockSpec((None, T * BT, Vp), lambda b: (b, 0, 0)),
            pl.BlockSpec((None, BT, H), lambda b: (b, 0, 0)),
            pl.BlockSpec((None, BT, H), lambda b: (b, 0, 0)),
        ),
        out_shape=(
            jax.ShapeDtypeStruct((NB, T * BT, Vp), jnp.float32),
            jax.ShapeDtypeStruct((NB, BT, H), jnp.float32),
            jax.ShapeDtypeStruct((NB, BT, H), jnp.float32),
        ),
        scratch_shapes=[pltpu.VMEM((T * BT, 4 * H), jnp.float32),   # hoisted input projections
                        pltpu.VMEM((T * BT, H), jnp.float32)],      # per-layer hidden sequence
        compiler_params=pltpu.CompilerParams(dimension_semantics=("parallel",)),
    )(x, params["wih1"], params["whh1"], params["b1"],
      params["wih2"], params["whh2"], params["b2"], wd, bd)

    logits = (logits.reshape(NB, T, BT, Vp).transpose(0, 2, 1, 3)
              .reshape(Bp, T, Vp)[:B, :, :V])                        # (B, T, V)
    h_n = h_n.reshape(Bp, H)[None, :B, :]                            # (1, B, H)
    c_n = c_n.reshape(Bp, H)[None, :B, :]                            # (1, B, H)
    return logits, (h_n, c_n)


# ---------------------------------------------------------------------------
# Deterministic parameter init (PyTorch-default-like, synthetic)
# ---------------------------------------------------------------------------
def init_params(key, vocab_size, embed_dim, hidden_dim):
    ks = jax.random.split(key, 11)
    bound = 1.0 / jnp.sqrt(hidden_dim).astype(jnp.float32)

    def u(k, shape):
        return jax.random.uniform(k, shape, jnp.float32, -bound, bound)

    return dict(
        emb=jax.random.normal(ks[0], (vocab_size, embed_dim), jnp.float32),
        wih1=u(ks[1], (embed_dim, 4 * hidden_dim)),
        whh1=u(ks[2], (hidden_dim, 4 * hidden_dim)),
        b1=u(ks[3], (1, 4 * hidden_dim)) + u(ks[4], (1, 4 * hidden_dim)),   # bias_ih + bias_hh
        wih2=u(ks[5], (hidden_dim, 4 * hidden_dim)),
        whh2=u(ks[6], (hidden_dim, 4 * hidden_dim)),
        b2=u(ks[7], (1, 4 * hidden_dim)) + u(ks[8], (1, 4 * hidden_dim)),
        wd=u(ks[9], (hidden_dim, vocab_size)),
        bd=u(ks[10], (1, vocab_size)),
    )


# ---------------------------------------------------------------------------
# Pure-JAX reference (mirrors the PyTorch forward) for verification
# ---------------------------------------------------------------------------
def reference_forward(tokens, params):
    B, T = tokens.shape
    H = params["whh1"].shape[0]
    x = params["emb"][tokens]                                   # (B, T, E)

    def run_lstm(x_seq, wih, whh, b, h0, c0):
        def step(carry, x_t):
            h, c = carry
            gates = x_t @ wih + h @ whh + b[0]
            i = jax.nn.sigmoid(gates[:, :H])
            f = jax.nn.sigmoid(gates[:, H:2 * H])
            g = jnp.tanh(gates[:, 2 * H:3 * H])
            o = jax.nn.sigmoid(gates[:, 3 * H:])
            c = f * c + i * g
            h = o * jnp.tanh(c)
            return (h, c), h
        (h, c), ys = lax.scan(step, (h0, c0), jnp.transpose(x_seq, (1, 0, 2)))
        return jnp.transpose(ys, (1, 0, 2)), (h, c)

    z = jnp.zeros((B, H), jnp.float32)
    y1, (h1, c1) = run_lstm(x, params["wih1"], params["whh1"], params["b1"], z, z)
    y2, (h2, c2) = run_lstm(y1, params["wih2"], params["whh2"], params["b2"], h1, c1)
    logits = y2 @ params["wd"] + params["bd"][0]
    return logits, (h2[None], c2[None])


# ---------------------------------------------------------------------------
if __name__ == "__main__":
    VOCAB, EMBED, HIDDEN = 80, 8, 128     # small variant of the module's (80, 8, 256)
    BATCH, SEQ = 12, 8                    # batch padded to 16 -> grid of 2 batch tiles

    key = jax.random.PRNGKey(0)
    k_par, k_tok = jax.random.split(key)
    params = init_params(k_par, VOCAB, EMBED, HIDDEN)
    tokens = jax.random.randint(k_tok, (BATCH, SEQ), 0, VOCAB, dtype=jnp.int32)

    logits, (h_n, c_n) = shakespeare_lstm_forward(tokens, params)
    jax.block_until_ready((logits, h_n, c_n))

    ref_logits, (ref_h, ref_c) = reference_forward(tokens, params)
    assert logits.shape == (BATCH, SEQ, VOCAB)
    assert h_n.shape == (1, BATCH, HIDDEN) and c_n.shape == (1, BATCH, HIDDEN)
    assert jnp.allclose(logits, ref_logits, rtol=1e-3, atol=1e-3)
    assert jnp.allclose(h_n, ref_h, rtol=1e-3, atol=1e-3)
    assert jnp.allclose(c_n, ref_c, rtol=1e-3, atol=1e-3)

    print("KERNEL_OK")
</pallas_src>

<mosaic_0001>
module attributes {stable_mosaic.version = 11 : i64} {
  func.func @shakespeare_lstm_kernel(%arg0: i32, %arg1: memref<1x64x8xf32, #tpu.memory_space<vmem>>, %arg2: memref<8x512xf32, #tpu.memory_space<vmem>>, %arg3: memref<128x512xf32, #tpu.memory_space<vmem>>, %arg4: memref<1x512xf32, #tpu.memory_space<vmem>>, %arg5: memref<128x512xf32, #tpu.memory_space<vmem>>, %arg6: memref<128x512xf32, #tpu.memory_space<vmem>>, %arg7: memref<1x512xf32, #tpu.memory_space<vmem>>, %arg8: memref<128x128xf32, #tpu.memory_space<vmem>>, %arg9: memref<1x128xf32, #tpu.memory_space<vmem>>, %arg10: memref<1x64x128xf32, #tpu.memory_space<vmem>>, %arg11: memref<1x8x128xf32, #tpu.memory_space<vmem>>, %arg12: memref<1x8x128xf32, #tpu.memory_space<vmem>>, %arg13: memref<64x512xf32, #tpu.memory_space<vmem>>, %arg14: memref<64x128xf32, #tpu.memory_space<vmem>>) attributes {dimension_semantics = [#tpu.dimension_semantics<parallel>], iteration_bounds = array<i64: 2>, scalar_prefetch = 0 : i64, scratch_operands = 2 : i64, tpu.core_type = #tpu.core_type<tc>, window_params = [{transform_indices = @transform_0, window_bounds = array<i64: 1, 64, 8>}, {pipeline_mode = #tpu.pipeline_mode<synchronous>, transform_indices = @transform_1, window_bounds = array<i64: 8, 512>}, {pipeline_mode = #tpu.pipeline_mode<synchronous>, transform_indices = @transform_2, window_bounds = array<i64: 128, 512>}, {pipeline_mode = #tpu.pipeline_mode<synchronous>, transform_indices = @transform_3, window_bounds = array<i64: 1, 512>}, {pipeline_mode = #tpu.pipeline_mode<synchronous>, transform_indices = @transform_4, window_bounds = array<i64: 128, 512>}, {pipeline_mode = #tpu.pipeline_mode<synchronous>, transform_indices = @transform_5, window_bounds = array<i64: 128, 512>}, {pipeline_mode = #tpu.pipeline_mode<synchronous>, transform_indices = @transform_6, window_bounds = array<i64: 1, 512>}, {pipeline_mode = #tpu.pipeline_mode<synchronous>, transform_indices = @transform_7, window_bounds = array<i64: 128, 128>}, {pipeline_mode = #tpu.pipeline_mode<synchronous>, transform_indices = @transform_8, window_bounds = array<i64: 1, 128>}, {transform_indices = @transform_9, window_bounds = array<i64: 1, 64, 128>}, {transform_indices = @transform_10, window_bounds = array<i64: 1, 8, 128>}, {transform_indices = @transform_11, window_bounds = array<i64: 1, 8, 128>}]} {
    %c0 = arith.constant 0 : index
    %c0_0 = arith.constant 0 : index
    %c0_1 = arith.constant 0 : index
    %0 = vector.load %arg1[%c0, %c0_0, %c0_1] : memref<1x64x8xf32, #tpu.memory_space<vmem>>, vector<1x64x8xf32>
    %1 = vector.shape_cast %0 : vector<1x64x8xf32> to vector<64x8xf32>
    %c0_2 = arith.constant 0 : index
    %c0_3 = arith.constant 0 : index
    %2 = vector.load %arg2[%c0_2, %c0_3] : memref<8x512xf32, #tpu.memory_space<vmem>>, vector<8x512xf32>
    %cst = arith.constant dense<0.000000e+00> : vector<64x512xf32>
    %3 = tpu.matmul %1, %2, %cst {dimension_numbers = #tpu.dot_dimension_numbers<[1], [0], [0], [1], [0, 0, 1, 1], [], []>} : vector<64x8xf32>, vector<8x512xf32>, vector<64x512xf32> -> vector<64x512xf32>
    %c0_4 = arith.constant 0 : index
    %c0_5 = arith.constant 0 : index
    %4 = vector.load %arg4[%c0_4, %c0_5] : memref<1x512xf32, #tpu.memory_space<vmem>>, vector<1x512xf32>
    %5 = vector.broadcast %4 : vector<1x512xf32> to vector<64x512xf32>
    %6 = arith.addf %3, %5 : vector<64x512xf32>
    %c0_6 = arith.constant 0 : index
    %c0_7 = arith.constant 0 : index
    %7 = vector.load %arg13[%c0_6, %c0_7] : memref<64x512xf32, #tpu.memory_space<vmem>>, vector<64x512xf32>
    tpu.vector_store %arg13[%c0_6, %c0_7], %6 {strides = array<i32>} : memref<64x512xf32, #tpu.memory_space<vmem>>, vector<64x512xf32>,
    %cst_8 = arith.constant 0.000000e+00 : f32
    %8 = vector.broadcast %cst_8 : f32 to vector<8x128xf32>
    %c0_i32 = arith.constant 0 : i32
    %c8_i32 = arith.constant 8 : i32
    %9 = arith.muli %c0_i32, %c8_i32 : i32
    %10 = tpu.assume_multiple %9, 8 : i32
    %11 = arith.index_cast %10 : i32 to index
    %c0_9 = arith.constant 0 : index
    %12 = vector.load %arg13[%11, %c0_9] : memref<64x512xf32, #tpu.memory_space<vmem>>, vector<8x512xf32>
    %c0_10 = arith.constant 0 : index
    %c0_11 = arith.constant 0 : index
    %13 = vector.load %arg3[%c0_10, %c0_11] : memref<128x512xf32, #tpu.memory_space<vmem>>, vector<128x512xf32>
    %cst_12 = arith.constant dense<0.000000e+00> : vector<8x512xf32>
    %14 = tpu.matmul %8, %13, %cst_12 {dimension_numbers = #tpu.dot_dimension_numbers<[1], [0], [0], [1], [0, 0, 1, 1], [], []>} : vector<8x128xf32>, vector<128x512xf32>, vector<8x512xf32> -> vector<8x512xf32>
    %15 = arith.addf %12, %14 : vector<8x512xf32>
    %16 = vector.extract_strided_slice %15 {offsets = [0, 0], sizes = [8, 128], strides = [1, 1]} : vector<8x512xf32> to vector<8x128xf32>
    %17 = arith.negf %16 : vector<8x128xf32>
    %18 = math.exp %17 : vector<8x128xf32>
    %cst_13 = arith.constant 1.000000e+00 : f32
    %19 = vector.broadcast %cst_13 : f32 to vector<8x128xf32>
    %20 = arith.addf %19, %18 : vector<8x128xf32>
    %21 = arith.divf %19, %20 : vector<8x128xf32>
    %22 = vector.extract_strided_slice %15 {offsets = [0, 128], sizes = [8, 128], strides = [1, 1]} : vector<8x512xf32> to vector<8x128xf32>
    %23 = arith.negf %22 : vector<8x128xf32>
    %24 = math.exp %23 : vector<8x128xf32>
    %cst_14 = arith.constant 1.000000e+00 : f32
    %25 = vector.broadcast %cst_14 : f32 to vector<8x128xf32>
    %26 = arith.addf %25, %24 : vector<8x128xf32>
    %27 = arith.divf %25, %26 : vector<8x128xf32>
    %28 = vector.extract_strided_slice %15 {offsets = [0, 256], sizes = [8, 128], strides = [1, 1]} : vector<8x512xf32> to vector<8x128xf32>
    %29 = math.tanh %28 : vector<8x128xf32>
    %30 = vector.extract_strided_slice %15 {offsets = [0, 384], sizes = [8, 128], strides = [1, 1]} : vector<8x512xf32> to vector<8x128xf32>
    %31 = arith.negf %30 : vector<8x128xf32>
    %32 = math.exp %31 : vector<8x128xf32>
    %cst_15 = arith.constant 1.000000e+00 : f32
    %33 = vector.broadcast %cst_15 : f32 to vector<8x128xf32>
    %34 = arith.addf %33, %32 : vector<8x128xf32>
    %35 = arith.divf %33, %34 : vector<8x128xf32>
    %36 = arith.mulf %27, %8 : vector<8x128xf32>
    %37 = arith.mulf %21, %29 : vector<8x128xf32>
    %38 = arith.addf %36, %37 : vector<8x128xf32>
    %39 = math.tanh %38 : vector<8x128xf32>
    %40 = arith.mulf %35, %39 : vector<8x128xf32>
    %41 = arith.index_cast %10 : i32 to index
    %c0_16 = arith.constant 0 : index
    %42 = vector.load %arg14[%41, %c0_16] : memref<64x128xf32, #tpu.memory_space<vmem>>, vector<8x128xf32>
    tpu.vector_store %arg14[%41, %c0_16], %40 {strides = array<i32>} : memref<64x128xf32, #tpu.memory_space<vmem>>, vector<8x128xf32>,
    %c1_i32 = arith.constant 1 : i32
    %c8_i32_17 = arith.constant 8 : i32
    %43 = arith.muli %c1_i32, %c8_i32_17 : i32
    %44 = tpu.assume_multiple %43, 8 : i32
    %45 = arith.index_cast %44 : i32 to index
    %c0_18 = arith.constant 0 : index
    %46 = vector.load %arg13[%45, %c0_18] : memref<64x512xf32, #tpu.memory_space<vmem>>, vector<8x512xf32>
    %c0_19 = arith.constant 0 : index
    %c0_20 = arith.constant 0 : index
    %47 = vector.load %arg3[%c0_19, %c0_20] : memref<128x512xf32, #tpu.memory_space<vmem>>, vector<128x512xf32>
    %cst_21 = arith.constant dense<0.000000e+00> : vector<8x512xf32>
    %48 = tpu.matmul %40, %47, %cst_21 {dimension_numbers = #tpu.dot_dimension_numbers<[1], [0], [0], [1], [0, 0, 1, 1], [], []>} : vector<8x128xf32>, vector<128x512xf32>, vector<8x512xf32> -> vector<8x512xf32>
    %49 = arith.addf %46, %48 : vector<8x512xf32>
    %50 = vector.extract_strided_slice %49 {offsets = [0, 0], sizes = [8, 128], strides = [1, 1]} : vector<8x512xf32> to vector<8x128xf32>
    %51 = arith.negf %50 : vector<8x128xf32>
    %52 = math.exp %51 : vector<8x128xf32>
    %cst_22 = arith.constant 1.000000e+00 : f32
    %53 = vector.broadcast %cst_22 : f32 to vector<8x128xf32>
    %54 = arith.addf %53, %52 : vector<8x128xf32>
    %55 = arith.divf %53, %54 : vector<8x128xf32>
    %56 = vector.extract_strided_slice %49 {offsets = [0, 128], sizes = [8, 128], strides = [1, 1]} : vector<8x512xf32> to vector<8x128xf32>
    %57 = arith.negf %56 : vector<8x128xf32>
    %58 = math.exp %57 : vector<8x128xf32>
    %cst_23 = arith.constant 1.000000e+00 : f32
    %59 = vector.broadcast %cst_23 : f32 to vector<8x128xf32>
    %60 = arith.addf %59, %58 : vector<8x128xf32>
    %61 = arith.divf %59, %60 : vector<8x128xf32>
    %62 = vector.extract_strided_slice %49 {offsets = [0, 256], sizes = [8, 128], strides = [1, 1]} : vector<8x512xf32> to vector<8x128xf32>
    %63 = math.tanh %62 : vector<8x128xf32>
    %64 = vector.extract_strided_slice %49 {offsets = [0, 384], sizes = [8, 128], strides = [1, 1]} : vector<8x512xf32> to vector<8x128xf32>
    %65 = arith.negf %64 : vector<8x128xf32>
    %66 = math.exp %65 : vector<8x128xf32>
    %cst_24 = arith.constant 1.000000e+00 : f32
    %67 = vector.broadcast %cst_24 : f32 to vector<8x128xf32>
    %68 = arith.addf %67, %66 : vector<8x128xf32>
    %69 = arith.divf %67, %68 : vector<8x128xf32>
    %70 = arith.mulf %61, %38 : vector<8x128xf32>
    %71 = arith.mulf %55, %63 : vector<8x128xf32>
    %72 = arith.addf %70, %71 : vector<8x128xf32>
    %73 = math.tanh %72 : vector<8x128xf32>
    %74 = arith.mulf %69, %73 : vector<8x128xf32>
    %75 = arith.index_cast %44 : i32 to index
    %c0_25 = arith.constant 0 : index
    %76 = vector.load %arg14[%75, %c0_25] : memref<64x128xf32, #tpu.memory_space<vmem>>, vector<8x128xf32>
    tpu.vector_store %arg14[%75, %c0_25], %74 {strides = array<i32>} : memref<64x128xf32, #tpu.memory_space<vmem>>, vector<8x128xf32>,
    %c2_i32 = arith.constant 2 : i32
    %c8_i32_26 = arith.constant 8 : i32
    %77 = arith.muli %c2_i32, %c8_i32_26 : i32
    %78 = tpu.assume_multiple %77, 8 : i32
    %79 = arith.index_cast %78 : i32 to index
    %c0_27 = arith.constant 0 : index
    %80 = vector.load %arg13[%79, %c0_27] : memref<64x512xf32, #tpu.memory_space<vmem>>, vector<8x512xf32>
    %c0_28 = arith.constant 0 : index
    %c0_29 = arith.constant 0 : index
    %81 = vector.load %arg3[%c0_28, %c0_29] : memref<128x512xf32, #tpu.memory_space<vmem>>, vector<128x512xf32>
    %cst_30 = arith.constant dense<0.000000e+00> : vector<8x512xf32>
    %82 = tpu.matmul %74, %81, %cst_30 {dimension_numbers = #tpu.dot_dimension_numbers<[1], [0], [0], [1], [0, 0, 1, 1], [], []>} : vector<8x128xf32>, vector<128x512xf32>, vector<8x512xf32> -> vector<8x512xf32>
    %83 = arith.addf %80, %82 : vector<8x512xf32>
    %84 = vector.extract_strided_slice %83 {offsets = [0, 0], sizes = [8, 128], strides = [1, 1]} : vector<8x512xf32> to vector<8x128xf32>
    %85 = arith.negf %84 : vector<8x128xf32>
    %86 = math.exp %85 : vector<8x128xf32>
    %cst_31 = arith.constant 1.000000e+00 : f32
    %87 = vector.broadcast %cst_31 : f32 to vector<8x128xf32>
    %88 = arith.addf %87, %86 : vector<8x128xf32>
    %89 = arith.divf %87, %88 : vector<8x128xf32>
    %90 = vector.extract_strided_slice %83 {offsets = [0, 128], sizes = [8, 128], strides = [1, 1]} : vector<8x512xf32> to vector<8x128xf32>
    %91 = arith.negf %90 : vector<8x128xf32>
    %92 = math.exp %91 : vector<8x128xf32>
    %cst_32 = arith.constant 1.000000e+00 : f32
    %93 = vector.broadcast %cst_32 : f32 to vector<8x128xf32>
    %94 = arith.addf %93, %92 : vector<8x128xf32>
    %95 = arith.divf %93, %94 : vector<8x128xf32>
    %96 = vector.extract_strided_slice %83 {offsets = [0, 256], sizes = [8, 128], strides = [1, 1]} : vector<8x512xf32> to vector<8x128xf32>
    %97 = math.tanh %96 : vector<8x128xf32>
    %98 = vector.extract_strided_slice %83 {offsets = [0, 384], sizes = [8, 128], strides = [1, 1]} : vector<8x512xf32> to vector<8x128xf32>
    %99 = arith.negf %98 : vector<8x128xf32>
    %100 = math.exp %99 : vector<8x128xf32>
    %cst_33 = arith.constant 1.000000e+00 : f32
    %101 = vector.broadcast %cst_33 : f32 to vector<8x128xf32>
    %102 = arith.addf %101, %100 : vector<8x128xf32>
    %103 = arith.divf %101, %102 : vector<8x128xf32>
    %104 = arith.mulf %95, %72 : vector<8x128xf32>
    %105 = arith.mulf %89, %97 : vector<8x128xf32>
    %106 = arith.addf %104, %105 : vector<8x128xf32>
    %107 = math.tanh %106 : vector<8x128xf32>
    %108 = arith.mulf %103, %107 : vector<8x128xf32>
    %109 = arith.index_cast %78 : i32 to index
    %c0_34 = arith.constant 0 : index
    %110 = vector.load %arg14[%109, %c0_34] : memref<64x128xf32, #tpu.memory_space<vmem>>, vector<8x128xf32>
    tpu.vector_store %arg14[%109, %c0_34], %108 {strides = array<i32>} : memref<64x128xf32, #tpu.memory_space<vmem>>, vector<8x128xf32>,
    %c3_i32 = arith.constant 3 : i32
    %c8_i32_35 = arith.constant 8 : i32
    %111 = arith.muli %c3_i32, %c8_i32_35 : i32
    %112 = tpu.assume_multiple %111, 8 : i32
    %113 = arith.index_cast %112 : i32 to index
    %c0_36 = arith.constant 0 : index
    %114 = vector.load %arg13[%113, %c0_36] : memref<64x512xf32, #tpu.memory_space<vmem>>, vector<8x512xf32>
    %c0_37 = arith.constant 0 : index
    %c0_38 = arith.constant 0 : index
    %115 = vector.load %arg3[%c0_37, %c0_38] : memref<128x512xf32, #tpu.memory_space<vmem>>, vector<128x512xf32>
    %cst_39 = arith.constant dense<0.000000e+00> : vector<8x512xf32>
    %116 = tpu.matmul %108, %115, %cst_39 {dimension_numbers = #tpu.dot_dimension_numbers<[1], [0], [0], [1], [0, 0, 1, 1], [], []>} : vector<8x128xf32>, vector<128x512xf32>, vector<8x512xf32> -> vector<8x512xf32>
    %117 = arith.addf %114, %116 : vector<8x512xf32>
    %118 = vector.extract_strided_slice %117 {offsets = [0, 0], sizes = [8, 128], strides = [1, 1]} : vector<8x512xf32> to vector<8x128xf32>
    %119 = arith.negf %118 : vector<8x128xf32>
    %120 = math.exp %119 : vector<8x128xf32>
    %cst_40 = arith.constant 1.000000e+00 : f32
    %121 = vector.broadcast %cst_40 : f32 to vector<8x128xf32>
    %122 = arith.addf %121, %120 : vector<8x128xf32>
    %123 = arith.divf %121, %122 : vector<8x128xf32>
    %124 = vector.extract_strided_slice %117 {offsets = [0, 128], sizes = [8, 128], strides = [1, 1]} : vector<8x512xf32> to vector<8x128xf32>
    %125 = arith.negf %124 : vector<8x128xf32>
    %126 = math.exp %125 : vector<8x128xf32>
    %cst_41 = arith.constant 1.000000e+00 : f32
    %127 = vector.broadcast %cst_41 : f32 to vector<8x128xf32>
    %128 = arith.addf %127, %126 : vector<8x128xf32>
    %129 = arith.divf %127, %128 : vector<8x128xf32>
    %130 = vector.extract_strided_slice %117 {offsets = [0, 256], sizes = [8, 128], strides = [1, 1]} : vector<8x512xf32> to vector<8x128xf32>
    %131 = math.tanh %130 : vector<8x128xf32>
    %132 = vector.extract_strided_slice %117 {offsets = [0, 384], sizes = [8, 128], strides = [1, 1]} : vector<8x512xf32> to vector<8x128xf32>
    %133 = arith.negf %132 : vector<8x128xf32>
    %134 = math.exp %133 : vector<8x128xf32>
    %cst_42 = arith.constant 1.000000e+00 : f32
    %135 = vector.broadcast %cst_42 : f32 to vector<8x128xf32>
    %136 = arith.addf %135, %134 : vector<8x128xf32>
    %137 = arith.divf %135, %136 : vector<8x128xf32>
    %138 = arith.mulf %129, %106 : vector<8x128xf32>
    %139 = arith.mulf %123, %131 : vector<8x128xf32>
    %140 = arith.addf %138, %139 : vector<8x128xf32>
    %141 = math.tanh %140 : vector<8x128xf32>
    %142 = arith.mulf %137, %141 : vector<8x128xf32>
    %143 = arith.index_cast %112 : i32 to index
    %c0_43 = arith.constant 0 : index
    %144 = vector.load %arg14[%143, %c0_43] : memref<64x128xf32, #tpu.memory_space<vmem>>, vector<8x128xf32>
    tpu.vector_store %arg14[%143, %c0_43], %142 {strides = array<i32>} : memref<64x128xf32, #tpu.memory_space<vmem>>, vector<8x128xf32>,
    %c4_i32 = arith.constant 4 : i32
    %c8_i32_44 = arith.constant 8 : i32
    %145 = arith.muli %c4_i32, %c8_i32_44 : i32
    %146 = tpu.assume_multiple %145, 8 : i32
    %147 = arith.index_cast %146 : i32 to index
    %c0_45 = arith.constant 0 : index
    %148 = vector.load %arg13[%147, %c0_45] : memref<64x512xf32, #tpu.memory_space<vmem>>, vector<8x512xf32>
    %c0_46 = arith.constant 0 : index
    %c0_47 = arith.constant 0 : index
    %149 = vector.load %arg3[%c0_46, %c0_47] : memref<128x512xf32, #tpu.memory_space<vmem>>, vector<128x512xf32>
    %cst_48 = arith.constant dense<0.000000e+00> : vector<8x512xf32>
    %150 = tpu.matmul %142, %149, %cst_48 {dimension_numbers = #tpu.dot_dimension_numbers<[1], [0], [0], [1], [0, 0, 1, 1], [], []>} : vector<8x128xf32>, vector<128x512xf32>, vector<8x512xf32> -> vector<8x512xf32>
    %151 = arith.addf %148, %150 : vector<8x512xf32>
    %152 = vector.extract_strided_slice %151 {offsets = [0, 0], sizes = [8, 128], strides = [1, 1]} : vector<8x512xf32> to vector<8x128xf32>
    %153 = arith.negf %152 : vector<8x128xf32>
    %154 = math.exp %153 : vector<8x128xf32>
    %cst_49 = arith.constant 1.000000e+00 : f32
    %155 = vector.broadcast %cst_49 : f32 to vector<8x128xf32>
    %156 = arith.addf %155, %154 : vector<8x128xf32>
    %157 = arith.divf %155, %156 : vector<8x128xf32>
    %158 = vector.extract_strided_slice %151 {offsets = [0, 128], sizes = [8, 128], strides = [1, 1]} : vector<8x512xf32> to vector<8x128xf32>
    %159 = arith.negf %158 : vector<8x128xf32>
    %160 = math.exp %159 : vector<8x128xf32>
    %cst_50 = arith.constant 1.000000e+00 : f32
    %161 = vector.broadcast %cst_50 : f32 to vector<8x128xf32>
    %162 = arith.addf %161, %160 : vector<8x128xf32>
    %163 = arith.divf %161, %162 : vector<8x128xf32>
    %164 = vector.extract_strided_slice %151 {offsets = [0, 256], sizes = [8, 128], strides = [1, 1]} : vector<8x512xf32> to vector<8x128xf32>
    %165 = math.tanh %164 : vector<8x128xf32>
    %166 = vector.extract_strided_slice %151 {offsets = [0, 384], sizes = [8, 128], strides = [1, 1]} : vector<8x512xf32> to vector<8x128xf32>
    %167 = arith.negf %166 : vector<8x128xf32>
    %168 = math.exp %167 : vector<8x128xf32>
    %cst_51 = arith.constant 1.000000e+00 : f32
    %169 = vector.broadcast %cst_51 : f32 to vector<8x128xf32>
    %170 = arith.addf %169, %168 : vector<8x128xf32>
    %171 = arith.divf %169, %170 : vector<8x128xf32>
    %172 = arith.mulf %163, %140 : vector<8x128xf32>
    %173 = arith.mulf %157, %165 : vector<8x128xf32>
    %174 = arith.addf %172, %173 : vector<8x128xf32>
    %175 = math.tanh %174 : vector<8x128xf32>
    %176 = arith.mulf %171, %175 : vector<8x128xf32>
    %177 = arith.index_cast %146 : i32 to index
    %c0_52 = arith.constant 0 : index
    %178 = vector.load %arg14[%177, %c0_52] : memref<64x128xf32, #tpu.memory_space<vmem>>, vector<8x128xf32>
    tpu.vector_store %arg14[%177, %c0_52], %176 {strides = array<i32>} : memref<64x128xf32, #tpu.memory_space<vmem>>, vector<8x128xf32>,
    %c5_i32 = arith.constant 5 : i32
    %c8_i32_53 = arith.constant 8 : i32
    %179 = arith.muli %c5_i32, %c8_i32_53 : i32
    %180 = tpu.assume_multiple %179, 8 : i32
    %181 = arith.index_cast %180 : i32 to index
    %c0_54 = arith.constant 0 : index
    %182 = vector.load %arg13[%181, %c0_54] : memref<64x512xf32, #tpu.memory_space<vmem>>, vector<8x512xf32>
    %c0_55 = arith.constant 0 : index
    %c0_56 = arith.constant 0 : index
    %183 = vector.load %arg3[%c0_55, %c0_56] : memref<128x512xf32, #tpu.memory_space<vmem>>, vector<128x512xf32>
    %cst_57 = arith.constant dense<0.000000e+00> : vector<8x512xf32>
    %184 = tpu.matmul %176, %183, %cst_57 {dimension_numbers = #tpu.dot_dimension_numbers<[1], [0], [0], [1], [0, 0, 1, 1], [], []>} : vector<8x128xf32>, vector<128x512xf32>, vector<8x512xf32> -> vector<8x512xf32>
    %185 = arith.addf %182, %184 : vector<8x512xf32>
    %186 = vector.extract_strided_slice %185 {offsets = [0, 0], sizes = [8, 128], strides = [1, 1]} : vector<8x512xf32> to vector<8x128xf32>
    %187 = arith.negf %186 : vector<8x128xf32>
    %188 = math.exp %187 : vector<8x128xf32>
    %cst_58 = arith.constant 1.000000e+00 : f32
    %189 = vector.broadcast %cst_58 : f32 to vector<8x128xf32>
    %190 = arith.addf %189, %188 : vector<8x128xf32>
    %191 = arith.divf %189, %190 : vector<8x128xf32>
    %192 = vector.extract_strided_slice %185 {offsets = [0, 128], sizes = [8, 128], strides = [1, 1]} : vector<8x512xf32> to vector<8x128xf32>
    %193 = arith.negf %192 : vector<8x128xf32>
    %194 = math.exp %193 : vector<8x128xf32>
    %cst_59 = arith.constant 1.000000e+00 : f32
    %195 = vector.broadcast %cst_59 : f32 to vector<8x128xf32>
    %196 = arith.addf %195, %194 : vector<8x128xf32>
    %197 = arith.divf %195, %196 : vector<8x128xf32>
    %198 = vector.extract_strided_slice %185 {offsets = [0, 256], sizes = [8, 128], strides = [1, 1]} : vector<8x512xf32> to vector<8x128xf32>
    %199 = math.tanh %198 : vector<8x128xf32>
    %200 = vector.extract_strided_slice %185 {offsets = [0, 384], sizes = [8, 128], strides = [1, 1]} : vector<8x512xf32> to vector<8x128xf32>
    %201 = arith.negf %200 : vector<8x128xf32>
    %202 = math.exp %201 : vector<8x128xf32>
    %cst_60 = arith.constant 1.000000e+00 : f32
    %203 = vector.broadcast %cst_60 : f32 to vector<8x128xf32>
    %204 = arith.addf %203, %202 : vector<8x128xf32>
    %205 = arith.divf %203, %204 : vector<8x128xf32>
    %206 = arith.mulf %197, %174 : vector<8x128xf32>
    %207 = arith.mulf %191, %199 : vector<8x128xf32>
    %208 = arith.addf %206, %207 : vector<8x128xf32>
    %209 = math.tanh %208 : vector<8x128xf32>
    %210 = arith.mulf %205, %209 : vector<8x128xf32>
    %211 = arith.index_cast %180 : i32 to index
    %c0_61 = arith.constant 0 : index
    %212 = vector.load %arg14[%211, %c0_61] : memref<64x128xf32, #tpu.memory_space<vmem>>, vector<8x128xf32>
    tpu.vector_store %arg14[%211, %c0_61], %210 {strides = array<i32>} : memref<64x128xf32, #tpu.memory_space<vmem>>, vector<8x128xf32>,
    %c6_i32 = arith.constant 6 : i32
    %c8_i32_62 = arith.constant 8 : i32
    %213 = arith.muli %c6_i32, %c8_i32_62 : i32
    %214 = tpu.assume_multiple %213, 8 : i32
    %215 = arith.index_cast %214 : i32 to index
    %c0_63 = arith.constant 0 : index
    %216 = vector.load %arg13[%215, %c0_63] : memref<64x512xf32, #tpu.memory_space<vmem>>, vector<8x512xf32>
    %c0_64 = arith.constant 0 : index
    %c0_65 = arith.constant 0 : index
    %217 = vector.load %arg3[%c0_64, %c0_65] : memref<128x512xf32, #tpu.memory_space<vmem>>, vector<128x512xf32>
    %cst_66 = arith.constant dense<0.000000e+00> : vector<8x512xf32>
    %218 = tpu.matmul %210, %217, %cst_66 {dimension_numbers = #tpu.dot_dimension_numbers<[1], [0], [0], [1], [0, 0, 1, 1], [], []>} : vector<8x128xf32>, vector<128x512xf32>, vector<8x512xf32> -> vector<8x512xf32>
    %219 = arith.addf %216, %218 : vector<8x512xf32>
    %220 = vector.extract_strided_slice %219 {offsets = [0, 0], sizes = [8, 128], strides = [1, 1]} : vector<8x512xf32> to vector<8x128xf32>
    %221 = arith.negf %220 : vector<8x128xf32>
    %222 = math.exp %221 : vector<8x128xf32>
    %cst_67 = arith.constant 1.000000e+00 : f32
    %223 = vector.broadcast %cst_67 : f32 to vector<8x128xf32>
    %224 = arith.addf %223, %222 : vector<8x128xf32>
    %225 = arith.divf %223, %224 : vector<8x128xf32>
    %226 = vector.extract_strided_slice %219 {offsets = [0, 128], sizes = [8, 128], strides = [1, 1]} : vector<8x512xf32> to vector<8x128xf32>
    %227 = arith.negf %226 : vector<8x128xf32>
    %228 = math.exp %227 : vector<8x128xf32>
    %cst_68 = arith.constant 1.000000e+00 : f32
    %229 = vector.broadcast %cst_68 : f32 to vector<8x128xf32>
    %230 = arith.addf %229, %228 : vector<8x128xf32>
    %231 = arith.divf %229, %230 : vector<8x128xf32>
    %232 = vector.extract_strided_slice %219 {offsets = [0, 256], sizes = [8, 128], strides = [1, 1]} : vector<8x512xf32> to vector<8x128xf32>
    %233 = math.tanh %232 : vector<8x128xf32>
    %234 = vector.extract_strided_slice %219 {offsets = [0, 384], sizes = [8, 128], strides = [1, 1]} : vector<8x512xf32> to vector<8x128xf32>
    %235 = arith.negf %234 : vector<8x128xf32>
    %236 = math.exp %235 : vector<8x128xf32>
    %cst_69 = arith.constant 1.000000e+00 : f32
    %237 = vector.broadcast %cst_69 : f32 to vector<8x128xf32>
    %238 = arith.addf %237, %236 : vector<8x128xf32>
    %239 = arith.divf %237, %238 : vector<8x128xf32>
    %240 = arith.mulf %231, %208 : vector<8x128xf32>
    %241 = arith.mulf %225, %233 : vector<8x128xf32>
    %242 = arith.addf %240, %241 : vector<8x128xf32>
    %243 = math.tanh %242 : vector<8x128xf32>
    %244 = arith.mulf %239, %243 : vector<8x128xf32>
    %245 = arith.index_cast %214 : i32 to index
    %c0_70 = arith.constant 0 : index
    %246 = vector.load %arg14[%245, %c0_70] : memref<64x128xf32, #tpu.memory_space<vmem>>, vector<8x128xf32>
    tpu.vector_store %arg14[%245, %c0_70], %244 {strides = array<i32>} : memref<64x128xf32, #tpu.memory_space<vmem>>, vector<8x128xf32>,
    %c7_i32 = arith.constant 7 : i32
    %c8_i32_71 = arith.constant 8 : i32
    %247 = arith.muli %c7_i32, %c8_i32_71 : i32
    %248 = tpu.assume_multiple %247, 8 : i32
    %249 = arith.index_cast %248 : i32 to index
    %c0_72 = arith.constant 0 : index
    %250 = vector.load %arg13[%249, %c0_72] : memref<64x512xf32, #tpu.memory_space<vmem>>, vector<8x512xf32>
    %c0_73 = arith.constant 0 : index
    %c0_74 = arith.constant 0 : index
    %251 = vector.load %arg3[%c0_73, %c0_74] : memref<128x512xf32, #tpu.memory_space<vmem>>, vector<128x512xf32>
    %cst_75 = arith.constant dense<0.000000e+00> : vector<8x512xf32>
    %252 = tpu.matmul %244, %251, %cst_75 {dimension_numbers = #tpu.dot_dimension_numbers<[1], [0], [0], [1], [0, 0, 1, 1], [], []>} : vector<8x128xf32>, vector<128x512xf32>, vector<8x512xf32> -> vector<8x512xf32>
    %253 = arith.addf %250, %252 : vector<8x512xf32>
    %254 = vector.extract_strided_slice %253 {offsets = [0, 0], sizes = [8, 128], strides = [1, 1]} : vector<8x512xf32> to vector<8x128xf32>
    %255 = arith.negf %254 : vector<8x128xf32>
    %256 = math.exp %255 : vector<8x128xf32>
    %cst_76 = arith.constant 1.000000e+00 : f32
    %257 = vector.broadcast %cst_76 : f32 to vector<8x128xf32>
    %258 = arith.addf %257, %256 : vector<8x128xf32>
    %259 = arith.divf %257, %258 : vector<8x128xf32>
    %260 = vector.extract_strided_slice %253 {offsets = [0, 128], sizes = [8, 128], strides = [1, 1]} : vector<8x512xf32> to vector<8x128xf32>
    %261 = arith.negf %260 : vector<8x128xf32>
    %262 = math.exp %261 : vector<8x128xf32>
    %cst_77 = arith.constant 1.000000e+00 : f32
    %263 = vector.broadcast %cst_77 : f32 to vector<8x128xf32>
    %264 = arith.addf %263, %262 : vector<8x128xf32>
    %265 = arith.divf %263, %264 : vector<8x128xf32>
    %266 = vector.extract_strided_slice %253 {offsets = [0, 256], sizes = [8, 128], strides = [1, 1]} : vector<8x512xf32> to vector<8x128xf32>
    %267 = math.tanh %266 : vector<8x128xf32>
    %268 = vector.extract_strided_slice %253 {offsets = [0, 384], sizes = [8, 128], strides = [1, 1]} : vector<8x512xf32> to vector<8x128xf32>
    %269 = arith.negf %268 : vector<8x128xf32>
    %270 = math.exp %269 : vector<8x128xf32>
    %cst_78 = arith.constant 1.000000e+00 : f32
    %271 = vector.broadcast %cst_78 : f32 to vector<8x128xf32>
    %272 = arith.addf %271, %270 : vector<8x128xf32>
    %273 = arith.divf %271, %272 : vector<8x128xf32>
    %274 = arith.mulf %265, %242 : vector<8x128xf32>
    %275 = arith.mulf %259, %267 : vector<8x128xf32>
    %276 = arith.addf %274, %275 : vector<8x128xf32>
    %277 = math.tanh %276 : vector<8x128xf32>
    %278 = arith.mulf %273, %277 : vector<8x128xf32>
    %279 = arith.index_cast %248 : i32 to index
    %c0_79 = arith.constant 0 : index
    %280 = vector.load %arg14[%279, %c0_79] : memref<64x128xf32, #tpu.memory_space<vmem>>, vector<8x128xf32>
    tpu.vector_store %arg14[%279, %c0_79], %278 {strides = array<i32>} : memref<64x128xf32, #tpu.memory_space<vmem>>, vector<8x128xf32>,
    %c8_i32_80 = arith.constant 8 : i32
    %c0_81 = arith.constant 0 : index
    %c0_82 = arith.constant 0 : index
    %281 = vector.load %arg14[%c0_81, %c0_82] : memref<64x128xf32, #tpu.memory_space<vmem>>, vector<64x128xf32>
    %c0_83 = arith.constant 0 : index
    %c0_84 = arith.constant 0 : index
    %282 = vector.load %arg5[%c0_83, %c0_84] : memref<128x512xf32, #tpu.memory_space<vmem>>, vector<128x512xf32>
    %cst_85 = arith.constant dense<0.000000e+00> : vector<64x512xf32>
    %283 = tpu.matmul %281, %282, %cst_85 {dimension_numbers = #tpu.dot_dimension_numbers<[1], [0], [0], [1], [0, 0, 1, 1], [], []>} : vector<64x128xf32>, vector<128x512xf32>, vector<64x512xf32> -> vector<64x512xf32>
    %c0_86 = arith.constant 0 : index
    %c0_87 = arith.constant 0 : index
    %284 = vector.load %arg7[%c0_86, %c0_87] : memref<1x512xf32, #tpu.memory_space<vmem>>, vector<1x512xf32>
    %285 = vector.broadcast %284 : vector<1x512xf32> to vector<64x512xf32>
    %286 = arith.addf %283, %285 : vector<64x512xf32>
    %c0_88 = arith.constant 0 : index
    %c0_89 = arith.constant 0 : index
    %287 = vector.load %arg13[%c0_88, %c0_89] : memref<64x512xf32, #tpu.memory_space<vmem>>, vector<64x512xf32>
    tpu.vector_store %arg13[%c0_88, %c0_89], %286 {strides = array<i32>} : memref<64x512xf32, #tpu.memory_space<vmem>>, vector<64x512xf32>,
    %c0_i32_90 = arith.constant 0 : i32
    %c8_i32_91 = arith.constant 8 : i32
    %288 = arith.muli %c0_i32_90, %c8_i32_91 : i32
    %289 = tpu.assume_multiple %288, 8 : i32
    %290 = arith.index_cast %289 : i32 to index
    %c0_92 = arith.constant 0 : index
    %291 = vector.load %arg13[%290, %c0_92] : memref<64x512xf32, #tpu.memory_space<vmem>>, vector<8x512xf32>
    %c0_93 = arith.constant 0 : index
    %c0_94 = arith.constant 0 : index
    %292 = vector.load %arg6[%c0_93, %c0_94] : memref<128x512xf32, #tpu.memory_space<vmem>>, vector<128x512xf32>
    %cst_95 = arith.constant dense<0.000000e+00> : vector<8x512xf32>
    %293 = tpu.matmul %278, %292, %cst_95 {dimension_numbers = #tpu.dot_dimension_numbers<[1], [0], [0], [1], [0, 0, 1, 1], [], []>} : vector<8x128xf32>, vector<128x512xf32>, vector<8x512xf32> -> vector<8x512xf32>
    %294 = arith.addf %291, %293 : vector<8x512xf32>
    %295 = vector.extract_strided_slice %294 {offsets = [0, 0], sizes = [8, 128], strides = [1, 1]} : vector<8x512xf32> to vector<8x128xf32>
    %296 = arith.negf %295 : vector<8x128xf32>
    %297 = math.exp %296 : vector<8x128xf32>
    %cst_96 = arith.constant 1.000000e+00 : f32
    %298 = vector.broadcast %cst_96 : f32 to vector<8x128xf32>
    %299 = arith.addf %298, %297 : vector<8x128xf32>
    %300 = arith.divf %298, %299 : vector<8x128xf32>
    %301 = vector.extract_strided_slice %294 {offsets = [0, 128], sizes = [8, 128], strides = [1, 1]} : vector<8x512xf32> to vector<8x128xf32>
    %302 = arith.negf %301 : vector<8x128xf32>
    %303 = math.exp %302 : vector<8x128xf32>
    %cst_97 = arith.constant 1.000000e+00 : f32
    %304 = vector.broadcast %cst_97 : f32 to vector<8x128xf32>
    %305 = arith.addf %304, %303 : vector<8x128xf32>
    %306 = arith.divf %304, %305 : vector<8x128xf32>
    %307 = vector.extract_strided_slice %294 {offsets = [0, 256], sizes = [8, 128], strides = [1, 1]} : vector<8x512xf32> to vector<8x128xf32>
    %308 = math.tanh %307 : vector<8x128xf32>
    %309 = vector.extract_strided_slice %294 {offsets = [0, 384], sizes = [8, 128], strides = [1, 1]} : vector<8x512xf32> to vector<8x128xf32>
    %310 = arith.negf %309 : vector<8x128xf32>
    %311 = math.exp %310 : vector<8x128xf32>
    %cst_98 = arith.constant 1.000000e+00 : f32
    %312 = vector.broadcast %cst_98 : f32 to vector<8x128xf32>
    %313 = arith.addf %312, %311 : vector<8x128xf32>
    %314 = arith.divf %312, %313 : vector<8x128xf32>
    %315 = arith.mulf %306, %276 : vector<8x128xf32>
    %316 = arith.mulf %300, %308 : vector<8x128xf32>
    %317 = arith.addf %315, %316 : vector<8x128xf32>
    %318 = math.tanh %317 : vector<8x128xf32>
    %319 = arith.mulf %314, %318 : vector<8x128xf32>
    %320 = arith.index_cast %289 : i32 to index
    %c0_99 = arith.constant 0 : index
    %321 = vector.load %arg14[%320, %c0_99] : memref<64x128xf32, #tpu.memory_space<vmem>>, vector<8x128xf32>
    tpu.vector_store %arg14[%320, %c0_99], %319 {strides = array<i32>} : memref<64x128xf32, #tpu.memory_space<vmem>>, vector<8x128xf32>,
    %c1_i32_100 = arith.constant 1 : i32
    %c8_i32_101 = arith.constant 8 : i32
    %322 = arith.muli %c1_i32_100, %c8_i32_101 : i32
    %323 = tpu.assume_multiple %322, 8 : i32
    %324 = arith.index_cast %323 : i32 to index
    %c0_102 = arith.constant 0 : index
    %325 = vector.load %arg13[%324, %c0_102] : memref<64x512xf32, #tpu.memory_space<vmem>>, vector<8x512xf32>
    %c0_103 = arith.constant 0 : index
    %c0_104 = arith.constant 0 : index
    %326 = vector.load %arg6[%c0_103, %c0_104] : memref<128x512xf32, #tpu.memory_space<vmem>>, vector<128x512xf32>
    %cst_105 = arith.constant dense<0.000000e+00> : vector<8x512xf32>
    %327 = tpu.matmul %319, %326, %cst_105 {dimension_numbers = #tpu.dot_dimension_numbers<[1], [0], [0], [1], [0, 0, 1, 1], [], []>} : vector<8x128xf32>, vector<128x512xf32>, vector<8x512xf32> -> vector<8x512xf32>
    %328 = arith.addf %325, %327 : vector<8x512xf32>
    %329 = vector.extract_strided_slice %328 {offsets = [0, 0], sizes = [8, 128], strides = [1, 1]} : vector<8x512xf32> to vector<8x128xf32>
    %330 = arith.negf %329 : vector<8x128xf32>
    %331 = math.exp %330 : vector<8x128xf32>
    %cst_106 = arith.constant 1.000000e+00 : f32
    %332 = vector.broadcast %cst_106 : f32 to vector<8x128xf32>
    %333 = arith.addf %332, %331 : vector<8x128xf32>
    %334 = arith.divf %332, %333 : vector<8x128xf32>
    %335 = vector.extract_strided_slice %328 {offsets = [0, 128], sizes = [8, 128], strides = [1, 1]} : vector<8x512xf32> to vector<8x128xf32>
    %336 = arith.negf %335 : vector<8x128xf32>
    %337 = math.exp %336 : vector<8x128xf32>
    %cst_107 = arith.constant 1.000000e+00 : f32
    %338 = vector.broadcast %cst_107 : f32 to vector<8x128xf32>
    %339 = arith.addf %338, %337 : vector<8x128xf32>
    %340 = arith.divf %338, %339 : vector<8x128xf32>
    %341 = vector.extract_strided_slice %328 {offsets = [0, 256], sizes = [8, 128], strides = [1, 1]} : vector<8x512xf32> to vector<8x128xf32>
    %342 = math.tanh %341 : vector<8x128xf32>
    %343 = vector.extract_strided_slice %328 {offsets = [0, 384], sizes = [8, 128], strides = [1, 1]} : vector<8x512xf32> to vector<8x128xf32>
    %344 = arith.negf %343 : vector<8x128xf32>
    %345 = math.exp %344 : vector<8x128xf32>
    %cst_108 = arith.constant 1.000000e+00 : f32
    %346 = vector.broadcast %cst_108 : f32 to vector<8x128xf32>
    %347 = arith.addf %346, %345 : vector<8x128xf32>
    %348 = arith.divf %346, %347 : vector<8x128xf32>
    %349 = arith.mulf %340, %317 : vector<8x128xf32>
    %350 = arith.mulf %334, %342 : vector<8x128xf32>
    %351 = arith.addf %349, %350 : vector<8x128xf32>
    %352 = math.tanh %351 : vector<8x128xf32>
    %353 = arith.mulf %348, %352 : vector<8x128xf32>
    %354 = arith.index_cast %323 : i32 to index
    %c0_109 = arith.constant 0 : index
    %355 = vector.load %arg14[%354, %c0_109] : memref<64x128xf32, #tpu.memory_space<vmem>>, vector<8x128xf32>
    tpu.vector_store %arg14[%354, %c0_109], %353 {strides = array<i32>} : memref<64x128xf32, #tpu.memory_space<vmem>>, vector<8x128xf32>,
    %c2_i32_110 = arith.constant 2 : i32
    %c8_i32_111 = arith.constant 8 : i32
    %356 = arith.muli %c2_i32_110, %c8_i32_111 : i32
    %357 = tpu.assume_multiple %356, 8 : i32
    %358 = arith.index_cast %357 : i32 to index
    %c0_112 = arith.constant 0 : index
    %359 = vector.load %arg13[%358, %c0_112] : memref<64x512xf32, #tpu.memory_space<vmem>>, vector<8x512xf32>
    %c0_113 = arith.constant 0 : index
    %c0_114 = arith.constant 0 : index
    %360 = vector.load %arg6[%c0_113, %c0_114] : memref<128x512xf32, #tpu.memory_space<vmem>>, vector<128x512xf32>
    %cst_115 = arith.constant dense<0.000000e+00> : vector<8x512xf32>
    %361 = tpu.matmul %353, %360, %cst_115 {dimension_numbers = #tpu.dot_dimension_numbers<[1], [0], [0], [1], [0, 0, 1, 1], [], []>} : vector<8x128xf32>, vector<128x512xf32>, vector<8x512xf32> -> vector<8x512xf32>
    %362 = arith.addf %359, %361 : vector<8x512xf32>
    %363 = vector.extract_strided_slice %362 {offsets = [0, 0], sizes = [8, 128], strides = [1, 1]} : vector<8x512xf32> to vector<8x128xf32>
    %364 = arith.negf %363 : vector<8x128xf32>
    %365 = math.exp %364 : vector<8x128xf32>
    %cst_116 = arith.constant 1.000000e+00 : f32
    %366 = vector.broadcast %cst_116 : f32 to vector<8x128xf32>
    %367 = arith.addf %366, %365 : vector<8x128xf32>
    %368 = arith.divf %366, %367 : vector<8x128xf32>
    %369 = vector.extract_strided_slice %362 {offsets = [0, 128], sizes = [8, 128], strides = [1, 1]} : vector<8x512xf32> to vector<8x128xf32>
    %370 = arith.negf %369 : vector<8x128xf32>
    %371 = math.exp %370 : vector<8x128xf32>
    %cst_117 = arith.constant 1.000000e+00 : f32
    %372 = vector.broadcast %cst_117 : f32 to vector<8x128xf32>
    %373 = arith.addf %372, %371 : vector<8x128xf32>
    %374 = arith.divf %372, %373 : vector<8x128xf32>
    %375 = vector.extract_strided_slice %362 {offsets = [0, 256], sizes = [8, 128], strides = [1, 1]} : vector<8x512xf32> to vector<8x128xf32>
    %376 = math.tanh %375 : vector<8x128xf32>
    %377 = vector.extract_strided_slice %362 {offsets = [0, 384], sizes = [8, 128], strides = [1, 1]} : vector<8x512xf32> to vector<8x128xf32>
    %378 = arith.negf %377 : vector<8x128xf32>
    %379 = math.exp %378 : vector<8x128xf32>
    %cst_118 = arith.constant 1.000000e+00 : f32
    %380 = vector.broadcast %cst_118 : f32 to vector<8x128xf32>
    %381 = arith.addf %380, %379 : vector<8x128xf32>
    %382 = arith.divf %380, %381 : vector<8x128xf32>
    %383 = arith.mulf %374, %351 : vector<8x128xf32>
    %384 = arith.mulf %368, %376 : vector<8x128xf32>
    %385 = arith.addf %383, %384 : vector<8x128xf32>
    %386 = math.tanh %385 : vector<8x128xf32>
    %387 = arith.mulf %382, %386 : vector<8x128xf32>
    %388 = arith.index_cast %357 : i32 to index
    %c0_119 = arith.constant 0 : index
    %389 = vector.load %arg14[%388, %c0_119] : memref<64x128xf32, #tpu.memory_space<vmem>>, vector<8x128xf32>
    tpu.vector_store %arg14[%388, %c0_119], %387 {strides = array<i32>} : memref<64x128xf32, #tpu.memory_space<vmem>>, vector<8x128xf32>,
    %c3_i32_120 = arith.constant 3 : i32
    %c8_i32_121 = arith.constant 8 : i32
    %390 = arith.muli %c3_i32_120, %c8_i32_121 : i32
    %391 = tpu.assume_multiple %390, 8 : i32
    %392 = arith.index_cast %391 : i32 to index
    %c0_122 = arith.constant 0 : index
    %393 = vector.load %arg13[%392, %c0_122] : memref<64x512xf32, #tpu.memory_space<vmem>>, vector<8x512xf32>
    %c0_123 = arith.constant 0 : index
    %c0_124 = arith.constant 0 : index
    %394 = vector.load %arg6[%c0_123, %c0_124] : memref<128x512xf32, #tpu.memory_space<vmem>>, vector<128x512xf32>
    %cst_125 = arith.constant dense<0.000000e+00> : vector<8x512xf32>
    %395 = tpu.matmul %387, %394, %cst_125 {dimension_numbers = #tpu.dot_dimension_numbers<[1], [0], [0], [1], [0, 0, 1, 1], [], []>} : vector<8x128xf32>, vector<128x512xf32>, vector<8x512xf32> -> vector<8x512xf32>
    %396 = arith.addf %393, %395 : vector<8x512xf32>
    %397 = vector.extract_strided_slice %396 {offsets = [0, 0], sizes = [8, 128], strides = [1, 1]} : vector<8x512xf32> to vector<8x128xf32>
    %398 = arith.negf %397 : vector<8x128xf32>
    %399 = math.exp %398 : vector<8x128xf32>
    %cst_126 = arith.constant 1.000000e+00 : f32
    %400 = vector.broadcast %cst_126 : f32 to vector<8x128xf32>
    %401 = arith.addf %400, %399 : vector<8x128xf32>
    %402 = arith.divf %400, %401 : vector<8x128xf32>
    %403 = vector.extract_strided_slice %396 {offsets = [0, 128], sizes = [8, 128], strides = [1, 1]} : vector<8x512xf32> to vector<8x128xf32>
    %404 = arith.negf %403 : vector<8x128xf32>
    %405 = math.exp %404 : vector<8x128xf32>
    %cst_127 = arith.constant 1.000000e+00 : f32
    %406 = vector.broadcast %cst_127 : f32 to vector<8x128xf32>
    %407 = arith.addf %406, %405 : vector<8x128xf32>
    %408 = arith.divf %406, %407 : vector<8x128xf32>
    %409 = vector.extract_strided_slice %396 {offsets = [0, 256], sizes = [8, 128], strides = [1, 1]} : vector<8x512xf32> to vector<8x128xf32>
    %410 = math.tanh %409 : vector<8x128xf32>
    %411 = vector.extract_strided_slice %396 {offsets = [0, 384], sizes = [8, 128], strides = [1, 1]} : vector<8x512xf32> to vector<8x128xf32>
    %412 = arith.negf %411 : vector<8x128xf32>
    %413 = math.exp %412 : vector<8x128xf32>
    %cst_128 = arith.constant 1.000000e+00 : f32
    %414 = vector.broadcast %cst_128 : f32 to vector<8x128xf32>
    %415 = arith.addf %414, %413 : vector<8x128xf32>
    %416 = arith.divf %414, %415 : vector<8x128xf32>
    %417 = arith.mulf %408, %385 : vector<8x128xf32>
    %418 = arith.mulf %402, %410 : vector<8x128xf32>
    %419 = arith.addf %417, %418 : vector<8x128xf32>
    %420 = math.tanh %419 : vector<8x128xf32>
    %421 = arith.mulf %416, %420 : vector<8x128xf32>
    %422 = arith.index_cast %391 : i32 to index
    %c0_129 = arith.constant 0 : index
    %423 = vector.load %arg14[%422, %c0_129] : memref<64x128xf32, #tpu.memory_space<vmem>>, vector<8x128xf32>
    tpu.vector_store %arg14[%422, %c0_129], %421 {strides = array<i32>} : memref<64x128xf32, #tpu.memory_space<vmem>>, vector<8x128xf32>,
    %c4_i32_130 = arith.constant 4 : i32
    %c8_i32_131 = arith.constant 8 : i32
    %424 = arith.muli %c4_i32_130, %c8_i32_131 : i32
    %425 = tpu.assume_multiple %424, 8 : i32
    %426 = arith.index_cast %425 : i32 to index
    %c0_132 = arith.constant 0 : index
    %427 = vector.load %arg13[%426, %c0_132] : memref<64x512xf32, #tpu.memory_space<vmem>>, vector<8x512xf32>
    %c0_133 = arith.constant 0 : index
    %c0_134 = arith.constant 0 : index
    %428 = vector.load %arg6[%c0_133, %c0_134] : memref<128x512xf32, #tpu.memory_space<vmem>>, vector<128x512xf32>
    %cst_135 = arith.constant dense<0.000000e+00> : vector<8x512xf32>
    %429 = tpu.matmul %421, %428, %cst_135 {dimension_numbers = #tpu.dot_dimension_numbers<[1], [0], [0], [1], [0, 0, 1, 1], [], []>} : vector<8x128xf32>, vector<128x512xf32>, vector<8x512xf32> -> vector<8x512xf32>
    %430 = arith.addf %427, %429 : vector<8x512xf32>
    %431 = vector.extract_strided_slice %430 {offsets = [0, 0], sizes = [8, 128], strides = [1, 1]} : vector<8x512xf32> to vector<8x128xf32>
    %432 = arith.negf %431 : vector<8x128xf32>
    %433 = math.exp %432 : vector<8x128xf32>
    %cst_136 = arith.constant 1.000000e+00 : f32
    %434 = vector.broadcast %cst_136 : f32 to vector<8x128xf32>
    %435 = arith.addf %434, %433 : vector<8x128xf32>
    %436 = arith.divf %434, %435 : vector<8x128xf32>
    %437 = vector.extract_strided_slice %430 {offsets = [0, 128], sizes = [8, 128], strides = [1, 1]} : vector<8x512xf32> to vector<8x128xf32>
    %438 = arith.negf %437 : vector<8x128xf32>
    %439 = math.exp %438 : vector<8x128xf32>
    %cst_137 = arith.constant 1.000000e+00 : f32
    %440 = vector.broadcast %cst_137 : f32 to vector<8x128xf32>
    %441 = arith.addf %440, %439 : vector<8x128xf32>
    %442 = arith.divf %440, %441 : vector<8x128xf32>
    %443 = vector.extract_strided_slice %430 {offsets = [0, 256], sizes = [8, 128], strides = [1, 1]} : vector<8x512xf32> to vector<8x128xf32>
    %444 = math.tanh %443 : vector<8x128xf32>
    %445 = vector.extract_strided_slice %430 {offsets = [0, 384], sizes = [8, 128], strides = [1, 1]} : vector<8x512xf32> to vector<8x128xf32>
    %446 = arith.negf %445 : vector<8x128xf32>
    %447 = math.exp %446 : vector<8x128xf32>
    %cst_138 = arith.constant 1.000000e+00 : f32
    %448 = vector.broadcast %cst_138 : f32 to vector<8x128xf32>
    %449 = arith.addf %448, %447 : vector<8x128xf32>
    %450 = arith.divf %448, %449 : vector<8x128xf32>
    %451 = arith.mulf %442, %419 : vector<8x128xf32>
    %452 = arith.mulf %436, %444 : vector<8x128xf32>
    %453 = arith.addf %451, %452 : vector<8x128xf32>
    %454 = math.tanh %453 : vector<8x128xf32>
    %455 = arith.mulf %450, %454 : vector<8x128xf32>
    %456 = arith.index_cast %425 : i32 to index
    %c0_139 = arith.constant 0 : index
    %457 = vector.load %arg14[%456, %c0_139] : memref<64x128xf32, #tpu.memory_space<vmem>>, vector<8x128xf32>
    tpu.vector_store %arg14[%456, %c0_139], %455 {strides = array<i32>} : memref<64x128xf32, #tpu.memory_space<vmem>>, vector<8x128xf32>,
    %c5_i32_140 = arith.constant 5 : i32
    %c8_i32_141 = arith.constant 8 : i32
    %458 = arith.muli %c5_i32_140, %c8_i32_141 : i32
    %459 = tpu.assume_multiple %458, 8 : i32
    %460 = arith.index_cast %459 : i32 to index
    %c0_142 = arith.constant 0 : index
    %461 = vector.load %arg13[%460, %c0_142] : memref<64x512xf32, #tpu.memory_space<vmem>>, vector<8x512xf32>
    %c0_143 = arith.constant 0 : index
    %c0_144 = arith.constant 0 : index
    %462 = vector.load %arg6[%c0_143, %c0_144] : memref<128x512xf32, #tpu.memory_space<vmem>>, vector<128x512xf32>
    %cst_145 = arith.constant dense<0.000000e+00> : vector<8x512xf32>
    %463 = tpu.matmul %455, %462, %cst_145 {dimension_numbers = #tpu.dot_dimension_numbers<[1], [0], [0], [1], [0, 0, 1, 1], [], []>} : vector<8x128xf32>, vector<128x512xf32>, vector<8x512xf32> -> vector<8x512xf32>
    %464 = arith.addf %461, %463 : vector<8x512xf32>
    %465 = vector.extract_strided_slice %464 {offsets = [0, 0], sizes = [8, 128], strides = [1, 1]} : vector<8x512xf32> to vector<8x128xf32>
    %466 = arith.negf %465 : vector<8x128xf32>
    %467 = math.exp %466 : vector<8x128xf32>
    %cst_146 = arith.constant 1.000000e+00 : f32
    %468 = vector.broadcast %cst_146 : f32 to vector<8x128xf32>
    %469 = arith.addf %468, %467 : vector<8x128xf32>
    %470 = arith.divf %468, %469 : vector<8x128xf32>
    %471 = vector.extract_strided_slice %464 {offsets = [0, 128], sizes = [8, 128], strides = [1, 1]} : vector<8x512xf32> to vector<8x128xf32>
    %472 = arith.negf %471 : vector<8x128xf32>
    %473 = math.exp %472 : vector<8x128xf32>
    %cst_147 = arith.constant 1.000000e+00 : f32
    %474 = vector.broadcast %cst_147 : f32 to vector<8x128xf32>
    %475 = arith.addf %474, %473 : vector<8x128xf32>
    %476 = arith.divf %474, %475 : vector<8x128xf32>
    %477 = vector.extract_strided_slice %464 {offsets = [0, 256], sizes = [8, 128], strides = [1, 1]} : vector<8x512xf32> to vector<8x128xf32>
    %478 = math.tanh %477 : vector<8x128xf32>
    %479 = vector.extract_strided_slice %464 {offsets = [0, 384], sizes = [8, 128], strides = [1, 1]} : vector<8x512xf32> to vector<8x128xf32>
    %480 = arith.negf %479 : vector<8x128xf32>
    %481 = math.exp %480 : vector<8x128xf32>
    %cst_148 = arith.constant 1.000000e+00 : f32
    %482 = vector.broadcast %cst_148 : f32 to vector<8x128xf32>
    %483 = arith.addf %482, %481 : vector<8x128xf32>
    %484 = arith.divf %482, %483 : vector<8x128xf32>
    %485 = arith.mulf %476, %453 : vector<8x128xf32>
    %486 = arith.mulf %470, %478 : vector<8x128xf32>
    %487 = arith.addf %485, %486 : vector<8x128xf32>
    %488 = math.tanh %487 : vector<8x128xf32>
    %489 = arith.mulf %484, %488 : vector<8x128xf32>
    %490 = arith.index_cast %459 : i32 to index
    %c0_149 = arith.constant 0 : index
    %491 = vector.load %arg14[%490, %c0_149] : memref<64x128xf32, #tpu.memory_space<vmem>>, vector<8x128xf32>
    tpu.vector_store %arg14[%490, %c0_149], %489 {strides = array<i32>} : memref<64x128xf32, #tpu.memory_space<vmem>>, vector<8x128xf32>,
    %c6_i32_150 = arith.constant 6 : i32
    %c8_i32_151 = arith.constant 8 : i32
    %492 = arith.muli %c6_i32_150, %c8_i32_151 : i32
    %493 = tpu.assume_multiple %492, 8 : i32
    %494 = arith.index_cast %493 : i32 to index
    %c0_152 = arith.constant 0 : index
    %495 = vector.load %arg13[%494, %c0_152] : memref<64x512xf32, #tpu.memory_space<vmem>>, vector<8x512xf32>
    %c0_153 = arith.constant 0 : index
    %c0_154 = arith.constant 0 : index
    %496 = vector.load %arg6[%c0_153, %c0_154] : memref<128x512xf32, #tpu.memory_space<vmem>>, vector<128x512xf32>
    %cst_155 = arith.constant dense<0.000000e+00> : vector<8x512xf32>
    %497 = tpu.matmul %489, %496, %cst_155 {dimension_numbers = #tpu.dot_dimension_numbers<[1], [0], [0], [1], [0, 0, 1, 1], [], []>} : vector<8x128xf32>, vector<128x512xf32>, vector<8x512xf32> -> vector<8x512xf32>
    %498 = arith.addf %495, %497 : vector<8x512xf32>
    %499 = vector.extract_strided_slice %498 {offsets = [0, 0], sizes = [8, 128], strides = [1, 1]} : vector<8x512xf32> to vector<8x128xf32>
    %500 = arith.negf %499 : vector<8x128xf32>
    %501 = math.exp %500 : vector<8x128xf32>
    %cst_156 = arith.constant 1.000000e+00 : f32
    %502 = vector.broadcast %cst_156 : f32 to vector<8x128xf32>
    %503 = arith.addf %502, %501 : vector<8x128xf32>
    %504 = arith.divf %502, %503 : vector<8x128xf32>
    %505 = vector.extract_strided_slice %498 {offsets = [0, 128], sizes = [8, 128], strides = [1, 1]} : vector<8x512xf32> to vector<8x128xf32>
    %506 = arith.negf %505 : vector<8x128xf32>
    %507 = math.exp %506 : vector<8x128xf32>
    %cst_157 = arith.constant 1.000000e+00 : f32
    %508 = vector.broadcast %cst_157 : f32 to vector<8x128xf32>
    %509 = arith.addf %508, %507 : vector<8x128xf32>
    %510 = arith.divf %508, %509 : vector<8x128xf32>
    %511 = vector.extract_strided_slice %498 {offsets = [0, 256], sizes = [8, 128], strides = [1, 1]} : vector<8x512xf32> to vector<8x128xf32>
    %512 = math.tanh %511 : vector<8x128xf32>
    %513 = vector.extract_strided_slice %498 {offsets = [0, 384], sizes = [8, 128], strides = [1, 1]} : vector<8x512xf32> to vector<8x128xf32>
    %514 = arith.negf %513 : vector<8x128xf32>
    %515 = math.exp %514 : vector<8x128xf32>
    %cst_158 = arith.constant 1.000000e+00 : f32
    %516 = vector.broadcast %cst_158 : f32 to vector<8x128xf32>
    %517 = arith.addf %516, %515 : vector<8x128xf32>
    %518 = arith.divf %516, %517 : vector<8x128xf32>
    %519 = arith.mulf %510, %487 : vector<8x128xf32>
    %520 = arith.mulf %504, %512 : vector<8x128xf32>
    %521 = arith.addf %519, %520 : vector<8x128xf32>
    %522 = math.tanh %521 : vector<8x128xf32>
    %523 = arith.mulf %518, %522 : vector<8x128xf32>
    %524 = arith.index_cast %493 : i32 to index
    %c0_159 = arith.constant 0 : index
    %525 = vector.load %arg14[%524, %c0_159] : memref<64x128xf32, #tpu.memory_space<vmem>>, vector<8x128xf32>
    tpu.vector_store %arg14[%524, %c0_159], %523 {strides = array<i32>} : memref<64x128xf32, #tpu.memory_space<vmem>>, vector<8x128xf32>,
    %c7_i32_160 = arith.constant 7 : i32
    %c8_i32_161 = arith.constant 8 : i32
    %526 = arith.muli %c7_i32_160, %c8_i32_161 : i32
    %527 = tpu.assume_multiple %526, 8 : i32
    %528 = arith.index_cast %527 : i32 to index
    %c0_162 = arith.constant 0 : index
    %529 = vector.load %arg13[%528, %c0_162] : memref<64x512xf32, #tpu.memory_space<vmem>>, vector<8x512xf32>
    %c0_163 = arith.constant 0 : index
    %c0_164 = arith.constant 0 : index
    %530 = vector.load %arg6[%c0_163, %c0_164] : memref<128x512xf32, #tpu.memory_space<vmem>>, vector<128x512xf32>
    %cst_165 = arith.constant dense<0.000000e+00> : vector<8x512xf32>
    %531 = tpu.matmul %523, %530, %cst_165 {dimension_numbers = #tpu.dot_dimension_numbers<[1], [0], [0], [1], [0, 0, 1, 1], [], []>} : vector<8x128xf32>, vector<128x512xf32>, vector<8x512xf32> -> vector<8x512xf32>
    %532 = arith.addf %529, %531 : vector<8x512xf32>
    %533 = vector.extract_strided_slice %532 {offsets = [0, 0], sizes = [8, 128], strides = [1, 1]} : vector<8x512xf32> to vector<8x128xf32>
    %534 = arith.negf %533 : vector<8x128xf32>
    %535 = math.exp %534 : vector<8x128xf32>
    %cst_166 = arith.constant 1.000000e+00 : f32
    %536 = vector.broadcast %cst_166 : f32 to vector<8x128xf32>
    %537 = arith.addf %536, %535 : vector<8x128xf32>
    %538 = arith.divf %536, %537 : vector<8x128xf32>
    %539 = vector.extract_strided_slice %532 {offsets = [0, 128], sizes = [8, 128], strides = [1, 1]} : vector<8x512xf32> to vector<8x128xf32>
    %540 = arith.negf %539 : vector<8x128xf32>
    %541 = math.exp %540 : vector<8x128xf32>
    %cst_167 = arith.constant 1.000000e+00 : f32
    %542 = vector.broadcast %cst_167 : f32 to vector<8x128xf32>
    %543 = arith.addf %542, %541 : vector<8x128xf32>
    %544 = arith.divf %542, %543 : vector<8x128xf32>
    %545 = vector.extract_strided_slice %532 {offsets = [0, 256], sizes = [8, 128], strides = [1, 1]} : vector<8x512xf32> to vector<8x128xf32>
    %546 = math.tanh %545 : vector<8x128xf32>
    %547 = vector.extract_strided_slice %532 {offsets = [0, 384], sizes = [8, 128], strides = [1, 1]} : vector<8x512xf32> to vector<8x128xf32>
    %548 = arith.negf %547 : vector<8x128xf32>
    %549 = math.exp %548 : vector<8x128xf32>
    %cst_168 = arith.constant 1.000000e+00 : f32
    %550 = vector.broadcast %cst_168 : f32 to vector<8x128xf32>
    %551 = arith.addf %550, %549 : vector<8x128xf32>
    %552 = arith.divf %550, %551 : vector<8x128xf32>
    %553 = arith.mulf %544, %521 : vector<8x128xf32>
    %554 = arith.mulf %538, %546 : vector<8x128xf32>
    %555 = arith.addf %553, %554 : vector<8x128xf32>
    %556 = math.tanh %555 : vector<8x128xf32>
    %557 = arith.mulf %552, %556 : vector<8x128xf32>
    %558 = arith.index_cast %527 : i32 to index
    %c0_169 = arith.constant 0 : index
    %559 = vector.load %arg14[%558, %c0_169] : memref<64x128xf32, #tpu.memory_space<vmem>>, vector<8x128xf32>
    tpu.vector_store %arg14[%558, %c0_169], %557 {strides = array<i32>} : memref<64x128xf32, #tpu.memory_space<vmem>>, vector<8x128xf32>,
    %c8_i32_170 = arith.constant 8 : i32
    %c0_171 = arith.constant 0 : index
    %c0_172 = arith.constant 0 : index
    %560 = vector.load %arg14[%c0_171, %c0_172] : memref<64x128xf32, #tpu.memory_space<vmem>>, vector<64x128xf32>
    %c0_173 = arith.constant 0 : index
    %c0_174 = arith.constant 0 : index
    %561 = vector.load %arg8[%c0_173, %c0_174] : memref<128x128xf32, #tpu.memory_space<vmem>>, vector<128x128xf32>
    %cst_175 = arith.constant dense<0.000000e+00> : vector<64x128xf32>
    %562 = tpu.matmul %560, %561, %cst_175 {dimension_numbers = #tpu.dot_dimension_numbers<[1], [0], [0], [1], [0, 0, 1, 1], [], []>} : vector<64x128xf32>, vector<128x128xf32>, vector<64x128xf32> -> vector<64x128xf32>
    %c0_176 = arith.constant 0 : index
    %c0_177 = arith.constant 0 : index
    %563 = vector.load %arg9[%c0_176, %c0_177] : memref<1x128xf32, #tpu.memory_space<vmem>>, vector<1x128xf32>
    %564 = vector.broadcast %563 : vector<1x128xf32> to vector<64x128xf32>
    %565 = arith.addf %562, %564 : vector<64x128xf32>
    %c0_178 = arith.constant 0 : index
    %c0_179 = arith.constant 0 : index
    %c0_180 = arith.constant 0 : index
    %566 = vector.load %arg10[%c0_178, %c0_179, %c0_180] : memref<1x64x128xf32, #tpu.memory_space<vmem>>, vector<1x64x128xf32>
    %567 = vector.shape_cast %566 : vector<1x64x128xf32> to vector<64x128xf32>
    %568 = vector.shape_cast %565 : vector<64x128xf32> to vector<1x64x128xf32>
    tpu.vector_store %arg10[%c0_178, %c0_179, %c0_180], %568 {strides = array<i32>} : memref<1x64x128xf32, #tpu.memory_space<vmem>>, vector<1x64x128xf32>,
    %c0_181 = arith.constant 0 : index
    %c0_182 = arith.constant 0 : index
    %c0_183 = arith.constant 0 : index
    %569 = vector.load %arg11[%c0_181, %c0_182, %c0_183] : memref<1x8x128xf32, #tpu.memory_space<vmem>>, vector<1x8x128xf32>
    %570 = vector.shape_cast %569 : vector<1x8x128xf32> to vector<8x128xf32>
    %571 = vector.shape_cast %557 : vector<8x128xf32> to vector<1x8x128xf32>
    tpu.vector_store %arg11[%c0_181, %c0_182, %c0_183], %571 {strides = array<i32>} : memref<1x8x128xf32, #tpu.memory_space<vmem>>, vector<1x8x128xf32>,
    %c0_184 = arith.constant 0 : index
    %c0_185 = arith.constant 0 : index
    %c0_186 = arith.constant 0 : index
    %572 = vector.load %arg12[%c0_184, %c0_185, %c0_186] : memref<1x8x128xf32, #tpu.memory_space<vmem>>, vector<1x8x128xf32>
    %573 = vector.shape_cast %572 : vector<1x8x128xf32> to vector<8x128xf32>
    %574 = vector.shape_cast %555 : vector<8x128xf32> to vector<1x8x128xf32>
    tpu.vector_store %arg12[%c0_184, %c0_185, %c0_186], %574 {strides = array<i32>} : memref<1x8x128xf32, #tpu.memory_space<vmem>>, vector<1x8x128xf32>,
    return
  }
  func.func @transform_0(%arg0: i32) -> (i32, i32, i32) {
    %c0_i32 = arith.constant 0 : i32
    %c0_i32_0 = arith.constant 0 : i32
    %c0_i32_1 = arith.constant 0 : i32
    return %arg0, %c0_i32, %c0_i32_0 : i32, i32, i32
  }
  func.func @transform_1(%arg0: i32) -> (i32, i32) {
    %c0_i32 = arith.constant 0 : i32
    %c0_i32_0 = arith.constant 0 : i32
    %c0_i32_1 = arith.constant 0 : i32
    return %c0_i32, %c0_i32_0 : i32, i32
  }
  func.func @transform_2(%arg0: i32) -> (i32, i32) {
    %c0_i32 = arith.constant 0 : i32
    %c0_i32_0 = arith.constant 0 : i32
    %c0_i32_1 = arith.constant 0 : i32
    return %c0_i32, %c0_i32_0 : i32, i32
  }
  func.func @transform_3(%arg0: i32) -> (i32, i32) {
    %c0_i32 = arith.constant 0 : i32
    %c0_i32_0 = arith.constant 0 : i32
    %c0_i32_1 = arith.constant 0 : i32
    return %c0_i32, %c0_i32_0 : i32, i32
  }
  func.func @transform_4(%arg0: i32) -> (i32, i32) {
    %c0_i32 = arith.constant 0 : i32
    %c0_i32_0 = arith.constant 0 : i32
    %c0_i32_1 = arith.constant 0 : i32
    return %c0_i32, %c0_i32_0 : i32, i32
  }
  func.func @transform_5(%arg0: i32) -> (i32, i32) {
    %c0_i32 = arith.constant 0 : i32
    %c0_i32_0 = arith.constant 0 : i32
    %c0_i32_1 = arith.constant 0 : i32
    return %c0_i32, %c0_i32_0 : i32, i32
  }
  func.func @transform_6(%arg0: i32) -> (i32, i32) {
    %c0_i32 = arith.constant 0 : i32
    %c0_i32_0 = arith.constant 0 : i32
    %c0_i32_1 = arith.constant 0 : i32
    return %c0_i32, %c0_i32_0 : i32, i32
  }
  func.func @transform_7(%arg0: i32) -> (i32, i32) {
    %c0_i32 = arith.constant 0 : i32
    %c0_i32_0 = arith.constant 0 : i32
    %c0_i32_1 = arith.constant 0 : i32
    return %c0_i32, %c0_i32_0 : i32, i32
  }
  func.func @transform_8(%arg0: i32) -> (i32, i32) {
    %c0_i32 = arith.constant 0 : i32
    %c0_i32_0 = arith.constant 0 : i32
    %c0_i32_1 = arith.constant 0 : i32
    return %c0_i32, %c0_i32_0 : i32, i32
  }
  func.func @transform_9(%arg0: i32) -> (i32, i32, i32) {
    %c0_i32 = arith.constant 0 : i32
    %c0_i32_0 = arith.constant 0 : i32
    %c0_i32_1 = arith.constant 0 : i32
    return %arg0, %c0_i32, %c0_i32_0 : i32, i32, i32
  }
  func.func @transform_10(%arg0: i32) -> (i32, i32, i32) {
    %c0_i32 = arith.constant 0 : i32
    %c0_i32_0 = arith.constant 0 : i32
    %c0_i32_1 = arith.constant 0 : i32
    return %arg0, %c0_i32, %c0_i32_0 : i32, i32, i32
  }
  func.func @transform_11(%arg0: i32) -> (i32, i32, i32) {
    %c0_i32 = arith.constant 0 : i32
    %c0_i32_0 = arith.constant 0 : i32
    %c0_i32_1 = arith.constant 0 : i32
    return %arg0, %c0_i32, %c0_i32_0 : i32, i32, i32
  }
}

</mosaic_0001>

<bundles_post_ra>
// kernel: tpu_custom_call.1
= control target key start
LH: loop header
LB: loop body
LE: loop exit
PB: predicated region body
PF: predicated region fallthrough
CT: control target
= control target key end

     0   :  { %s8246_s0 = inlined_call_operand.vmem [shape: f32[2,64,8], index: 0, kind: input, shape index: {}]   ;;  %s8247_s1 = inlined_call_operand.hbm [shape: f32[8,512], index: 1, kind: input, shape index: {}]   ;;  %s8248_s2 = inlined_call_operand.hbm [shape: f32[128,512], index: 2, kind: input, shape index: {}]   ;;  %s8249_s3 = inlined_call_operand.vmem [shape: f32[1,512], index: 3, kind: input, shape index: {}]   ;;  %s8250_s4 = inlined_call_operand.hbm [shape: f32[128,512], index: 4, kind: input, shape index: {}]   ;;  %s8251_s5 = inlined_call_operand.hbm [shape: f32[128,512], index: 5, kind: input, shape index: {}]   ;;  %s8252_s6 = inlined_call_operand.vmem [shape: f32[1,512], index: 6, kind: input, shape index: {}]   ;;  %s8253_s7 = inlined_call_operand.vmem [shape: f32[128,128], index: 7, kind: input, shape index: {}]   ;;  %s8254_s8 = inlined_call_operand.vmem [shape: f32[1,128], index: 8, kind: input, shape index: {}]   ;;  %s8255_s9 = inlined_call_operand.hbm [shape: f32[2,64,128], index: 9, kind: output, shape index: {0}]   ;;  %s8256_s10 = inlined_call_operand.hbm [shape: f32[2,8,128], index: 10, kind: output, shape index: {1}]   ;;  %s8257_s11 = inlined_call_operand.hbm [shape: f32[2,8,128], index: 11, kind: output, shape index: {2}]  }
   0x1   :  { %8395 = sst [smem:[#allocation69_spill]] %s8246_s0 }
   0x2   :  { %8396 = sst [smem:[#allocation70_spill]] %s8247_s1 }
   0x3   :  { %8397 = sst [smem:[#allocation71_spill]] %s8248_s2 }
   0x4   :  { %17 = vsyncpa [#allocation5], 0 }
   0x5   :  { %18 = vsyncpa [#allocation8], 0 }
   0x6   :  { %19 = vsyncpa [#allocation11], 0 }
   0x7   :  { %20 = vsyncpa [#allocation6], 0 }
   0x8   :  { %22 = vsyncpa [#allocation6 + $0x1], 0 }
   0x9   :  { %23 = vsyncpa [#allocation14], 0 }
   0xa   :  { %25 = vsyncpa [#allocation14 + $0x1], 0  ;;  %s5569_s17 = smov 0   ;;  %s5571_s18 = smov 0  }
   0xb   :  { %s5573_s19 = smov 0   ;;  %s5575_s20 = smov 0  }
   0xc LB: > { %8398 = sst [smem:[#allocation21_spill]] %s5486_s17  ;;  %s5590_s21 = sadd.s32 4294967295, %s5498_s20   ;;  %s5498_s20 = sphi %s5575_s20, %s8680_s20   ;;  %s5494_s19 = sphi %s5573_s19, %s8682_s19   ;;  %s5490_s18 = sphi %s5571_s18, %s8684_s18   ;;  %s5486_s17 = sphi %s5569_s17, %s8683_s17  }
   0xd   : > { %8399 = sst [smem:[#allocation22_spill]] %s5494_s19  ;;  %s8258_s22 = sadd.s32 4294967294, %s5498_s20  }
   0xe   : > { %s5594_s23 = sadd.s32 1, %s5498_s20   ;;  %s232_s24 = sadd.s32 1, %s5494_s19 }
   0xf   : > { %8400 = sst [smem:[#allocation23_spill]] %s5594_s23  ;;  %s229_s25 = ssub.s32 %s5498_s20, %s5594_s23 }
  0x10   : > { %p242_p0 = scmp.ne.s32.totalorder %s5494_s19, %s5490_s18  ;;  %p230_p1 = scmp.eq.s32.totalorder %s229_s25, 0 }
  0x11   : > { %p243_p2 = scmp.eq.s32.totalorder %s5590_s21, 1  ;;  %p248_p3 = scmp.ne.s32.totalorder %s5490_s18, %s5486_s17 }
  0x12   : > { %p249_p4 = scmp.eq.s32.totalorder %s8258_s22, 1  ;;  %p4783_p7 = scmp.ge.s32.totalorder %s5498_s20, 1 }
  0x13   : > { %s5607_s26 = scalar_select %p230_p1, %s5494_s19, %s232_s24  }
  0x14   : > { %p5609_p5 = por %p243_p2, %p242_p0  ;;  %p5613_p6 = por %p249_p4, %p248_p3 }
  0x15   : > { %8401 = sst [smem:[#allocation24_spill]] %s5607_s26  ;;  %p308_p8 = scmp.lt.s32.totalorder %s5498_s20, 3 }
  0x16   : > { %s8403_s28 = scalar_select %p5613_p6, 1, 0 }
  0x17   : > { %p4937_p9 = scmp.eq.s32.totalorder %s5590_s21, 0  ;;  %p5620_p10 = pnand %p4783_p7, %p308_p8 }
  0x18   : > { %8404 = sst [smem:[#allocation25_spill]] %s8403_s28  ;;  %s5500_s14 = smov [#allocation7]  }
  0x19   : > { %s8406_s2 = sld [smem:[#allocation71_spill]]  ;;  %p4914_p11 = pneg %p5620_p10 }
  0x1a   : > { %s333_s15 = sshll.u32 %s5500_s14, 4  ;;  %s8408_s1 = sld [smem:[#allocation70_spill]]  ;;  %s334_s15 = int_to_ptr.vmem [resolvable:$true] %s333_s15 }
  0x1b   : > { %p5631_p12 = pnand %p4937_p9, %p4914_p11  ;;  %s5501_s30 = smov 512  }
  0x1c   : > { %s5502_s12 = smov 32   ;;  %s5503_s14 = smov [#allocation4]  }
  0x1d   : > { %s348_s23 = sshll.u32 %s8250_s4, 4  ;;  %s5504_s28 = smov [#allocation9]   ;;  %s349_s23 = int_to_ptr.hbm [resolvable:$true] %s348_s23 }
  0x1e   : > { %s350_s17 = sshll.u32 %s5504_s28, 4  ;;  %s351_s17 = int_to_ptr.vmem [resolvable:$true] %s350_s17 }
  0x1f   : > { %s331_s13 = sshll.u32 %s8406_s2, 4  ;;  %s322_s2 = sshll.u32 %s5503_s14, 4  ;;  %s332_s13 = int_to_ptr.hbm [resolvable:$true] %s331_s13  ;;  %s323_s2 = int_to_ptr.vmem [resolvable:$true] %s322_s2 }
  0x20   : > { %s320_s22 = sshll.u32 %s8408_s1, 4  ;;  %s362_s1 = sshll.u32 %s8251_s5, 4  ;;  %s321_s22 = int_to_ptr.hbm [resolvable:$true] %s320_s22  ;;  %s363_s1 = int_to_ptr.hbm [resolvable:$true] %s362_s1 }
  0x21   : > { %4920 = dma.hbm_to_vmem [thread:$0]  (!%p5631_p12), %s332_s13, 8192, %s334_s15, [#allocation8], %s5501_s30, %s5501_s30, %s5502_s12  }
  0x22   : > { %4917 = dma.hbm_to_vmem [thread:$0]  (!%p5631_p12), %s321_s22, 512, %s323_s2, [#allocation5]  }
  0x23   : > { %4923 = dma.hbm_to_vmem [thread:$0]  (!%p5631_p12), %s349_s23, 8192, %s351_s17, [#allocation8], %s5501_s30, %s5501_s30, %s5502_s12  }
  0x24   : > { %s5505_s13 = smov [#allocation10]   ;;  %397 = sbr.rel (%p5620_p10) target bundleno = 2997 (0xbb5), region = 56 }
  0x25   : > { %s364_s15 = sshll.u32 %s5505_s13, 4  ;;  %s365_s15 = int_to_ptr.vmem [resolvable:$true] %s364_s15 }
  0x26   : > { %4926 = dma.hbm_to_vmem [thread:$0]  (!%p5631_p12), %s363_s1, 8192, %s365_s15, [#allocation11], %s5501_s30, %s5501_s30, %s5502_s12  }
  0x29   : > { %5465 = dma.done.wait (%p4937_p9), [#allocation5], 512  }
  0x2a   : > { %5467 = vsyncadd (%p4937_p9), [#allocation5], 4294966784 }
  0x2b   : > { %5469 = dma.done.wait (%p4937_p9), [#allocation8], 16384  }
  0x2c   : > { %5471 = vsyncadd (%p4937_p9), [#allocation8], 4294950912 }
  0x2d   : > { %5473 = dma.done.wait (%p4937_p9), [#allocation11], 8192  }
  0x2e   : > { %5475 = vsyncadd (%p4937_p9), [#allocation11], 4294959104  ;;  %p463_p13 = scmp.lt.s32.totalorder %s5590_s21, 1  ;;  %s8409_s0 = sld [smem:[#allocation69_spill]]  ;;  %vm490_vm0 = vcmask 64512   ;;  %v476_v0 = vld [vmem:[#allocation4] sm:$0xff] }
  0x2f   : > { %v478_v1 = vld [vmem:[#allocation4 + $0x10] sm:$0xff]  ;;  %4890 = vmatpush.msra.mxu1 %v476_v0  ;;  %4891 = vmatpush.msra.mxu3 %v476_v0  ;;  %v479_v5 = vld [vmem:[#allocation4 + $0x18] sm:$0xff]  ;;  %v477_v6 = vld [vmem:[#allocation4 + $0x8] sm:$0xff]  ;;  %s8139_s28 = sand.u32 1, %s5490_s18   ;;  %s4884_s25 = sshll.u32 %s5590_s21, 3 }
  0x30   : > { %s464_s1 = scalar_select %p463_p13, %s5590_s21, 1  ;;  %612 = vmatpush.msra.mxu2 %v478_v1  ;;  %v5688_v7 = vld [vmem:[#allocation7 + $0x1e0] sm:$0xff]  ;;  %v5693_v9 = vld [vmem:[#allocation7 + $0x1e8] sm:$0xff]  ;;  %530 = vmatpush.msra.mxu0 %v476_v0  ;;  %v5703_v12 = vld [vmem:[#allocation7 + $0x1f8] sm:$0xff] }
  0x31   : > { %653 = vmatpush.msrb.mxu3 %v479_v5  ;;  %571 = vmatpush.msrb.mxu1 %v477_v6  ;;  %v5690_v8 = vld [vmem:[#allocation7 + $0x1c0] sm:$0xff]  ;;  %v5698_v11 = vld [vmem:[#allocation7 + $0x1c8] sm:$0xff]  ;;  %v5714_v15 = vld [vmem:[#allocation7 + $0x1d8] sm:$0xff]  ;;  %s4794_s29 = sshll.u32 %s8139_s28, 6  ;;  %s4795_s14 = sshll.u32 %s8139_s28, 3 }
  0x32   : > { %s4888_s2 = sshll.u32 %s464_s1, 6  ;;  %782 = vmatpush.msrb.mxu2 %v5688_v7  ;;  %v5695_v10 = vld [vmem:[#allocation7 + $0x1a0] sm:$0xff]  ;;  %1001 = vmatpush.msrb.mxu0 %v5688_v7  ;;  %v5719_v17 = vld [vmem:[#allocation7 + $0x1a8] sm:$0xff]  ;;  %v5725_v18 = vld [vmem:[#allocation7 + $0x1b8] sm:$0xff]  ;;  %s8150_s12 = scalar_lea.vmem [#allocation12], %s4794_s29 }
  0x33   : > { %v5717_v16 = vld [vmem:[#allocation7 + $0x180] sm:$0xff]  ;;  %v5731_v20 = vld [vmem:[#allocation7 + $0x188] sm:$0xff]  ;;  %v5735_v21 = vld [vmem:[#allocation7 + $0x198] sm:$0xff]  ;;  %s8165_s24 = scalar_lea.vmem [#allocation15], %s4795_s14  ;;  %s4593_s1 = scalar_lea.hbm %s8256_s10, %s4884_s25 }
  0x34   : > { %s5671_s22 = scalar_lea.vmem %s8409_s0, %s4888_s2  ;;  %783 = vmatpush.msrb.mxu2 %v5690_v8  ;;  %1002 = vmatpush.msrb.mxu0 %v5690_v8  ;;  %v762_v19 = vld [vmem:[#allocation7 + $0x160] sm:$0xff]  ;;  %v5738_v23 = vld [vmem:[#allocation7 + $0x168] sm:$0xff]  ;;  %v5742_v24 = vld [vmem:[#allocation7 + $0x178] sm:$0xff]  ;;  %s4560_s2 = sand.u32 1, %s5590_s21  }
  0x35   : > { %v5674_v2 = vld [vmem:[%s5671_s22 + $0x20] sm:$0xff]  ;;  %v5677_v3 = vld [vmem:[%s5671_s22 + $0x28] sm:$0xff]  ;;  %v5707_v13 = vld [vmem:[%s5671_s22 + $0x30] sm:$0xff]  ;;  %s455_s17 = scalar_lea.vmem [#allocation13], %s4795_s14  ;;  %s4607_s29 = scalar_lea.hbm %s8257_s11, %s4884_s25 }
  0x36   : > { %v5680_v4 = vld [vmem:[%s5671_s22] sm:$0xff]  ;;  %4803 = vmatmul.msk.f32.vlgmr.msra.gmra.mxu1 %vm490_vm0, %v5674_v2  ;;  %4804 = vmatmul.msk.f32.vlgmr.msra.gmra.mxu3 %vm490_vm0, %v5677_v3  ;;  %v5710_v14 = vld [vmem:[%s5671_s22 + $0x8] sm:$0xff]  ;;  %v5747_v26 = vld [vmem:[%s5671_s22 + $0x38] sm:$0xff]  ;;  %s4595_s19 = sshll.u32 %s455_s17, 4  ;;  %s8180_s16 = scalar_lea.sflag [#allocation14], %s4560_s2  ;;  %s4596_s19 = int_to_ptr.vmem [resolvable:$true] %s4595_s19 }
  0x37   : > { %4815 = vmatmul.msk.f32.vlgmr.msra.gmra.mxu2 %vm490_vm0, %v5680_v4  ;;  %802 = vmatpush.msra.mxu1 %v5693_v9  ;;  %v758_v22 = vld [vmem:[#allocation7 + $0x140] sm:$0xff]  ;;  %v5750_v27 = vld [vmem:[%s5671_s22 + $0x10] sm:$0xff]  ;;  %v5753_v29 = vld [vmem:[#allocation7 + $0x148] sm:$0xff] }
  0x38   : > { %4799 = vmatmul.msk.f32.vlgmr.msra.gmra.mxu0 %vm490_vm0, %v5680_v4  ;;  %842 = vmatpush.msra.mxu3 %v5703_v12  ;;  %v754_v25 = vld [vmem:[#allocation7 + $0x120] sm:$0xff]  ;;  %v5760_v30 = vld [vmem:[#allocation7 + $0x158] sm:$0xff]  ;;  %v5766_v32 = vld [vmem:[#allocation7 + $0x128] sm:$0xff] }
  0x39   : > { %803 = vmatpush.msra.mxu1 %v5698_v11  ;;  %784 = vmatpush.msrb.mxu2 %v5695_v10  ;;  %v750_v28 = vld [vmem:[#allocation7 + $0x100] sm:$0xff]  ;;  %v5769_v33 = vld [vmem:[#allocation7 + $0x138] sm:$0xff]  ;;  %v5772_v35 = vld [vmem:[#allocation7 + $0x108] sm:$0xff] }
  0x3a   : > { %843 = vmatpush.msra.mxu3 %v5714_v15  ;;  %1003 = vmatpush.msrb.mxu0 %v5695_v10  ;;  %v746_v31 = vld [vmem:[#allocation7 + $0xe0] sm:$0xff]  ;;  %v5775_v36 = vld [vmem:[#allocation7 + $0x118] sm:$0xff]  ;;  %v5782_v40 = vld [vmem:[#allocation7 + $0xe8] sm:$0xff] }
  0x3b   : > { %785 = vmatpush.msrb.mxu2 %v5717_v16  ;;  %804 = vmatpush.msra.mxu1 %v5719_v17  ;;  %v742_v34 = vld [vmem:[#allocation7 + $0xc0] sm:$0xff]  ;;  %v5779_v38 = vld [vmem:[%s5671_s22 + $0x18] sm:$0xff]  ;;  %v5791_v42 = vld [vmem:[#allocation7 + $0xc8] sm:$0xff]  ;;  %s4597_s22 = sshll.u32 %s4593_s1, 4  ;;  %s4598_s22 = int_to_ptr.hbm [resolvable:$true] %s4597_s22 }
  0x3c   : > { %844 = vmatpush.msra.mxu3 %v5725_v18  ;;  %1004 = vmatpush.msrb.mxu0 %v5717_v16  ;;  %v738_v37 = vld [vmem:[#allocation7 + $0xa0] sm:$0xff]  ;;  %v5793_v43 = vld [vmem:[#allocation7 + $0xf8] sm:$0xff]  ;;  %v5799_v46 = vld [vmem:[#allocation7 + $0xa8] sm:$0xff]  ;;  %s5378_s30 = sshra.s32 %s4598_s22, 4  ;;  %s5379_s30 = int_to_ptr.hbm [resolvable:$true] %s5378_s30 }
  0x3d   : > { %786 = vmatpush.msrb.mxu2 %v762_v19  ;;  %805 = vmatpush.msra.mxu1 %v5731_v20  ;;  %v734_v39 = vld [vmem:[#allocation7 + $0x80] sm:$0xff]  ;;  %v5796_v44 = vld [vmem:[#allocation7 + $0xd8] sm:$0xff]  ;;  %v5810_v49 = vld [vmem:[#allocation7 + $0x88] sm:$0xff]  ;;  %s5380_s13 = scalar_lea.hbm %s5379_s30, 8  ;;  %p5385_p3 = scmp.lt.s32.totalorder %s5379_s30, %s8256_s10 }
  0x3e   : > { %4807 = vmatmul.msk.f32.vlgmr.msrb.gmra.mxu1 %vm490_vm0, %v5680_v4  ;;  %4805 = vmatmul.msk.f32.gmra.mxu3 %vm490_vm0, %v5707_v13  ;;  %v730_v41 = vld [vmem:[#allocation7 + $0x60] sm:$0xff]  ;;  %v5815_v50 = vld [vmem:[#allocation7 + $0x1f0] sm:$0xff]  ;;  %v5821_v51 = vld [vmem:[#allocation7 + $0xb8] sm:$0xff]  ;;  %p5381_p0 = scmp.ne.s32.totalorder %s5379_s30, %s5380_s13 }
  0x3f   : > { %4816 = vmatmul.msk.f32.gmra.mxu2 %vm490_vm0, %v5710_v14  ;;  %845 = vmatpush.msra.mxu3 %v5735_v21  ;;  %v726_v45 = vld [vmem:[#allocation7 + $0x40] sm:$0xff]  ;;  %v5823_v52 = vld [vmem:[#allocation7 + $0x68] sm:$0xff]  ;;  %v5826_v53 = vld [vmem:[#allocation7 + $0x1d0] sm:$0xff] }
  0x40   : > { %787 = vmatpush.msrb.mxu2 %v758_v22  ;;  %806 = vmatpush.msra.mxu1 %v5738_v23  ;;  %v5802_v47 = vld [vmem:[#allocation7 + $0x20] sm:$0xff]  ;;  %v5829_v54 = vld [vmem:[#allocation7 + $0x98] sm:$0xff]  ;;  %v5833_v55 = vld [vmem:[#allocation7 + $0x48] sm:$0xff]  ;;  %p5382_p1 = pnand %p5381_p0, %p5609_p5 }
  0x41   : > { %846 = vmatpush.msra.mxu3 %v5742_v24  ;;  %4800 = vmatmul.msk.f32.gmra.mxu0 %vm490_vm0, %v5710_v14  ;;  %v5808_v48 = vld [vmem:[#allocation7] sm:$0xff]  ;;  %v5835_v56 = vld [vmem:[#allocation7 + $0x1b0] sm:$0xff]  ;;  %v5844_v58 = vld [vmem:[#allocation7 + $0x28] sm:$0xff] }
  0x42   : > { %788 = vmatpush.msrb.mxu2 %v754_v25  ;;  %807 = vmatpush.msra.mxu1 %v5753_v29  ;;  %v5842_v57 = vld [vmem:[#allocation7 + $0x190] sm:$0xff]  ;;  %v5856_v60 = vld [vmem:[#allocation7 + $0x8] sm:$0xff]  ;;  %v5858_v61 = vld [vmem:[#allocation7 + $0x78] sm:$0xff]  ;;  %p5383_p2 = pneg %p5382_p1 }
  0x43   : > { %847 = vmatpush.msra.mxu3 %v5760_v30  ;;  %1005 = vmatpush.msrb.mxu0 %v762_v19  ;;  %v5854_v59 = vld [vmem:[#allocation7 + $0x170] sm:$0xff]  ;;  %v5862_v62 = vld [vmem:[#allocation7 + $0x58] sm:$0xff] }
  0x44   : > { %789 = vmatpush.msrb.mxu2 %v750_v28  ;;  %808 = vmatpush.msra.mxu1 %v5766_v32  ;;  %v5864_v63 = vld [vmem:[#allocation7 + $0x150] sm:$0xff]  ;;  %v5886_v5 = vld [vmem:[#allocation7 + $0x38] sm:$0xff] }
  0x45   : > { %848 = vmatpush.msra.mxu3 %v5769_v33  ;;  %1006 = vmatpush.msrb.mxu0 %v758_v22  ;;  %v5869_v0 = vld [vmem:[#allocation7 + $0x130] sm:$0xff]  ;;  %v5888_v6 = vld [vmem:[#allocation7 + $0x18] sm:$0xff] }
  0x46   : > { %4808 = vmatmul.msk.f32.gmra.mxu1 %vm490_vm0, %v5710_v14  ;;  %4806 = vmatmul.msk.f32.gmra.mxu3 %vm490_vm0, %v5747_v26  ;;  %v5874_v1 = vld [vmem:[#allocation7 + $0x110] sm:$0xff] }
  0x47   : > { %4817 = vmatmul.msk.f32.gmra.mxu2 %vm490_vm0, %v5750_v27  ;;  %809 = vmatpush.msra.mxu1 %v5772_v35  ;;  %v5898_v19 = vld [vmem:[#allocation7 + $0xb0] sm:$0xff] }
  0x48   : > { %790 = vmatpush.msrb.mxu2 %v746_v31  ;;  %849 = vmatpush.msra.mxu3 %v5775_v36  ;;  %v5904_v22 = vld [vmem:[#allocation7 + $0x90] sm:$0xff] }
  0x49   : > { %1007 = vmatpush.msrb.mxu0 %v754_v25  ;;  %810 = vmatpush.msra.mxu1 %v5782_v40  ;;  %v5915_v25 = vld [vmem:[#allocation7 + $0x70] sm:$0xff] }
  0x4a   : > { %791 = vmatpush.msrb.mxu2 %v742_v34  ;;  %850 = vmatpush.msra.mxu3 %v5793_v43 }
  0x4b   : > { %1008 = vmatpush.msrb.mxu0 %v750_v28  ;;  %811 = vmatpush.msra.mxu1 %v5791_v42  ;;  %v5925_v28 = vld [vmem:[#allocation7 + $0x30] sm:$0xff] }
  0x4c   : > { %792 = vmatpush.msrb.mxu2 %v738_v37  ;;  %851 = vmatpush.msra.mxu3 %v5796_v44 }
  0x4d   : > { %4801 = vmatmul.msk.f32.gmra.mxu0 %vm490_vm0, %v5750_v27  ;;  %812 = vmatpush.msra.mxu1 %v5799_v46 }
  0x4e   : > { %4809 = vmatmul.msk.f32.gmra.mxu1 %vm490_vm0, %v5750_v27  ;;  %4823 = vmatmul.msk.f32.vlgmr.msrb.gmra.mxu3 %vm490_vm0, %v5680_v4  ;;  %v5884_v4 = vld [vmem:[#allocation7 + $0xf0] sm:$0xff] }
  0x4f   : > { %4818 = vmatmul.msk.f32.gmra.mxu2 %vm490_vm0, %v5779_v38  ;;  %1009 = vmatpush.msrb.mxu0 %v746_v31 }
  0x50   : > { %793 = vmatpush.msrb.mxu2 %v734_v39  ;;  %813 = vmatpush.msra.mxu1 %v5810_v49 }
  0x51   : > { %852 = vmatpush.msra.mxu3 %v5821_v51  ;;  %1010 = vmatpush.msrb.mxu0 %v742_v34 }
  0x52   : > { %794 = vmatpush.msrb.mxu2 %v730_v41  ;;  %814 = vmatpush.msra.mxu1 %v5823_v52 }
  0x53   : > { %853 = vmatpush.msra.mxu3 %v5829_v54  ;;  %1011 = vmatpush.msrb.mxu0 %v738_v37 }
  0x54   : > { %795 = vmatpush.msrb.mxu2 %v726_v45  ;;  %815 = vmatpush.msra.mxu1 %v5833_v55 }
  0x55   : > { %4802 = vmatmul.msk.f32.gmra.mxu0 %vm490_vm0, %v5779_v38  ;;  %854 = vmatpush.msra.mxu3 %v5858_v61 }
  0x56   : > { %4810 = vmatmul.msk.f32.gmra.mxu1 %vm490_vm0, %v5779_v38  ;;  %796 = vmatpush.msrb.mxu2 %v5802_v47 }
  0x57   : > { %4819 = vmatmul.msk.f32.gmra.mxu2 %vm490_vm0, %v5674_v2  ;;  %4824 = vmatmul.msk.f32.gmra.mxu3 %vm490_vm0, %v5710_v14  ;;  %v5892_v14 = vld [vmem:[#allocation7 + $0xd0] sm:$0xff] }
  0x58   : > { %797 = vmatpush.msrb.mxu2 %v5808_v48  ;;  %1012 = vmatpush.msrb.mxu0 %v734_v39 }
  0x59   : > { %816 = vmatpush.msra.mxu1 %v5844_v58  ;;  %855 = vmatpush.msra.mxu3 %v5862_v62 }
  0x5a   : > { %822 = vmatpush.msra.mxu2 %v5815_v50  ;;  %1013 = vmatpush.msrb.mxu0 %v730_v41 }
  0x5b   : > { %817 = vmatpush.msra.mxu1 %v5856_v60  ;;  %856 = vmatpush.msra.mxu3 %v5886_v5 }
  0x5c   : > { %823 = vmatpush.msra.mxu2 %v5826_v53  ;;  %1014 = vmatpush.msrb.mxu0 %v726_v45 }
  0x5d   : > { %1021 = vmatpush.msrb.mxu1 %v5693_v9  ;;  %857 = vmatpush.msra.mxu3 %v5888_v6 }
  0x5e   : > { %824 = vmatpush.msra.mxu2 %v5835_v56  ;;  %4811 = vmatmul.msk.f32.gmra.mxu1 %vm490_vm0, %v5674_v2 }
  0x5f   : > { %4820 = vmatmul.msk.f32.gmra.mxu2 %vm490_vm0, %v5677_v3  ;;  %4825 = vmatmul.msk.f32.gmra.mxu3 %vm490_vm0, %v5750_v27  ;;  %v5919_v27 = vld [vmem:[#allocation7 + $0x50] sm:$0xff] }
  0x60   : > { %825 = vmatpush.msra.mxu2 %v5842_v57  ;;  %1022 = vmatpush.msrb.mxu1 %v5698_v11 }
  0x61   : > { %1015 = vmatpush.msrb.mxu0 %v5802_v47  ;;  %1061 = vmatpush.msrb.mxu3 %v5703_v12 }
  0x62   : > { %826 = vmatpush.msra.mxu2 %v5854_v59  ;;  %1023 = vmatpush.msrb.mxu1 %v5719_v17 }
  0x63   : > { %1016 = vmatpush.msrb.mxu0 %v5808_v48  ;;  %1062 = vmatpush.msrb.mxu3 %v5714_v15 }
  0x64   : > { %827 = vmatpush.msra.mxu2 %v5864_v63  ;;  %1024 = vmatpush.msrb.mxu1 %v5731_v20 }
  0x65   : > { %1063 = vmatpush.msrb.mxu3 %v5725_v18  ;;  %1221 = vmatpush.msra.mxu0 %v5688_v7  ;;  %v5506_v7 = vmov 0.0  }
  0x66   : > { %4812 = vmatmul.msk.f32.gmra.mxu1 %vm490_vm0, %v5677_v3  ;;  %828 = vmatpush.msra.mxu2 %v5869_v0 }
  0x67   : > { %4821 = vmatmul.msk.f32.gmra.mxu2 %vm490_vm0, %v5707_v13  ;;  %4826 = vmatmul.msk.f32.gmra.mxu3 %vm490_vm0, %v5779_v38 }
  0x68   : > { %829 = vmatpush.msra.mxu2 %v5874_v1  ;;  %1025 = vmatpush.msrb.mxu1 %v5738_v23 }
  0x69   : > { %1064 = vmatpush.msrb.mxu3 %v5735_v21  ;;  %1222 = vmatpush.msra.mxu0 %v5690_v8 }
  0x6a   : > { %830 = vmatpush.msra.mxu2 %v5884_v4  ;;  %1026 = vmatpush.msrb.mxu1 %v5753_v29 }
  0x6b   : > { %1065 = vmatpush.msrb.mxu3 %v5742_v24  ;;  %1223 = vmatpush.msra.mxu0 %v5695_v10 }
  0x6c   : > { %831 = vmatpush.msra.mxu2 %v5892_v14  ;;  %1027 = vmatpush.msrb.mxu1 %v5766_v32 }
  0x6d   : > { %1066 = vmatpush.msrb.mxu3 %v5760_v30  ;;  %1224 = vmatpush.msra.mxu0 %v5717_v16 }
  0x6e   : > { %4813 = vmatmul.msk.f32.gmra.mxu1 %vm490_vm0, %v5707_v13  ;;  %832 = vmatpush.msra.mxu2 %v5898_v19 }
  0x6f   : > { %4822 = vmatmul.msk.f32.gmra.mxu2 %vm490_vm0, %v5747_v26  ;;  %4827 = vmatmul.msk.f32.gmra.mxu3 %vm490_vm0, %v5674_v2  ;;  %v5931_v2 = vld [vmem:[#allocation7 + $0x10] sm:$0xff] }
  0x70   : > { %833 = vmatpush.msra.mxu2 %v5904_v22  ;;  %1028 = vmatpush.msrb.mxu1 %v5772_v35 }
  0x71   : > { %1067 = vmatpush.msrb.mxu3 %v5769_v33 }
  0x72   : > { %834 = vmatpush.msra.mxu2 %v5915_v25  ;;  %1029 = vmatpush.msrb.mxu1 %v5782_v40 }
  0x73   : > { %1068 = vmatpush.msrb.mxu3 %v5775_v36 }
  0x74   : > { %835 = vmatpush.msra.mxu2 %v5919_v27  ;;  %1030 = vmatpush.msrb.mxu1 %v5791_v42 }
  0x75   : > { %1069 = vmatpush.msrb.mxu3 %v5793_v43 }
  0x76   : > { %4814 = vmatmul.msk.f32.gmra.mxu1 %vm490_vm0, %v5747_v26  ;;  %836 = vmatpush.msra.mxu2 %v5925_v28 }
  0x77   : > { %4828 = vmatmul.msk.f32.gmra.mxu3 %vm490_vm0, %v5677_v3  ;;  %798 = vmatmul.f32.vlgmr.msrb.gmra.mxu2 %v5506_v7 }
  0x78   : > { %837 = vmatpush.msra.mxu2 %v5931_v2  ;;  %1031 = vmatpush.msrb.mxu1 %v5799_v46 }
  0x79   : > { %1070 = vmatpush.msrb.mxu3 %v5796_v44 }
  0x7a   : > { %1041 = vmatpush.msrb.mxu2 %v5815_v50  ;;  %1032 = vmatpush.msrb.mxu1 %v5810_v49 }
  0x7b   : > { %1071 = vmatpush.msrb.mxu3 %v5821_v51 }
  0x7c   : > { %1042 = vmatpush.msrb.mxu2 %v5826_v53  ;;  %1033 = vmatpush.msrb.mxu1 %v5823_v52 }
  0x7d   : > { %1072 = vmatpush.msrb.mxu3 %v5829_v54 }
  0x7e   : > { %1043 = vmatpush.msrb.mxu2 %v5835_v56  ;;  %818 = vmatmul.f32.vlgmr.msra.gmra.mxu1 %v5506_v7 }
  0x7f   : > { %4829 = vmatmul.msk.f32.gmra.mxu3 %vm490_vm0, %v5707_v13  ;;  %838 = vmatmul.f32.vlgmr.msra.gmra.mxu2 %v5506_v7 }
  0x80   : > { %1044 = vmatpush.msrb.mxu2 %v5842_v57  ;;  %1034 = vmatpush.msrb.mxu1 %v5833_v55 }
  0x81   : > { %1073 = vmatpush.msrb.mxu3 %v5858_v61 }
  0x82   : > { %1045 = vmatpush.msrb.mxu2 %v5854_v59  ;;  %1035 = vmatpush.msrb.mxu1 %v5844_v58 }
  0x83   : > { %1074 = vmatpush.msrb.mxu3 %v5862_v62 }
  0x84   : > { %1046 = vmatpush.msrb.mxu2 %v5864_v63  ;;  %1036 = vmatpush.msrb.mxu1 %v5856_v60 }
  0x85   : > { %1075 = vmatpush.msrb.mxu3 %v5886_v5 }
  0x86   : > { %1047 = vmatpush.msrb.mxu2 %v5869_v0  ;;  %1241 = vmatpush.msra.mxu1 %v5693_v9 }
  0x87   : > { %4830 = vmatmul.msk.f32.gmra.mxu3 %vm490_vm0, %v5747_v26 }
  0x88   : > { %1048 = vmatpush.msrb.mxu2 %v5874_v1  ;;  %1076 = vmatpush.msrb.mxu3 %v5888_v6 }
  0x89   : > { %1242 = vmatpush.msra.mxu1 %v5698_v11 }
  0x8a   : > { %1049 = vmatpush.msrb.mxu2 %v5884_v4 }
  0x8b   : > { %1243 = vmatpush.msra.mxu1 %v5719_v17 }
  0x8c   : > { %1050 = vmatpush.msrb.mxu2 %v5892_v14 }
  0x8d   : > { %1244 = vmatpush.msra.mxu1 %v5731_v20 }
  0x8e   : > { %1051 = vmatpush.msrb.mxu2 %v5898_v19 }
  0x8f   : > { %858 = vmatmul.f32.vlgmr.msra.gmra.mxu3 %v5506_v7  ;;  %1245 = vmatpush.msra.mxu1 %v5738_v23 }
  0x90   : > { %1052 = vmatpush.msrb.mxu2 %v5904_v22  ;;  %1281 = vmatpush.msra.mxu3 %v5703_v12 }
  0x91   : > { %1246 = vmatpush.msra.mxu1 %v5753_v29 }
  0x92   : > { %1053 = vmatpush.msrb.mxu2 %v5915_v25  ;;  %1282 = vmatpush.msra.mxu3 %v5714_v15 }
  0x93   : > { %1247 = vmatpush.msra.mxu1 %v5766_v32 }
  0x94   : > { %1054 = vmatpush.msrb.mxu2 %v5919_v27  ;;  %1283 = vmatpush.msra.mxu3 %v5725_v18 }
  0x95   : > { %1248 = vmatpush.msra.mxu1 %v5772_v35  ;;  %v480_v35 = vld [vmem:[%s8249_s3] sm:$0xf] }
  0x96   : > { %1055 = vmatpush.msrb.mxu2 %v5925_v28  ;;  %1284 = vmatpush.msra.mxu3 %v5735_v21  ;;  %v6078_v41 = vperm.slane %v480_v35, 1 }
  0x97   : > { %1249 = vmatpush.msra.mxu1 %v5782_v40  ;;  %v6076_v40 = vperm.slane %v480_v35, 0 }
  0x98   : > { %1056 = vmatpush.msrb.mxu2 %v5931_v2  ;;  %1285 = vmatpush.msra.mxu3 %v5742_v24  ;;  %8427 = vst [vmem:[#allocation43_spill] sm:$0xff] %v6078_v41 }
  0x99   : > { %1250 = vmatpush.msra.mxu1 %v5791_v42  ;;  %8426 = vst [vmem:[#allocation42_spill] sm:$0xff] %v6076_v40 }
  0x9a   : > { %1261 = vmatpush.msra.mxu2 %v5815_v50  ;;  %1286 = vmatpush.msra.mxu3 %v5760_v30 }
  0x9b   : > { %1251 = vmatpush.msra.mxu1 %v5799_v46 }
  0x9c   : > { %1262 = vmatpush.msra.mxu2 %v5826_v53  ;;  %1287 = vmatpush.msra.mxu3 %v5769_v33 }
  0x9d   : > { %1252 = vmatpush.msra.mxu1 %v5810_v49 }
  0x9e   : > { %1263 = vmatpush.msra.mxu2 %v5835_v56  ;;  %1288 = vmatpush.msra.mxu3 %v5775_v36 }
  0x9f   : > { %1253 = vmatpush.msra.mxu1 %v5823_v52 }
  0xa0   : > { %1264 = vmatpush.msra.mxu2 %v5842_v57  ;;  %1289 = vmatpush.msra.mxu3 %v5793_v43  ;;  %v6088_v57 = vperm.slane %v480_v35, 3 }
  0xa1   : > { %1254 = vmatpush.msra.mxu1 %v5833_v55 }
  0xa2   : > { %1265 = vmatpush.msra.mxu2 %v5854_v59  ;;  %1290 = vmatpush.msra.mxu3 %v5796_v44  ;;  %8431 = vst [vmem:[#allocation47_spill] sm:$0xff] %v6088_v57 }
  0xa3   : > { %1255 = vmatpush.msra.mxu1 %v5844_v58 }
  0xa4   : > { %1266 = vmatpush.msra.mxu2 %v5864_v63  ;;  %1291 = vmatpush.msra.mxu3 %v5821_v51 }
  0xa5   : > { %1256 = vmatpush.msra.mxu1 %v5856_v60 }
  0xa6   : > { %1267 = vmatpush.msra.mxu2 %v5869_v0  ;;  %1292 = vmatpush.msra.mxu3 %v5829_v54 }
  0xa8   : > { %1268 = vmatpush.msra.mxu2 %v5874_v1  ;;  %1293 = vmatpush.msra.mxu3 %v5858_v61 }
  0xaa   : > { %1269 = vmatpush.msra.mxu2 %v5884_v4  ;;  %1294 = vmatpush.msra.mxu3 %v5862_v62  ;;  %v6091_v4 = vperm.slane %v480_v35, 2 }
  0xac   : > { %1270 = vmatpush.msra.mxu2 %v5892_v14  ;;  %1295 = vmatpush.msra.mxu3 %v5886_v5  ;;  %8432 = vst [vmem:[#allocation48_spill] sm:$0xff] %v6091_v4 }
  0xae   : > { %1271 = vmatpush.msra.mxu2 %v5898_v19  ;;  %1296 = vmatpush.msra.mxu3 %v5888_v6 }
  0xb0   : > { %1272 = vmatpush.msra.mxu2 %v5904_v22 }
  0xb2   : > { %1273 = vmatpush.msra.mxu2 %v5915_v25 }
  0xb3   : > { %v6026_v3 = vpop.f32.mrf.mxu1 }
  0xb4   : > { %8410 = vst [vmem:[#allocation26_spill] sm:$0xff] %v6026_v3  ;;  %1274 = vmatpush.msra.mxu2 %v5919_v27 }
  0xb5   : > { %v532_v39 = vpop.f32.mrf.mxu0 }
  0xb6   : > { %1275 = vmatpush.msra.mxu2 %v5925_v28  ;;  %v533_v42 = vadd.f32 %v532_v39, %v6076_v40 }
  0xb8   : > { %1276 = vmatpush.msra.mxu2 %v5931_v2 }
  0xb9   : > { %v6031_v8 = vpop.f32.mrf.mxu3 }
  0xba   : > { %8411 = vst [vmem:[#allocation27_spill] sm:$0xff] %v6031_v8  ;;  %v614_v9 = vpop.f32.mrf.mxu2 }
  0xbb   : > { %v573_v10 = vpop.f32.mrf.mxu1  ;;  %v615_v25 = vadd.f32 %v614_v9, %v6091_v4 }
  0xbc   : > { %v574_v43 = vadd.f32 %v573_v10, %v6078_v41 }
  0xc1   : > { %v6033_v11 = vpop.f32.mrf.mxu3 }
  0xc2   : > { %8412 = vst [vmem:[#allocation28_spill] sm:$0xff] %v6033_v11  ;;  %v6035_v12 = vpop.f32.mrf.mxu2  ;;  %v6258_v11 = vld [vmem:[#allocation7 + $0xf8] sm:$0xff] }
  0xc3   : > { %v6037_v13 = vpop.f32.mrf.mxu1 }
  0xc9   : > { %v6039_v15 = vpop.f32.mrf.mxu3 }
  0xca   : > { %8413 = vst [vmem:[#allocation29_spill] sm:$0xff] %v6039_v15  ;;  %v6041_v16 = vpop.f32.mrf.mxu2  ;;  %v6238_v15 = vld [vmem:[#allocation7 + $0x138] sm:$0xff] }
  0xcb   : > { %v6043_v17 = vpop.f32.mrf.mxu1  ;;  %8447 = vst [vmem:[#allocation61_spill] sm:$0xff] %v6238_v15 }
  0xd1   : > { %v655_v20 = vpop.f32.mrf.mxu3 }
  0xd2   : > { %v6045_v18 = vpop.f32.mrf.mxu2  ;;  %v656_v62 = vadd.f32 %v655_v20, %v6088_v57  ;;  %v577_v20 = vadd.f32 %v6037_v13, %v6078_v41 }
  0xd3   : > { %8414 = vst [vmem:[#allocation30_spill] sm:$0xff] %v6045_v18  ;;  %v6047_v21 = vpop.f32.mrf.mxu1  ;;  %v6280_v18 = vld [vmem:[#allocation7 + $0xb0] sm:$0xff] }
  0xd4   : > { %8415 = vst [vmem:[#allocation31_spill] sm:$0xff] %v6047_v21  ;;  %v6304_v21 = vld [vmem:[#allocation7 + $0x78] sm:$0xff] }
  0xd5   : > { %8451 = vst [vmem:[#allocation65_spill] sm:$0xff] %v6304_v21 }
  0xda   : > { %v6049_v23 = vpop.f32.mrf.mxu2  ;;  %v6051_v24 = vpop.f32.mrf.mxu3 }
  0xdb   : > { %8416 = vst [vmem:[#allocation32_spill] sm:$0xff] %v6049_v23  ;;  %v6053_v26 = vpop.f32.mrf.mxu1  ;;  %v659_v13 = vadd.f32 %v6051_v24, %v6088_v57  ;;  %v6268_v23 = vld [vmem:[#allocation7 + $0xc8] sm:$0xff] }
  0xdc   : > { %8417 = vst [vmem:[#allocation33_spill] sm:$0xff] %v6053_v26  ;;  %v6272_v26 = vld [vmem:[#allocation7 + $0xd8] sm:$0xff] }
  0xe2   : > { %v6055_v29 = vpop.f32.mrf.mxu2  ;;  %v6057_v30 = vpop.f32.mrf.mxu3 }
  0xe3   : > { %8418 = vst [vmem:[#allocation34_spill] sm:$0xff] %v6055_v29  ;;  %v6059_v31 = vpop.f32.mrf.mxu1  ;;  %v580_v29 = vadd.f32 %v6043_v17, %v6078_v41 }
  0xe4   : > { %8419 = vst [vmem:[#allocation35_spill] sm:$0xff] %v6059_v31 }
  0xea   : > { %v6061_v32 = vpop.f32.mrf.mxu2  ;;  %v6063_v33 = vpop.f32.mrf.mxu3 }
  0xeb   : > { %8420 = vst [vmem:[#allocation36_spill] sm:$0xff] %v6061_v32  ;;  %v6065_v34 = vpop.f32.mrf.mxu1  ;;  %v6248_v32 = vld [vmem:[#allocation7 + $0x118] sm:$0xff] }
  0xec   : > { %8421 = vst [vmem:[#allocation37_spill] sm:$0xff] %v6063_v33  ;;  %v6282_v33 = vld [vmem:[#allocation7 + $0xb8] sm:$0xff] }
  0xed   : > { %8422 = vst [vmem:[#allocation38_spill] sm:$0xff] %v6065_v34  ;;  %v6256_v34 = vld [vmem:[#allocation7 + $0xf0] sm:$0xff] }
  0xf2   : > { %v6070_v36 = vpop.f32.mrf.mxu2  ;;  %v6072_v37 = vpop.f32.mrf.mxu3 }
  0xf3   : > { %8423 = vst [vmem:[#allocation39_spill] sm:$0xff] %v6070_v36  ;;  %v6074_v38 = vpop.f32.mrf.mxu1 }
  0xf4   : > { %8424 = vst [vmem:[#allocation40_spill] sm:$0xff] %v6072_v37  ;;  %v6270_v37 = vld [vmem:[#allocation7 + $0xd0] sm:$0xff] }
  0xf5   : > { %8425 = vst [vmem:[#allocation41_spill] sm:$0xff] %v6074_v38 }
  0xfa   : > { %v6082_v44 = vpop.f32.mrf.mxu3  ;;  %v799_v45 = vpop.f32.mrf.mxu2 }
  0xfb   : > { %8428 = vst [vmem:[#allocation44_spill] sm:$0xff] %v6082_v44  ;;  %v862_v46 = vadd.f32 %v799_v45, %v533_v42  ;;  %v819_v47 = vpop.f32.mrf.mxu1 }
  0xfc   : > { %v863_v48 = vadd.f32 %v819_v47, %v574_v43 }
  0xfd   : > { %v4831_v49 = vmul.f32 -1.442695, %v862_v46 }
  0xfe   : > { %v4832_v50 = vmul.f32 -1.442695, %v863_v48 }
  0xff   : > { %4988 = vpow2.f32 %v4831_v49 }
 0x100   : > { %4990 = vpow2.f32 %v4832_v50 }
 0x102   : > { %v6084_v51 = vpop.f32.mrf.mxu3  ;;  %v839_v19 = vpop.f32.mrf.mxu2 }
 0x103   : > { %8429 = vst [vmem:[#allocation45_spill] sm:$0xff] %v6084_v51  ;;  %v864_v2 = vadd.f32 %v839_v19, %v615_v25  ;;  %v535_v19 = vpop.f32.mrf.mxu0  ;;  %v6254_v51 = vld [vmem:[#allocation7 + $0xe8] sm:$0xff] }
 0x105   : > { %v4989_v52 = vpop.eup %4988 }
 0x106   : > { %v4991_v53 = vpop.eup %4990  ;;  %v869_v54 = vadd.f32 1.0, %v4989_v52 }
 0x107   : > { %v888_v55 = vadd.f32 1.0, %v4991_v53 }
 0x108   : > { %4992 = vrcp.f32 %v869_v54  ;;  %vm875_vm1 = vweird.f32 %v869_v54  ;;  %v881_v7 = vand.u32 2147483648, %v869_v54  ;;  %v879_v35 = vand.u32 2147483647, %v869_v54 }
 0x109   : > { %4994 = vrcp.f32 %v888_v55  ;;  %v900_v28 = vand.u32 2147483648, %v888_v55  ;;  %vm894_vm4 = vweird.f32 %v888_v55  ;;  %v898_v39 = vand.u32 2147483647, %v888_v55 }
 0x10a   : > { %v6086_v56 = vpop.f32.mrf.mxu3  ;;  %v882_v45 = vor.u32 1.1754944e-38, %v881_v7  ;;  %vm880_vm7 = vcmp.eq.f32.partialorder %v879_v35, 8.507059e+37  ;;  %v6122_v7 = vld [vmem:[#allocation7 + $0x100] sm:$0xff]  ;;  %v536_v35 = vadd.f32 %v535_v19, %v6076_v40 }
 0x10b   : > { %8430 = vst [vmem:[#allocation46_spill] sm:$0xff] %v6086_v56  ;;  %v901_v9 = vor.u32 1.1754944e-38, %v900_v28  ;;  %vm899_vm8 = vcmp.eq.f32.partialorder %v898_v39, 8.507059e+37  ;;  %v6116_v28 = vld [vmem:[#allocation7 + $0x140] sm:$0xff] }
 0x10e   : > { %v4993_v58 = vpop.eup %4992 }
 0x10f   : > { %v4995_v59 = vpop.eup %4994  ;;  %v871_v60 = vmul.f32 %v4993_v58, %v869_v54  ;;  %vm876_vm2 = vweird.f32 %v4993_v58 }
 0x110   : > { %v890_v61 = vmul.f32 %v4995_v59, %v888_v55  ;;  %vm895_vm3 = vweird.f32 %v4995_v59  ;;  %vm6094_vm5 = vmor %vm875_vm1, %vm876_vm2 }
 0x111   : > { %v872_v63 = vsub.f32 1.0, %v871_v60  ;;  %vm896_vm6 = vmor %vm894_vm4, %vm895_vm3 }
 0x112   : > { %v891_v0 = vsub.f32 1.0, %v890_v61  ;;  %v859_v1 = vpop.f32.mrf.mxu3 }
 0x113   : > { %v865_v5 = vadd.f32 %v859_v1, %v656_v62  ;;  %v873_v22 = vmul.f32 %v4993_v58, %v872_v63 }
 0x114   : > { %v892_v6 = vmul.f32 %v4995_v59, %v891_v0 }
 0x115   : > { %v4833_v14 = vmul.f32 -1.442695, %v865_v5  ;;  %v874_v10 = vadd.f32 %v4993_v58, %v873_v22  ;;  %v6109_v22 = vpop.f32.mrf.mxu0 }
 0x116   : > { %v893_v27 = vadd.f32 %v4995_v59, %v892_v6  ;;  %v539_v44 = vadd.f32 %v6109_v22, %v6076_v40  ;;  %v6278_v22 = vld [vmem:[#allocation7 + $0xa8] sm:$0xff] }
 0x117   : > { %4996 = vpow2.f32 %v4833_v14  ;;  %v878_v46 = vsel %vm6094_vm5, %v4993_v58, %v874_v10  ;;  %v6125_v10 = vld [vmem:[#allocation7 + $0xe0] sm:$0xff] }
 0x118   : > { %v897_v42 = vsel %vm896_vm6, %v4995_v59, %v893_v27  ;;  %4998 = vtanh.f32 %v864_v2  ;;  %v883_v49 = vsel %vm880_vm7, %v882_v45, %v878_v46  ;;  %v6113_v27 = vld [vmem:[#allocation7 + $0x160] sm:$0xff] }
 0x119   : > { %v902_v48 = vsel %vm899_vm8, %v901_v9, %v897_v42  ;;  %1225 = vmatpush.msra.mxu0 %v6113_v27  ;;  %v6119_v2 = vld [vmem:[#allocation7 + $0x120] sm:$0xff] }
 0x11a   : > { %v924_v50 = vmul.f32 0.0, %v902_v48  ;;  %v6134_v46 = vld [vmem:[#allocation7 + $0xa0] sm:$0xff] }
 0x11b   : > { %1226 = vmatpush.msra.mxu0 %v6116_v28 }
 0x11d   : > { %v4997_v43 = vpop.eup %4996  ;;  %v6111_v25 = vpop.f32.mrf.mxu0  ;;  %1227 = vmatpush.msra.mxu0 %v6119_v2 }
 0x11e   : > { %v908_v47 = vadd.f32 1.0, %v4997_v43  ;;  %v4999_v52 = vpop.eup %4998  ;;  %8436 = vst [vmem:[#allocation50_spill] sm:$0xff] %v6111_v25  ;;  %v6131_v43 = vld [vmem:[#allocation7 + $0xc0] sm:$0xff] }
 0x11f   : > { %v925_v53 = vmul.f32 %v4999_v52, %v883_v49  ;;  %1228 = vmatpush.msra.mxu0 %v6122_v7  ;;  %v6137_v49 = vld [vmem:[#allocation7 + $0x80] sm:$0xff] }
 0x120   : > { %5000 = vrcp.f32 %v908_v47  ;;  %v920_v61 = vand.u32 2147483648, %v908_v47  ;;  %v918_v58 = vand.u32 2147483647, %v908_v47  ;;  %vm914_vm10 = vweird.f32 %v908_v47 }
 0x121   : > { %v6100_v55 = vadd.f32 %v925_v53, %v924_v50  ;;  %1229 = vmatpush.msra.mxu0 %v6125_v10  ;;  %v6142_v50 = vld [vmem:[#allocation7 + $0x60] sm:$0xff] }
 0x122   : > { %v921_v0 = vor.u32 1.1754944e-38, %v920_v61  ;;  %vm919_vm12 = vcmp.eq.f32.partialorder %v918_v58, 8.507059e+37 }
 0x123   : > { %5002 = vtanh.f32 %v6100_v55  ;;  %1230 = vmatpush.msra.mxu0 %v6131_v43 }
 0x125   : > { %1231 = vmatpush.msra.mxu0 %v6134_v46 }
 0x126   : > { %v5001_v54 = vpop.eup %5000 }
 0x127   : > { %v910_v59 = vmul.f32 %v5001_v54, %v908_v47  ;;  %vm915_vm9 = vweird.f32 %v5001_v54  ;;  %1232 = vmatpush.msra.mxu0 %v6137_v49 }
 0x128   : > { %vm916_vm11 = vmor %vm914_vm10, %vm915_vm9 }
 0x129   : > { %v911_v60 = vsub.f32 1.0, %v910_v59  ;;  %v5003_v5 = vpop.eup %5002  ;;  %1233 = vmatpush.msra.mxu0 %v6142_v50 }
 0x12b   : > { %v912_v62 = vmul.f32 %v5001_v54, %v911_v60  ;;  %v6148_v60 = vld [vmem:[#allocation7 + $0x20] sm:$0xff] }
 0x12d   : > { %v913_v63 = vadd.f32 %v5001_v54, %v912_v62  ;;  %v6151_v62 = vld [vmem:[#allocation7] sm:$0xff] }
 0x12f   : > { %v917_v1 = vsel %vm916_vm11, %v5001_v54, %v913_v63  ;;  %v6145_v54 = vld [vmem:[#allocation7 + $0x40] sm:$0xff] }
 0x130   : > { %v922_v6 = vsel %vm919_vm12, %v921_v0, %v917_v1  ;;  %8437 = vst [vmem:[#allocation51_spill] sm:$0xff] %v6145_v54  ;;  %1234 = vmatpush.msra.mxu0 %v6145_v54 }
 0x131   : > { %v6103_v14 = vmul.f32 %v5003_v5, %v922_v6  ;;  %v618_v5 = vadd.f32 %v6035_v12, %v6091_v4 }
 0x132   : > { %1235 = vmatpush.msra.mxu0 %v6148_v60 }
 0x133   : > { %8435 = vst [vmem:[#allocation49_spill] sm:$0xff] %v6103_v14  ;;  %1017 = vmatmul.f32.vlgmr.msrb.gmra.mxu0 %v6103_v14  ;;  %1037 = vmatmul.f32.vlgmr.msrb.gmra.mxu1 %v6103_v14 }
 0x134   : > { %1057 = vmatmul.f32.vlgmr.msrb.gmra.mxu2 %v6103_v14  ;;  %1077 = vmatmul.f32.vlgmr.msrb.gmra.mxu3 %v6103_v14  ;;  %v6246_v14 = vld [vmem:[#allocation7 + $0x110] sm:$0xff] }
 0x135   : > { %1236 = vmatpush.msra.mxu0 %v6151_v62 }
 0x1b0   : > { %v1018_v39 = vpop.f32.mrf.mxu0  ;;  %v1038_v42 = vpop.f32.mrf.mxu1 }
 0x1b1   : > { %v1081_v9 = vadd.f32 %v1018_v39, %v536_v35  ;;  %v1082_v45 = vadd.f32 %v1038_v42, %v577_v20 }
 0x1b3   : > { %v4834_v47 = vmul.f32 -1.442695, %v1081_v9  ;;  %v4835_v48 = vmul.f32 -1.442695, %v1082_v45 }
 0x1b5   : > { %5004 = vpow2.f32 %v4834_v47 }
 0x1b6   : > { %5006 = vpow2.f32 %v4835_v48 }
 0x1b7   : > { %v1078_v52 = vpop.f32.mrf.mxu3  ;;  %v1058_v0 = vpop.f32.mrf.mxu2 }
 0x1b8   : > { %v1084_v53 = vadd.f32 %v1078_v52, %v659_v13  ;;  %v1083_v20 = vadd.f32 %v1058_v0, %v618_v5 }
 0x1ba   : > { %v4836_v59 = vmul.f32 -1.442695, %v1084_v53 }
 0x1bb   : > { %v5005_v61 = vpop.eup %5004 }
 0x1bc   : > { %v5007_v24 = vpop.eup %5006  ;;  %v1088_v58 = vadd.f32 1.0, %v5005_v61  ;;  %5008 = vpow2.f32 %v4836_v59 }
 0x1bd   : > { %v1107_v63 = vadd.f32 1.0, %v5007_v24 }
 0x1be   : > { %5010 = vrcp.f32 %v1088_v58  ;;  %v1100_v47 = vand.u32 2147483648, %v1088_v58  ;;  %v1098_v52 = vand.u32 2147483647, %v1088_v58  ;;  %vm1094_vm15 = vweird.f32 %v1088_v58 }
 0x1bf   : > { %5012 = vrcp.f32 %v1107_v63  ;;  %v1119_v48 = vand.u32 2147483648, %v1107_v63  ;;  %v1117_v59 = vand.u32 2147483647, %v1107_v63  ;;  %vm1113_vm0 = vweird.f32 %v1107_v63 }
 0x1c0   : > { %v1101_v24 = vor.u32 1.1754944e-38, %v1100_v47  ;;  %vm1099_vm3 = vcmp.eq.f32.partialorder %v1098_v52, 8.507059e+37 }
 0x1c1   : > { %v1120_v5 = vor.u32 1.1754944e-38, %v1119_v48  ;;  %vm1118_vm4 = vcmp.eq.f32.partialorder %v1117_v59, 8.507059e+37 }
 0x1c2   : > { %v5009_v1 = vpop.eup %5008 }
 0x1c3   : > { %v1127_v6 = vadd.f32 1.0, %v5009_v1 }
 0x1c4   : > { %v5011_v19 = vpop.eup %5010 }
 0x1c5   : > { %v5013_v35 = vpop.eup %5012  ;;  %v1090_v39 = vmul.f32 %v5011_v19, %v1088_v58  ;;  %5014 = vrcp.f32 %v1127_v6  ;;  %vm1095_vm13 = vweird.f32 %v5011_v19  ;;  %v1139_v47 = vand.u32 2147483648, %v1127_v6 }
 0x1c6   : > { %v1109_v42 = vmul.f32 %v5013_v35, %v1107_v63  ;;  %5016 = vtanh.f32 %v1083_v20  ;;  %vm1114_vm14 = vweird.f32 %v5013_v35  ;;  %vm1096_vm1 = vmor %vm1094_vm15, %vm1095_vm13  ;;  %vm1133_vm6 = vweird.f32 %v1127_v6 }
 0x1c7   : > { %v1091_v9 = vsub.f32 1.0, %v1090_v39  ;;  %vm1115_vm2 = vmor %vm1113_vm0, %vm1114_vm14  ;;  %v1140_v52 = vor.u32 1.1754944e-38, %v1139_v47  ;;  %v6218_v47 = vld [vmem:[#allocation7 + $0x178] sm:$0xff] }
 0x1c8   : > { %v1110_v45 = vsub.f32 1.0, %v1109_v42 }
 0x1c9   : > { %v1092_v13 = vmul.f32 %v5011_v19, %v1091_v9 }
 0x1ca   : > { %v1111_v53 = vmul.f32 %v5013_v35, %v1110_v45 }
 0x1cb   : > { %v5015_v61 = vpop.eup %5014  ;;  %v1093_v12 = vadd.f32 %v5011_v19, %v1092_v13 }
 0x1cc   : > { %v1112_v0 = vadd.f32 %v5013_v35, %v1111_v53  ;;  %v1129_v1 = vmul.f32 %v5015_v61, %v1127_v6  ;;  %v5017_v20 = vpop.eup %5016  ;;  %vm1134_vm5 = vweird.f32 %v5015_v61 }
 0x1cd   : > { %v1097_v39 = vsel %vm1096_vm1, %v5011_v19, %v1093_v12  ;;  %v1137_v19 = vand.u32 2147483647, %v1127_v6  ;;  %vm1135_vm7 = vmor %vm1133_vm6, %vm1134_vm5  ;;  %v6178_v6 = vld [vmem:[#allocation7 + $0x1c0] sm:$0xff]  ;;  %v6182_v12 = vld [vmem:[#allocation7 + $0x1d0] sm:$0xff] }
 0x1ce   : > { %v1102_v42 = vsel %vm1099_vm3, %v1101_v24, %v1097_v39  ;;  %v1116_v9 = vsel %vm1115_vm2, %v5013_v35, %v1112_v0  ;;  %v1130_v36 = vsub.f32 1.0, %v1129_v1  ;;  %8442 = vst [vmem:[#allocation56_spill] sm:$0xff] %v6178_v6  ;;  %v6186_v24 = vld [vmem:[#allocation7 + $0x1d8] sm:$0xff]  ;;  %v6190_v0 = vld [vmem:[#allocation7 + $0x1a0] sm:$0xff]  ;;  %v6192_v1 = vld [vmem:[#allocation7 + $0x1a8] sm:$0xff] }
 0x1cf   : > { %v1121_v45 = vsel %vm1118_vm4, %v1120_v5, %v1116_v9  ;;  %v1144_v56 = vmul.f32 %v5017_v20, %v1102_v42  ;;  %vm1138_vm8 = vcmp.eq.f32.partialorder %v1137_v19, 8.507059e+37  ;;  %v6194_v5 = vld [vmem:[#allocation7 + $0x1b0] sm:$0xff]  ;;  %v6198_v39 = vld [vmem:[#allocation7 + $0x1b8] sm:$0xff]  ;;  %v6202_v20 = vld [vmem:[#allocation7 + $0x180] sm:$0xff] }
 0x1d0   : > { %v1143_v38 = vmul.f32 %v1121_v45, %v6100_v55  ;;  %v1131_v13 = vmul.f32 %v5015_v61, %v1130_v36  ;;  %v6166_v36 = vld [vmem:[#allocation7 + $0x1e0] sm:$0xff]  ;;  %v6174_v55 = vld [vmem:[#allocation7 + $0x1f8] sm:$0xff]  ;;  %v6204_v42 = vld [vmem:[#allocation7 + $0x188] sm:$0xff] }
 0x1d1   : > { %8439 = vst [vmem:[#allocation53_spill] sm:$0xff] %v6166_v36  ;;  %1441 = vmatpush.msrb.mxu0 %v6166_v36  ;;  %1501 = vmatpush.msrb.mxu3 %v6174_v55  ;;  %v6206_v9 = vld [vmem:[#allocation7 + $0x190] sm:$0xff]  ;;  %v6210_v45 = vld [vmem:[#allocation7 + $0x198] sm:$0xff]  ;;  %v6224_v19 = vld [vmem:[#allocation7 + $0x148] sm:$0xff] }
 0x1d2   : > { %v6157_v58 = vadd.f32 %v1144_v56, %v1143_v38  ;;  %v1132_v63 = vadd.f32 %v5015_v61, %v1131_v13  ;;  %v6168_v38 = vld [vmem:[#allocation7 + $0x1e8] sm:$0xff]  ;;  %v6170_v56 = vld [vmem:[#allocation7 + $0x1f0] sm:$0xff]  ;;  %8441 = vst [vmem:[#allocation55_spill] sm:$0xff] %v6174_v55 }
 0x1d3   : > { %8440 = vst [vmem:[#allocation54_spill] sm:$0xff] %v6170_v56  ;;  %1461 = vmatpush.msrb.mxu1 %v6168_v38  ;;  %1481 = vmatpush.msrb.mxu2 %v6170_v56  ;;  %v6214_v13 = vld [vmem:[#allocation7 + $0x168] sm:$0xff] }
 0x1d4   : > { %5018 = vtanh.f32 %v6157_v58  ;;  %v1136_v48 = vsel %vm1135_vm7, %v5015_v61, %v1132_v63  ;;  %v6180_v61 = vld [vmem:[#allocation7 + $0x1c8] sm:$0xff]  ;;  %1442 = vmatpush.msrb.mxu0 %v6178_v6  ;;  %1502 = vmatpush.msrb.mxu3 %v6186_v24  ;;  %8444 = vst [vmem:[#allocation58_spill] sm:$0xff] %v6204_v42  ;;  %v6216_v63 = vld [vmem:[#allocation7 + $0x170] sm:$0xff] }
 0x1d5   : > { %v1141_v53 = vsel %vm1138_vm8, %v1140_v52, %v1136_v48  ;;  %8443 = vst [vmem:[#allocation57_spill] sm:$0xff] %v6180_v61  ;;  %1462 = vmatpush.msrb.mxu1 %v6180_v61  ;;  %1482 = vmatpush.msrb.mxu2 %v6182_v12  ;;  %v6226_v48 = vld [vmem:[#allocation7 + $0x150] sm:$0xff]  ;;  %v6228_v52 = vld [vmem:[#allocation7 + $0x158] sm:$0xff] }
 0x1d6   : > { %1443 = vmatpush.msrb.mxu0 %v6190_v0  ;;  %1503 = vmatpush.msrb.mxu3 %v6198_v39  ;;  %8445 = vst [vmem:[#allocation59_spill] sm:$0xff] %v6206_v9 }
 0x1d7   : > { %1463 = vmatpush.msrb.mxu1 %v6192_v1  ;;  %1483 = vmatpush.msrb.mxu2 %v6194_v5 }
 0x1d8   : > { %1444 = vmatpush.msrb.mxu0 %v6202_v20  ;;  %1504 = vmatpush.msrb.mxu3 %v6210_v45 }
 0x1d9   : > { %1464 = vmatpush.msrb.mxu1 %v6204_v42  ;;  %1484 = vmatpush.msrb.mxu2 %v6206_v9 }
 0x1da   : > { %v5019_v35 = vpop.eup %5018  ;;  %1445 = vmatpush.msrb.mxu0 %v6113_v27  ;;  %1505 = vmatpush.msrb.mxu3 %v6218_v47 }
 0x1db   : > { %v6160_v59 = vmul.f32 %v5019_v35, %v1141_v53  ;;  %1465 = vmatpush.msrb.mxu1 %v6214_v13  ;;  %1485 = vmatpush.msrb.mxu2 %v6216_v63  ;;  %v6234_v35 = vld [vmem:[#allocation7 + $0x128] sm:$0xff]  ;;  %v6236_v53 = vld [vmem:[#allocation7 + $0x130] sm:$0xff] }
 0x1dc   : > { %1446 = vmatpush.msrb.mxu0 %v6116_v28  ;;  %1506 = vmatpush.msrb.mxu3 %v6228_v52  ;;  %8446 = vst [vmem:[#allocation60_spill] sm:$0xff] %v6236_v53 }
 0x1dd   : > { %8438 = vst [vmem:[#allocation52_spill] sm:$0xff] %v6160_v59  ;;  %1237 = vmatmul.f32.vlgmr.msra.gmra.mxu0 %v6160_v59  ;;  %1257 = vmatmul.f32.vlgmr.msra.gmra.mxu1 %v6160_v59 }
 0x1de   : > { %1277 = vmatmul.f32.vlgmr.msra.gmra.mxu2 %v6160_v59  ;;  %1297 = vmatmul.f32.vlgmr.msra.gmra.mxu3 %v6160_v59  ;;  %v6244_v59 = vld [vmem:[#allocation7 + $0x108] sm:$0xff] }
 0x1df   : > { %1466 = vmatpush.msrb.mxu1 %v6224_v19  ;;  %1486 = vmatpush.msrb.mxu2 %v6226_v48 }
 0x1e0   : > { %1447 = vmatpush.msrb.mxu0 %v6119_v2  ;;  %1507 = vmatpush.msrb.mxu3 %v6238_v15 }
 0x1e1   : > { %1467 = vmatpush.msrb.mxu1 %v6234_v35  ;;  %1487 = vmatpush.msrb.mxu2 %v6236_v53 }
 0x1e2   : > { %1448 = vmatpush.msrb.mxu0 %v6122_v7  ;;  %1508 = vmatpush.msrb.mxu3 %v6248_v32 }
 0x1e3   : > { %1468 = vmatpush.msrb.mxu1 %v6244_v59  ;;  %1488 = vmatpush.msrb.mxu2 %v6246_v14 }
 0x1e4   : > { %1449 = vmatpush.msrb.mxu0 %v6125_v10  ;;  %1509 = vmatpush.msrb.mxu3 %v6258_v11 }
 0x1e5   : > { %1469 = vmatpush.msrb.mxu1 %v6254_v51  ;;  %1489 = vmatpush.msrb.mxu2 %v6256_v34 }
 0x1e6   : > { %1450 = vmatpush.msrb.mxu0 %v6131_v43  ;;  %1510 = vmatpush.msrb.mxu3 %v6272_v26 }
 0x1e7   : > { %1470 = vmatpush.msrb.mxu1 %v6268_v23  ;;  %1490 = vmatpush.msrb.mxu2 %v6270_v37 }
 0x1e8   : > { %1451 = vmatpush.msrb.mxu0 %v6134_v46  ;;  %1511 = vmatpush.msrb.mxu3 %v6282_v33 }
 0x1e9   : > { %1471 = vmatpush.msrb.mxu1 %v6278_v22  ;;  %1491 = vmatpush.msrb.mxu2 %v6280_v18 }
 0x1ea   : > { %1452 = vmatpush.msrb.mxu0 %v6137_v49 }
 0x1ec   : > { %1453 = vmatpush.msrb.mxu0 %v6142_v50 }
 0x1ee   : > { %1454 = vmatpush.msrb.mxu0 %v6145_v54  ;;  %v6330_v54 = vld [vmem:[#allocation7 + $0x10] sm:$0xff] }
 0x1f0   : > { %1455 = vmatpush.msrb.mxu0 %v6148_v60 }
 0x1f2   : > { %1456 = vmatpush.msrb.mxu0 %v6151_v62 }
 0x1f4   : > { %1661 = vmatpush.msra.mxu0 %v6166_v36 }
 0x1f6   : > { %1662 = vmatpush.msra.mxu0 %v6178_v6 }
 0x1f8   : > { %1663 = vmatpush.msra.mxu0 %v6190_v0 }
 0x1fa   : > { %1664 = vmatpush.msra.mxu0 %v6202_v20 }
 0x1fc   : > { %1665 = vmatpush.msra.mxu0 %v6113_v27 }
 0x1fe   : > { %1666 = vmatpush.msra.mxu0 %v6116_v28 }
 0x200   : > { %1667 = vmatpush.msra.mxu0 %v6119_v2 }
 0x202   : > { %1668 = vmatpush.msra.mxu0 %v6122_v7 }
 0x204   : > { %1669 = vmatpush.msra.mxu0 %v6125_v10 }
 0x206   : > { %1670 = vmatpush.msra.mxu0 %v6131_v43 }
 0x208   : > { %1671 = vmatpush.msra.mxu0 %v6134_v46 }
 0x20a   : > { %1672 = vmatpush.msra.mxu0 %v6137_v49  ;;  %v8459_v49 = vld [vmem:[#allocation51_spill] sm:$0xff] }
 0x20c   : > { %1673 = vmatpush.msra.mxu0 %v6142_v50  ;;  %v8464_v50 = vld [vmem:[#allocation53_spill] sm:$0xff] }
 0x20e   : > { %1674 = vmatpush.msra.mxu0 %v8459_v49 }
 0x210   : > { %1675 = vmatpush.msra.mxu0 %v6148_v60  ;;  %v8465_v60 = vld [vmem:[#allocation54_spill] sm:$0xff] }
 0x212   : > { %1676 = vmatpush.msra.mxu0 %v6151_v62  ;;  %v8469_v62 = vld [vmem:[#allocation58_spill] sm:$0xff] }
 0x25a   : > { %v1238_v31 = vpop.f32.mrf.mxu0  ;;  %v1258_v8 = vpop.f32.mrf.mxu1 }
 0x25b   : > { %v1301_v17 = vadd.f32 %v1238_v31, %v539_v44  ;;  %v1302_v3 = vadd.f32 %v1258_v8, %v580_v29  ;;  %v6288_v8 = vld [vmem:[#allocation7 + $0x88] sm:$0xff]  ;;  %v6290_v29 = vld [vmem:[#allocation7 + $0x90] sm:$0xff]  ;;  %v6292_v31 = vld [vmem:[#allocation7 + $0x98] sm:$0xff] }
 0x25c   : > { %8448 = vst [vmem:[#allocation62_spill] sm:$0xff] %v6292_v31  ;;  %1472 = vmatpush.msrb.mxu1 %v6288_v8  ;;  %1492 = vmatpush.msrb.mxu2 %v6290_v29  ;;  %v6300_v44 = vld [vmem:[#allocation7 + $0x68] sm:$0xff] }
 0x25d   : > { %v4837_v25 = vmul.f32 -1.442695, %v1301_v17  ;;  %v4838_v40 = vmul.f32 -1.442695, %v1302_v3  ;;  %v662_v3 = vadd.f32 %v6057_v30, %v6088_v57  ;;  %1512 = vmatpush.msrb.mxu3 %v6292_v31  ;;  %8449 = vst [vmem:[#allocation63_spill] sm:$0xff] %v6300_v44  ;;  %v6302_v17 = vld [vmem:[#allocation7 + $0x70] sm:$0xff] }
 0x25e   : > { %8450 = vst [vmem:[#allocation64_spill] sm:$0xff] %v6302_v17  ;;  %1473 = vmatpush.msrb.mxu1 %v6300_v44  ;;  %1493 = vmatpush.msrb.mxu2 %v6302_v17  ;;  %v6310_v30 = vld [vmem:[#allocation7 + $0x48] sm:$0xff]  ;;  %v6314_v57 = vld [vmem:[#allocation7 + $0x58] sm:$0xff] }
 0x25f   : > { %5020 = vpow2.f32 %v4837_v25  ;;  %1513 = vmatpush.msrb.mxu3 %v6304_v21  ;;  %8452 = vst [vmem:[#allocation66_spill] sm:$0xff] %v6310_v30  ;;  %v6324_v21 = vld [vmem:[#allocation7 + $0x38] sm:$0xff]  ;;  %v6328_v44 = vld [vmem:[#allocation7 + $0x8] sm:$0xff] }
 0x260   : > { %5022 = vpow2.f32 %v4838_v40  ;;  %v6312_v40 = vld [vmem:[#allocation7 + $0x50] sm:$0xff]  ;;  %8454 = vst [vmem:[#allocation68_spill] sm:$0xff] %v6314_v57  ;;  %1474 = vmatpush.msrb.mxu1 %v6310_v30 }
 0x261   : > { %v1298_v41 = vpop.f32.mrf.mxu3  ;;  %8453 = vst [vmem:[#allocation67_spill] sm:$0xff] %v6312_v40  ;;  %1494 = vmatpush.msrb.mxu2 %v6312_v40  ;;  %1514 = vmatpush.msrb.mxu3 %v6314_v57 }
 0x262   : > { %v1304_v25 = vadd.f32 %v1298_v41, %v662_v3  ;;  %v6320_v41 = vld [vmem:[#allocation7 + $0x28] sm:$0xff]  ;;  %v6322_v3 = vld [vmem:[#allocation7 + $0x30] sm:$0xff] }
 0x263   : > { %1475 = vmatpush.msrb.mxu1 %v6320_v41  ;;  %1495 = vmatpush.msrb.mxu2 %v6322_v3  ;;  %v8455_v46 = vld [vmem:[#allocation62_spill] sm:$0xff] }
 0x264   : > { %v4839_v31 = vmul.f32 -1.442695, %v1304_v25  ;;  %v6332_v25 = vld [vmem:[#allocation7 + $0x18] sm:$0xff]  ;;  %1515 = vmatpush.msrb.mxu3 %v6324_v21 }
 0x265   : > { %v5021_v17 = vpop.eup %5020  ;;  %1476 = vmatpush.msrb.mxu1 %v6328_v44  ;;  %1496 = vmatpush.msrb.mxu2 %v6330_v54 }
 0x266   : > { %v5023_v40 = vpop.eup %5022  ;;  %v6334_v30 = vadd.f32 1.0, %v5021_v17  ;;  %5024 = vpow2.f32 %v4839_v31  ;;  %1516 = vmatpush.msrb.mxu3 %v6332_v25  ;;  %v1278_v31 = vpop.f32.mrf.mxu2 }
 0x267   : > { %v6338_v57 = vadd.f32 1.0, %v5023_v40  ;;  %1681 = vmatpush.msra.mxu1 %v6168_v38  ;;  %1701 = vmatpush.msra.mxu2 %v6170_v56  ;;  %v621_v40 = vadd.f32 %v6041_v16, %v6091_v4 }
 0x268   : > { %5026 = vrcp.f32 %v6334_v30  ;;  %1721 = vmatpush.msra.mxu3 %v6174_v55  ;;  %vm1314_vm11 = vweird.f32 %v6334_v30 }
 0x269   : > { %5028 = vrcp.f32 %v6338_v57  ;;  %1682 = vmatpush.msra.mxu1 %v6180_v61  ;;  %1702 = vmatpush.msra.mxu2 %v6182_v12  ;;  %v1303_v56 = vadd.f32 %v1278_v31, %v621_v40  ;;  %v1320_v40 = vand.u32 2147483648, %v6334_v30  ;;  %v1339_v4 = vand.u32 2147483648, %v6338_v57 }
 0x26a   : > { %1722 = vmatpush.msra.mxu3 %v6186_v24  ;;  %vm1333_vm12 = vweird.f32 %v6338_v57 }
 0x26b   : > { %1683 = vmatpush.msra.mxu1 %v6192_v1  ;;  %1703 = vmatpush.msra.mxu2 %v6194_v5  ;;  %v1321_v28 = vor.u32 1.1754944e-38, %v1320_v40 }
 0x26c   : > { %v5025_v17 = vpop.eup %5024  ;;  %1723 = vmatpush.msra.mxu3 %v6198_v39 }
 0x26d   : > { %v6356_v36 = vadd.f32 1.0, %v5025_v17  ;;  %1684 = vmatpush.msra.mxu1 %v6204_v42  ;;  %1704 = vmatpush.msra.mxu2 %v6206_v9  ;;  %v1318_v9 = vand.u32 2147483647, %v6334_v30 }
 0x26e   : > { %v5027_v55 = vpop.eup %5026  ;;  %1724 = vmatpush.msra.mxu3 %v6210_v45 }
 0x26f   : > { %v5029_v61 = vpop.eup %5028  ;;  %v1310_v6 = vmul.f32 %v5027_v55, %v6334_v30  ;;  %5030 = vrcp.f32 %v6356_v36  ;;  %1685 = vmatpush.msra.mxu1 %v6214_v13  ;;  %1705 = vmatpush.msra.mxu2 %v6216_v63  ;;  %vm1315_vm9 = vweird.f32 %v5027_v55  ;;  %vm1319_vm15 = vcmp.eq.f32.partialorder %v1318_v9, 8.507059e+37 }
 0x270   : > { %v1329_v16 = vmul.f32 %v5029_v61, %v6338_v57  ;;  %5032 = vtanh.f32 %v1303_v56  ;;  %1725 = vmatpush.msra.mxu3 %v6218_v47  ;;  %vm1334_vm10 = vweird.f32 %v5029_v61  ;;  %vm1316_vm13 = vmor %vm1314_vm11, %vm1315_vm9  ;;  %v1359_v43 = vand.u32 2147483648, %v6356_v36 }
 0x271   : > { %v1311_v31 = vsub.f32 1.0, %v1310_v6  ;;  %1686 = vmatpush.msra.mxu1 %v6224_v19  ;;  %v1337_v6 = vand.u32 2147483647, %v6338_v57  ;;  %1706 = vmatpush.msra.mxu2 %v6226_v48  ;;  %vm1335_vm14 = vmor %vm1333_vm12, %vm1334_vm10  ;;  %vm1353_vm2 = vweird.f32 %v6356_v36 }
 0x272   : > { %v1330_v17 = vsub.f32 1.0, %v1329_v16  ;;  %1726 = vmatpush.msra.mxu3 %v6228_v52  ;;  %v1360_v9 = vor.u32 1.1754944e-38, %v1359_v43 }
 0x273   : > { %v1312_v42 = vmul.f32 %v5027_v55, %v1311_v31  ;;  %1687 = vmatpush.msra.mxu1 %v6234_v35  ;;  %1707 = vmatpush.msra.mxu2 %v6236_v53  ;;  %vm1338_vm0 = vcmp.eq.f32.partialorder %v1337_v6, 8.507059e+37  ;;  %v8458_v6 = vld [vmem:[#allocation65_spill] sm:$0xff] }
 0x274   : > { %v1331_v27 = vmul.f32 %v5029_v61, %v1330_v17  ;;  %1727 = vmatpush.msra.mxu3 %v6238_v15 }
 0x275   : > { %v6381_v56 = vpop.eup %5030  ;;  %v1313_v16 = vadd.f32 %v5027_v55, %v1312_v42  ;;  %v1340_v42 = vor.u32 1.1754944e-38, %v1339_v4  ;;  %1688 = vmatpush.msra.mxu1 %v6244_v59  ;;  %1708 = vmatpush.msra.mxu2 %v6246_v14 }
 0x276   : > { %v1332_v31 = vadd.f32 %v5029_v61, %v1331_v27  ;;  %v1349_v17 = vmul.f32 %v6381_v56, %v6356_v36  ;;  %v5033_v57 = vpop.eup %5032  ;;  %1728 = vmatpush.msra.mxu3 %v6248_v32  ;;  %vm1354_vm1 = vweird.f32 %v6381_v56 }
 0x277   : > { %v1317_v30 = vsel %vm1316_vm13, %v5027_v55, %v1313_v16  ;;  %1689 = vmatpush.msra.mxu1 %v6254_v51  ;;  %1709 = vmatpush.msra.mxu2 %v6256_v34  ;;  %vm1355_vm3 = vmor %vm1353_vm2, %vm1354_vm1 }
 0x278   : > { %v1322_v2 = vsel %vm1319_vm15, %v1321_v28, %v1317_v30  ;;  %v1336_v40 = vsel %vm1335_vm14, %v5029_v61, %v1332_v31  ;;  %v1350_v27 = vsub.f32 1.0, %v1349_v17  ;;  %1729 = vmatpush.msra.mxu3 %v6258_v11  ;;  %v8456_v61 = vld [vmem:[#allocation63_spill] sm:$0xff]  ;;  %v8462_v17 = vld [vmem:[#allocation68_spill] sm:$0xff] }
 0x279   : > { %v1341_v53 = vsel %vm1338_vm0, %v1340_v42, %v1336_v40  ;;  %v1364_v15 = vmul.f32 %v5033_v57, %v1322_v2  ;;  %1690 = vmatpush.msra.mxu1 %v6268_v23  ;;  %1710 = vmatpush.msra.mxu2 %v6270_v37  ;;  %v8461_v31 = vld [vmem:[#allocation67_spill] sm:$0xff]  ;;  %v8467_v30 = vld [vmem:[#allocation56_spill] sm:$0xff]  ;;  %v8468_v57 = vld [vmem:[#allocation57_spill] sm:$0xff] }
 0x27a   : > { %v1363_v4 = vmul.f32 %v1341_v53, %v6157_v58  ;;  %v1351_v7 = vmul.f32 %v6381_v56, %v1350_v27  ;;  %1730 = vmatpush.msra.mxu3 %v6272_v26  ;;  %v8457_v53 = vld [vmem:[#allocation64_spill] sm:$0xff]  ;;  %v8466_v42 = vld [vmem:[#allocation55_spill] sm:$0xff] }
 0x27b   : > { %1691 = vmatpush.msra.mxu1 %v6278_v22  ;;  %1711 = vmatpush.msra.mxu2 %v6280_v18 }
 0x27c   : > { %v6405_v55 = vadd.f32 %v1364_v15, %v1363_v4  ;;  %v1352_v10 = vadd.f32 %v6381_v56, %v1351_v7  ;;  %1731 = vmatpush.msra.mxu3 %v6282_v33  ;;  %v1357_v15 = vand.u32 2147483647, %v6356_v36  ;;  %v8460_v36 = vld [vmem:[#allocation66_spill] sm:$0xff] }
 0x27d   : > { %1692 = vmatpush.msra.mxu1 %v6288_v8  ;;  %1712 = vmatpush.msra.mxu2 %v6290_v29 }
 0x27e   : > { %5034 = vtanh.f32 %v6405_v55  ;;  %1732 = vmatpush.msra.mxu3 %v8455_v46  ;;  %v1356_v58 = vsel %vm1355_vm3, %v6381_v56, %v1352_v10  ;;  %vm1358_vm4 = vcmp.eq.f32.partialorder %v1357_v15, 8.507059e+37 }
 0x27f   : > { %1693 = vmatpush.msra.mxu1 %v8456_v61  ;;  %1713 = vmatpush.msra.mxu2 %v8457_v53  ;;  %v1361_v28 = vsel %vm1358_vm4, %v1360_v9, %v1356_v58 }
 0x280   : > { %1733 = vmatpush.msra.mxu3 %v8458_v6 }
 0x281   : > { %1694 = vmatpush.msra.mxu1 %v8460_v36  ;;  %1714 = vmatpush.msra.mxu2 %v8461_v31 }
 0x282   : > { %1734 = vmatpush.msra.mxu3 %v8462_v17 }
 0x283   : > { %1695 = vmatpush.msra.mxu1 %v6320_v41  ;;  %1715 = vmatpush.msra.mxu2 %v6322_v3 }
 0x284   : > { %v5035_v16 = vpop.eup %5034  ;;  %1735 = vmatpush.msra.mxu3 %v6324_v21 }
 0x285   : > { %v6432_v56 = vmul.f32 %v5035_v16, %v1361_v28  ;;  %1696 = vmatpush.msra.mxu1 %v6328_v44  ;;  %1716 = vmatpush.msra.mxu2 %v6330_v54 }
 0x286   : > { %1736 = vmatpush.msra.mxu3 %v6332_v25 }
 0x287   : > { %8463 = vst [vmem:[#allocation62_spill] sm:$0xff] %v6432_v56  ;;  %1457 = vmatmul.f32.vlgmr.msrb.gmra.mxu0 %v6432_v56  ;;  %1477 = vmatmul.f32.vlgmr.msrb.gmra.mxu1 %v6432_v56 }
 0x288   : > { %1497 = vmatmul.f32.vlgmr.msrb.gmra.mxu2 %v6432_v56  ;;  %1517 = vmatmul.f32.vlgmr.msrb.gmra.mxu3 %v6432_v56  ;;  %v6708_v56 = vld [vmem:[#allocation7 + $0x78] sm:$0xff] }
 0x289   : > { %1881 = vmatpush.msrb.mxu0 %v8464_v50  ;;  %1901 = vmatpush.msrb.mxu1 %v6168_v38  ;;  %v8470_v38 = vld [vmem:[#allocation59_spill] sm:$0xff]  ;;  %8493 = vst [vmem:[#allocation67_spill] sm:$0xff] %v6708_v56 }
 0x28a   : > { %1921 = vmatpush.msrb.mxu2 %v8465_v60  ;;  %1941 = vmatpush.msrb.mxu3 %v8466_v42 }
 0x28b   : > { %1882 = vmatpush.msrb.mxu0 %v8467_v30  ;;  %1902 = vmatpush.msrb.mxu1 %v8468_v57 }
 0x28c   : > { %1922 = vmatpush.msrb.mxu2 %v6182_v12  ;;  %1942 = vmatpush.msrb.mxu3 %v6186_v24  ;;  %v8471_v12 = vld [vmem:[#allocation60_spill] sm:$0xff]  ;;  %v8472_v24 = vld [vmem:[#allocation61_spill] sm:$0xff] }
 0x28d   : > { %1883 = vmatpush.msrb.mxu0 %v6190_v0  ;;  %1903 = vmatpush.msrb.mxu1 %v6192_v1  ;;  %v8478_v1 = vld [vmem:[#allocation37_spill] sm:$0xff] }
 0x28e   : > { %1923 = vmatpush.msrb.mxu2 %v6194_v5  ;;  %1943 = vmatpush.msrb.mxu3 %v6198_v39 }
 0x28f   : > { %1884 = vmatpush.msrb.mxu0 %v6202_v20  ;;  %1904 = vmatpush.msrb.mxu1 %v8469_v62 }
 0x290   : > { %1924 = vmatpush.msrb.mxu2 %v8470_v38  ;;  %1944 = vmatpush.msrb.mxu3 %v6210_v45 }
 0x291   : > { %1905 = vmatpush.msrb.mxu1 %v6214_v13 }
 0x292   : > { %1925 = vmatpush.msrb.mxu2 %v6216_v63  ;;  %1945 = vmatpush.msrb.mxu3 %v6218_v47 }
 0x293   : > { %1906 = vmatpush.msrb.mxu1 %v6224_v19 }
 0x294   : > { %1926 = vmatpush.msrb.mxu2 %v6226_v48  ;;  %1946 = vmatpush.msrb.mxu3 %v6228_v52  ;;  %v8479_v52 = vld [vmem:[#allocation48_spill] sm:$0xff] }
 0x295   : > { %1907 = vmatpush.msrb.mxu1 %v6234_v35  ;;  %v8480_v35 = vld [vmem:[#allocation30_spill] sm:$0xff] }
 0x296   : > { %1927 = vmatpush.msrb.mxu2 %v8471_v12  ;;  %1947 = vmatpush.msrb.mxu3 %v8472_v24 }
 0x297   : > { %1908 = vmatpush.msrb.mxu1 %v6244_v59 }
 0x298   : > { %1928 = vmatpush.msrb.mxu2 %v6246_v14  ;;  %1948 = vmatpush.msrb.mxu3 %v6248_v32  ;;  %v8476_v32 = vld [vmem:[#allocation50_spill] sm:$0xff] }
 0x299   : > { %1909 = vmatpush.msrb.mxu1 %v6254_v51 }
 0x29a   : > { %1929 = vmatpush.msrb.mxu2 %v6256_v34  ;;  %1949 = vmatpush.msrb.mxu3 %v6258_v11  ;;  %v8473_v11 = vld [vmem:[#allocation43_spill] sm:$0xff] }
 0x29b   : > { %1910 = vmatpush.msrb.mxu1 %v6268_v23 }
 0x29c   : > { %1930 = vmatpush.msrb.mxu2 %v6270_v37  ;;  %1950 = vmatpush.msrb.mxu3 %v6272_v26  ;;  %v8475_v26 = vld [vmem:[#allocation42_spill] sm:$0xff] }
 0x29d   : > { %1911 = vmatpush.msrb.mxu1 %v6278_v22  ;;  %v624_v22 = vadd.f32 %v8480_v35, %v8479_v52 }
 0x29e   : > { %1931 = vmatpush.msrb.mxu2 %v6280_v18  ;;  %1951 = vmatpush.msrb.mxu3 %v6282_v33  ;;  %v8474_v18 = vld [vmem:[#allocation31_spill] sm:$0xff]  ;;  %v542_v33 = vadd.f32 %v8476_v32, %v8475_v26 }
 0x29f   : > { %1912 = vmatpush.msrb.mxu1 %v6288_v8  ;;  %v583_v23 = vadd.f32 %v8474_v18, %v8473_v11 }
 0x2a0   : > { %1932 = vmatpush.msrb.mxu2 %v6290_v29  ;;  %1952 = vmatpush.msrb.mxu3 %v8455_v46 }
 0x2a1   : > { %1913 = vmatpush.msrb.mxu1 %v8456_v61 }
 0x2a2   : > { %1933 = vmatpush.msrb.mxu2 %v8457_v53  ;;  %1953 = vmatpush.msrb.mxu3 %v8458_v6 }
 0x2a3   : > { %1914 = vmatpush.msrb.mxu1 %v8460_v36 }
 0x2a4   : > { %1934 = vmatpush.msrb.mxu2 %v8461_v31  ;;  %1954 = vmatpush.msrb.mxu3 %v8462_v17 }
 0x2a5   : > { %1915 = vmatpush.msrb.mxu1 %v6320_v41 }
 0x2a6   : > { %1935 = vmatpush.msrb.mxu2 %v6322_v3  ;;  %1955 = vmatpush.msrb.mxu3 %v6324_v21  ;;  %v8477_v21 = vld [vmem:[#allocation47_spill] sm:$0xff] }
 0x2a7   : > { %1916 = vmatpush.msrb.mxu1 %v6328_v44  ;;  %v665_v5 = vadd.f32 %v8478_v1, %v8477_v21 }
 0x2a8   : > { %1936 = vmatpush.msrb.mxu2 %v6330_v54  ;;  %1956 = vmatpush.msrb.mxu3 %v6332_v25 }
 0x304   : > { %v1458_v34 = vpop.f32.mrf.mxu0  ;;  %v1478_v37 = vpop.f32.mrf.mxu1 }
 0x305   : > { %v1521_v51 = vadd.f32 %v1458_v34, %v542_v33  ;;  %v1522_v14 = vadd.f32 %v1478_v37, %v583_v23  ;;  %v6519_v33 = vld [vmem:[#allocation7 + $0x140] sm:$0xff] }
 0x306   : > { %v6522_v34 = vld [vmem:[#allocation7 + $0x120] sm:$0xff] }
 0x307   : > { %v4840_v59 = vmul.f32 -1.442695, %v1521_v51  ;;  %v4841_v0 = vmul.f32 -1.442695, %v1522_v14  ;;  %v6525_v37 = vld [vmem:[#allocation7 + $0x100] sm:$0xff] }
 0x308   : > { %v6528_v51 = vld [vmem:[#allocation7 + $0xe0] sm:$0xff] }
 0x309   : > { %5036 = vpow2.f32 %v4840_v59  ;;  %v8482_v14 = vld [vmem:[#allocation26_spill] sm:$0xff] }
 0x30a   : > { %5038 = vpow2.f32 %v4841_v0  ;;  %v545_v59 = vadd.f32 %v8482_v14, %v8475_v26  ;;  %v8483_v0 = vld [vmem:[#allocation33_spill] sm:$0xff] }
 0x30b   : > { %v1518_v54 = vpop.f32.mrf.mxu3  ;;  %v1498_v19 = vpop.f32.mrf.mxu2  ;;  %v586_v1 = vadd.f32 %v8483_v0, %v8473_v11 }
 0x30c   : > { %v1524_v39 = vadd.f32 %v1518_v54, %v665_v5  ;;  %v1523_v44 = vadd.f32 %v1498_v19, %v624_v22  ;;  %v6541_v19 = vld [vmem:[#allocation7 + $0x80] sm:$0xff] }
 0x30d   : > { %v6546_v22 = vld [vmem:[#allocation7 + $0x60] sm:$0xff] }
 0x30e   : > { %v4842_v20 = vmul.f32 -1.442695, %v1524_v39  ;;  %v6535_v39 = vld [vmem:[#allocation7 + $0xc0] sm:$0xff] }
 0x30f   : > { %v5037_v45 = vpop.eup %5036 }
 0x310   : > { %v5039_v13 = vpop.eup %5038  ;;  %v1528_v63 = vadd.f32 1.0, %v5037_v45  ;;  %5040 = vpow2.f32 %v4842_v20 }
 0x311   : > { %v1547_v47 = vadd.f32 1.0, %v5039_v13  ;;  %v6538_v13 = vld [vmem:[#allocation7 + $0xa0] sm:$0xff] }
 0x312   : > { %5042 = vrcp.f32 %v1528_v63  ;;  %v1540_v27 = vand.u32 2147483648, %v1528_v63  ;;  %v1538_v10 = vand.u32 2147483647, %v1528_v63  ;;  %vm1534_vm7 = vweird.f32 %v1528_v63 }
 0x313   : > { %5044 = vrcp.f32 %v1547_v47  ;;  %v1559_v4 = vand.u32 2147483648, %v1547_v47  ;;  %v1557_v15 = vand.u32 2147483647, %v1547_v47  ;;  %vm1553_vm8 = vweird.f32 %v1547_v47 }
 0x314   : > { %v1541_v61 = vor.u32 1.1754944e-38, %v1540_v27  ;;  %vm1539_vm11 = vcmp.eq.f32.partialorder %v1538_v10, 8.507059e+37 }
 0x315   : > { %v1560_v6 = vor.u32 1.1754944e-38, %v1559_v4  ;;  %vm1558_vm12 = vcmp.eq.f32.partialorder %v1557_v15, 8.507059e+37 }
 0x316   : > { %v5041_v48 = vpop.eup %5040 }
 0x317   : > { %v1567_v8 = vadd.f32 1.0, %v5041_v48  ;;  %v8484_v48 = vld [vmem:[#allocation40_spill] sm:$0xff] }
 0x318   : > { %v5043_v29 = vpop.eup %5042  ;;  %v668_v35 = vadd.f32 %v8484_v48, %v8477_v21 }
 0x319   : > { %v5045_v41 = vpop.eup %5044  ;;  %v1530_v3 = vmul.f32 %v5043_v29, %v1528_v63  ;;  %5046 = vrcp.f32 %v1567_v8  ;;  %vm1535_vm5 = vweird.f32 %v5043_v29  ;;  %v1579_v62 = vand.u32 2147483648, %v1567_v8 }
 0x31a   : > { %v1549_v25 = vmul.f32 %v5045_v41, %v1547_v47  ;;  %5048 = vtanh.f32 %v1523_v44  ;;  %vm1554_vm6 = vweird.f32 %v5045_v41  ;;  %vm1536_vm9 = vmor %vm1534_vm7, %vm1535_vm5  ;;  %vm1573_vm14 = vweird.f32 %v1567_v8  ;;  %v6549_v44 = vld [vmem:[#allocation7 + $0x40] sm:$0xff] }
 0x31b   : > { %v1531_v2 = vsub.f32 1.0, %v1530_v3  ;;  %vm1555_vm10 = vmor %vm1553_vm8, %vm1554_vm6  ;;  %v1577_v38 = vand.u32 2147483647, %v1567_v8  ;;  %v1580_v24 = vor.u32 1.1754944e-38, %v1579_v62  ;;  %8485 = vst [vmem:[#allocation64_spill] sm:$0xff] %v6549_v44  ;;  %v6552_v3 = vld [vmem:[#allocation7 + $0x20] sm:$0xff] }
 0x31c   : > { %v1550_v40 = vsub.f32 1.0, %v1549_v25 }
 0x31d   : > { %v1532_v7 = vmul.f32 %v5043_v29, %v1531_v2  ;;  %vm1578_vm0 = vcmp.eq.f32.partialorder %v1577_v38, 8.507059e+37  ;;  %v6555_v2 = vld [vmem:[#allocation7] sm:$0xff] }
 0x31e   : > { %v1551_v43 = vmul.f32 %v5045_v41, %v1550_v40 }
 0x31f   : > { %v5047_v46 = vpop.eup %5046  ;;  %v1533_v58 = vadd.f32 %v5043_v29, %v1532_v7 }
 0x320   : > { %v1552_v9 = vadd.f32 %v5045_v41, %v1551_v43  ;;  %v1569_v53 = vmul.f32 %v5047_v46, %v1567_v8  ;;  %v5049_v36 = vpop.eup %5048  ;;  %vm1574_vm13 = vweird.f32 %v5047_v46  ;;  %v8486_v43 = vld [vmem:[#allocation32_spill] sm:$0xff] }
 0x321   : > { %v1537_v49 = vsel %vm1536_vm9, %v5043_v29, %v1533_v58  ;;  %vm1575_vm15 = vmor %vm1573_vm14, %vm1574_vm13  ;;  %v627_v15 = vadd.f32 %v8486_v43, %v8479_v52  ;;  %v6586_v43 = vld [vmem:[#allocation7 + $0x1d0] sm:$0xff] }
 0x322   : > { %v1542_v16 = vsel %vm1539_vm11, %v1541_v61, %v1537_v49  ;;  %v1556_v28 = vsel %vm1555_vm10, %v5045_v41, %v1552_v9  ;;  %v1570_v31 = vsub.f32 1.0, %v1569_v53 }
 0x323   : > { %v1561_v17 = vsel %vm1558_vm12, %v1560_v6, %v1556_v28  ;;  %v1584_v50 = vmul.f32 %v5049_v36, %v1542_v16 }
 0x324   : > { %v1583_v60 = vmul.f32 %v1561_v17, %v6405_v55  ;;  %v1571_v42 = vmul.f32 %v5047_v46, %v1570_v31  ;;  %v6516_v55 = vld [vmem:[#allocation7 + $0x160] sm:$0xff] }
 0x325   : > { %1885 = vmatpush.msrb.mxu0 %v6516_v55 }
 0x326   : > { %v6507_v30 = vadd.f32 %v1584_v50, %v1583_v60  ;;  %v1572_v57 = vadd.f32 %v5047_v46, %v1571_v42 }
 0x327   : > { %1886 = vmatpush.msrb.mxu0 %v6519_v33 }
 0x328   : > { %5050 = vtanh.f32 %v6507_v30  ;;  %v1576_v12 = vsel %vm1575_vm15, %v5047_v46, %v1572_v57 }
 0x329   : > { %v1581_v23 = vsel %vm1578_vm0, %v1580_v24, %v1576_v12  ;;  %1887 = vmatpush.msrb.mxu0 %v6522_v34 }
 0x32b   : > { %1888 = vmatpush.msrb.mxu0 %v6525_v37 }
 0x32d   : > { %1889 = vmatpush.msrb.mxu0 %v6528_v51 }
 0x32e   : > { %v5051_v18 = vpop.eup %5050 }
 0x32f   : > { %v6510_v32 = vmul.f32 %v5051_v18, %v1581_v23  ;;  %1890 = vmatpush.msrb.mxu0 %v6535_v39 }
 0x331   : > { %8481 = vst [vmem:[#allocation63_spill] sm:$0xff] %v6510_v32  ;;  %1677 = vmatmul.f32.vlgmr.msra.gmra.mxu0 %v6510_v32  ;;  %1697 = vmatmul.f32.vlgmr.msra.gmra.mxu1 %v6510_v32 }
 0x332   : > { %1717 = vmatmul.f32.vlgmr.msra.gmra.mxu2 %v6510_v32  ;;  %1737 = vmatmul.f32.vlgmr.msra.gmra.mxu3 %v6510_v32  ;;  %v6706_v32 = vld [vmem:[#allocation7 + $0x70] sm:$0xff] }
 0x333   : > { %1891 = vmatpush.msrb.mxu0 %v6538_v13  ;;  %8492 = vst [vmem:[#allocation66_spill] sm:$0xff] %v6706_v32 }
 0x335   : > { %1892 = vmatpush.msrb.mxu0 %v6541_v19 }
 0x337   : > { %1893 = vmatpush.msrb.mxu0 %v6546_v22 }
 0x339   : > { %1894 = vmatpush.msrb.mxu0 %v6549_v44 }
 0x33b   : > { %1895 = vmatpush.msrb.mxu0 %v6552_v3 }
 0x33d   : > { %1896 = vmatpush.msrb.mxu0 %v6555_v2 }
 0x3ae   : > { %v1678_v5 = vpop.f32.mrf.mxu0  ;;  %v1698_v54 = vpop.f32.mrf.mxu1 }
 0x3af   : > { %v1741_v20 = vadd.f32 %v1678_v5, %v545_v59  ;;  %v1742_v45 = vadd.f32 %v1698_v54, %v586_v1 }
 0x3b1   : > { %v4843_v63 = vmul.f32 -1.442695, %v1741_v20  ;;  %v4844_v47 = vmul.f32 -1.442695, %v1742_v45 }
 0x3b3   : > { %5052 = vpow2.f32 %v4843_v63 }
 0x3b4   : > { %5054 = vpow2.f32 %v4844_v47 }
 0x3b5   : > { %v1738_v8 = vpop.f32.mrf.mxu3  ;;  %v1718_v7 = vpop.f32.mrf.mxu2 }
 0x3b6   : > { %v1744_v29 = vadd.f32 %v1738_v8, %v668_v35  ;;  %v1743_v61 = vadd.f32 %v1718_v7, %v627_v15  ;;  %v6582_v7 = vld [vmem:[#allocation7 + $0x1c0] sm:$0xff]  ;;  %v6590_v15 = vld [vmem:[#allocation7 + $0x1d8] sm:$0xff] }
 0x3b8   : > { %v4845_v41 = vmul.f32 -1.442695, %v1744_v29 }
 0x3b9   : > { %v5053_v25 = vpop.eup %5052 }
 0x3ba   : > { %v5055_v40 = vpop.eup %5054  ;;  %v1748_v27 = vadd.f32 1.0, %v5053_v25  ;;  %5056 = vpow2.f32 %v4845_v41 }
 0x3bb   : > { %v1767_v4 = vadd.f32 1.0, %v5055_v40  ;;  %v6572_v40 = vld [vmem:[#allocation7 + $0x1e8] sm:$0xff] }
 0x3bc   : > { %5058 = vrcp.f32 %v1748_v27  ;;  %v1760_v16 = vand.u32 2147483648, %v1748_v27  ;;  %v1758_v17 = vand.u32 2147483647, %v1748_v27  ;;  %vm1754_vm3 = vweird.f32 %v1748_v27  ;;  %2121 = vmatpush.msra.mxu1 %v6572_v40 }
 0x3bd   : > { %5060 = vrcp.f32 %v1767_v4  ;;  %v1779_v28 = vand.u32 2147483648, %v1767_v4  ;;  %v1777_v60 = vand.u32 2147483647, %v1767_v4  ;;  %vm1773_vm4 = vweird.f32 %v1767_v4 }
 0x3be   : > { %v1761_v62 = vor.u32 1.1754944e-38, %v1760_v16  ;;  %vm1759_vm7 = vcmp.eq.f32.partialorder %v1758_v17, 8.507059e+37  ;;  %v6618_v16 = vld [vmem:[#allocation7 + $0x168] sm:$0xff] }
 0x3bf   : > { %v1780_v24 = vor.u32 1.1754944e-38, %v1779_v28  ;;  %vm1778_vm8 = vcmp.eq.f32.partialorder %v1777_v60, 8.507059e+37  ;;  %v6620_v28 = vld [vmem:[#allocation7 + $0x170] sm:$0xff]  ;;  %v6628_v17 = vld [vmem:[#allocation7 + $0x148] sm:$0xff]  ;;  %v6632_v60 = vld [vmem:[#allocation7 + $0x158] sm:$0xff] }
 0x3c0   : > { %v5057_v10 = vpop.eup %5056 }
 0x3c1   : > { %v1787_v46 = vadd.f32 1.0, %v5057_v10  ;;  %v6584_v10 = vld [vmem:[#allocation7 + $0x1c8] sm:$0xff] }
 0x3c2   : > { %v5059_v58 = vpop.eup %5058  ;;  %2122 = vmatpush.msra.mxu1 %v6584_v10 }
 0x3c3   : > { %v5061_v9 = vpop.eup %5060  ;;  %v1750_v53 = vmul.f32 %v5059_v58, %v1748_v27  ;;  %5062 = vrcp.f32 %v1787_v46  ;;  %vm1755_vm1 = vweird.f32 %v5059_v58  ;;  %v1799_v47 = vand.u32 2147483648, %v1787_v46  ;;  %v6574_v27 = vld [vmem:[#allocation7 + $0x1f0] sm:$0xff] }
 0x3c4   : > { %v1769_v6 = vmul.f32 %v5061_v9, %v1767_v4  ;;  %5064 = vtanh.f32 %v1743_v61  ;;  %vm1774_vm2 = vweird.f32 %v5061_v9  ;;  %vm1756_vm5 = vmor %vm1754_vm3, %vm1755_vm1  ;;  %vm1793_vm10 = vweird.f32 %v1787_v46  ;;  %v6578_v4 = vld [vmem:[#allocation7 + $0x1f8] sm:$0xff]  ;;  %2141 = vmatpush.msra.mxu2 %v6574_v27  ;;  %v6598_v61 = vld [vmem:[#allocation7 + $0x1b0] sm:$0xff] }
 0x3c5   : > { %v1751_v49 = vsub.f32 1.0, %v1750_v53  ;;  %vm1775_vm6 = vmor %vm1773_vm4, %vm1774_vm2  ;;  %v1797_v48 = vand.u32 2147483647, %v1787_v46  ;;  %v1800_v8 = vor.u32 1.1754944e-38, %v1799_v47  ;;  %2161 = vmatpush.msra.mxu3 %v6578_v4  ;;  %v6606_v53 = vld [vmem:[#allocation7 + $0x180] sm:$0xff]  ;;  %v6674_v47 = vld [vmem:[#allocation7 + $0xd0] sm:$0xff] }
 0x3c6   : > { %v1770_v36 = vsub.f32 1.0, %v1769_v6  ;;  %2142 = vmatpush.msra.mxu2 %v6586_v43  ;;  %v6608_v6 = vld [vmem:[#allocation7 + $0x188] sm:$0xff] }
 0x3c7   : > { %v1752_v31 = vmul.f32 %v5059_v58, %v1751_v49  ;;  %vm1798_vm12 = vcmp.eq.f32.partialorder %v1797_v48, 8.507059e+37  ;;  %2162 = vmatpush.msra.mxu3 %v6590_v15  ;;  %v6610_v49 = vld [vmem:[#allocation7 + $0x190] sm:$0xff]  ;;  %v6676_v48 = vld [vmem:[#allocation7 + $0xd8] sm:$0xff] }
 0x3c8   : > { %v1771_v50 = vmul.f32 %v5061_v9, %v1770_v36  ;;  %2143 = vmatpush.msra.mxu2 %v6598_v61  ;;  %v6614_v36 = vld [vmem:[#allocation7 + $0x198] sm:$0xff] }
 0x3c9   : > { %v5063_v42 = vpop.eup %5062  ;;  %v1753_v57 = vadd.f32 %v5059_v58, %v1752_v31  ;;  %v6622_v31 = vld [vmem:[#allocation7 + $0x178] sm:$0xff] }
 0x3ca   : > { %v1772_v38 = vadd.f32 %v5061_v9, %v1771_v50  ;;  %v1789_v12 = vmul.f32 %v5063_v42, %v1787_v46  ;;  %v5065_v23 = vpop.eup %5064  ;;  %vm1794_vm9 = vweird.f32 %v5063_v42  ;;  %v6594_v46 = vld [vmem:[#allocation7 + $0x1a0] sm:$0xff]  ;;  %2144 = vmatpush.msra.mxu2 %v6610_v49  ;;  %v6630_v50 = vld [vmem:[#allocation7 + $0x150] sm:$0xff] }
 0x3cb   : > { %v1757_v18 = vsel %vm1756_vm5, %v5059_v58, %v1753_v57  ;;  %vm1795_vm11 = vmor %vm1793_vm10, %vm1794_vm9  ;;  %v6596_v58 = vld [vmem:[#allocation7 + $0x1a8] sm:$0xff]  ;;  %v6640_v57 = vld [vmem:[#allocation7 + $0x130] sm:$0xff] }
 0x3cc   : > { %v1762_v14 = vsel %vm1759_vm7, %v1761_v62, %v1757_v18  ;;  %v1776_v59 = vsel %vm1775_vm6, %v5061_v9, %v1772_v38  ;;  %v1790_v0 = vsub.f32 1.0, %v1789_v12  ;;  %2123 = vmatpush.msra.mxu1 %v6596_v58  ;;  %v6602_v9 = vld [vmem:[#allocation7 + $0x1b8] sm:$0xff]  ;;  %2145 = vmatpush.msra.mxu2 %v6620_v28  ;;  %v6648_v38 = vld [vmem:[#allocation7 + $0x108] sm:$0xff]  ;;  %v6650_v12 = vld [vmem:[#allocation7 + $0x110] sm:$0xff] }
 0x3cd   : > { %v1781_v1 = vsel %vm1778_vm8, %v1780_v24, %v1776_v59  ;;  %v1804_v5 = vmul.f32 %v5065_v23, %v1762_v14  ;;  %2163 = vmatpush.msra.mxu3 %v6602_v9  ;;  %v6642_v62 = vld [vmem:[#allocation7 + $0x138] sm:$0xff]  ;;  %v6658_v18 = vld [vmem:[#allocation7 + $0xe8] sm:$0xff]  ;;  %v6660_v23 = vld [vmem:[#allocation7 + $0xf0] sm:$0xff] }
 0x3ce   : > { %v1803_v54 = vmul.f32 %v1781_v1, %v6507_v30  ;;  %v1791_v20 = vmul.f32 %v5063_v42, %v1790_v0  ;;  %v6570_v30 = vld [vmem:[#allocation7 + $0x1e0] sm:$0xff]  ;;  %2124 = vmatpush.msra.mxu1 %v6608_v6  ;;  %2146 = vmatpush.msra.mxu2 %v6630_v50  ;;  %v6652_v24 = vld [vmem:[#allocation7 + $0x118] sm:$0xff]  ;;  %v8488_v59 = vld [vmem:[#allocation27_spill] sm:$0xff] }
 0x3cf   : > { %2101 = vmatpush.msra.mxu0 %v6570_v30  ;;  %2164 = vmatpush.msra.mxu3 %v6614_v36  ;;  %v6662_v14 = vld [vmem:[#allocation7 + $0xf8] sm:$0xff]  ;;  %v548_v0 = vadd.f32 %v8488_v59, %v8475_v26  ;;  %v8489_v1 = vld [vmem:[#allocation35_spill] sm:$0xff] }
 0x3d0   : > { %v6561_v45 = vadd.f32 %v1804_v5, %v1803_v54  ;;  %v1792_v63 = vadd.f32 %v5063_v42, %v1791_v20  ;;  %2125 = vmatpush.msra.mxu1 %v6618_v16  ;;  %2147 = vmatpush.msra.mxu2 %v6640_v57  ;;  %v589_v5 = vadd.f32 %v8489_v1, %v8473_v11  ;;  %v6686_v59 = vld [vmem:[#allocation7 + $0xb8] sm:$0xff] }
 0x3d1   : > { %2102 = vmatpush.msra.mxu0 %v6582_v7  ;;  %2165 = vmatpush.msra.mxu3 %v6622_v31 }
 0x3d2   : > { %5066 = vtanh.f32 %v6561_v45  ;;  %v1796_v35 = vsel %vm1795_vm11, %v5063_v42, %v1792_v63  ;;  %2126 = vmatpush.msra.mxu1 %v6628_v17  ;;  %v6638_v42 = vld [vmem:[#allocation7 + $0x128] sm:$0xff]  ;;  %2148 = vmatpush.msra.mxu2 %v6650_v12 }
 0x3d3   : > { %v1801_v41 = vsel %vm1798_vm12, %v1800_v8, %v1796_v35  ;;  %2103 = vmatpush.msra.mxu0 %v6594_v46  ;;  %2166 = vmatpush.msra.mxu3 %v6632_v60  ;;  %v6672_v63 = vld [vmem:[#allocation7 + $0xc8] sm:$0xff] }
 0x3d4   : > { %2127 = vmatpush.msra.mxu1 %v6638_v42  ;;  %2149 = vmatpush.msra.mxu2 %v6660_v23 }
 0x3d5   : > { %2104 = vmatpush.msra.mxu0 %v6606_v53  ;;  %2167 = vmatpush.msra.mxu3 %v6642_v62 }
 0x3d6   : > { %2128 = vmatpush.msra.mxu1 %v6648_v38  ;;  %2150 = vmatpush.msra.mxu2 %v6674_v47 }
 0x3d7   : > { %2105 = vmatpush.msra.mxu0 %v6516_v55  ;;  %2168 = vmatpush.msra.mxu3 %v6652_v24 }
 0x3d8   : > { %v5067_v29 = vpop.eup %5066  ;;  %2129 = vmatpush.msra.mxu1 %v6658_v18 }
 0x3d9   : > { %v6564_v25 = vmul.f32 %v5067_v29, %v1801_v41  ;;  %2106 = vmatpush.msra.mxu0 %v6519_v33  ;;  %2169 = vmatpush.msra.mxu3 %v6662_v14  ;;  %v6682_v29 = vld [vmem:[#allocation7 + $0xa8] sm:$0xff]  ;;  %v6684_v41 = vld [vmem:[#allocation7 + $0xb0] sm:$0xff] }
 0x3da   : > { %2130 = vmatpush.msra.mxu1 %v6672_v63  ;;  %2151 = vmatpush.msra.mxu2 %v6684_v41 }
 0x3db   : > { %8487 = vst [vmem:[#allocation65_spill] sm:$0xff] %v6564_v25  ;;  %1897 = vmatmul.f32.vlgmr.msrb.gmra.mxu0 %v6564_v25  ;;  %1917 = vmatmul.f32.vlgmr.msrb.gmra.mxu1 %v6564_v25 }
 0x3dc   : > { %1937 = vmatmul.f32.vlgmr.msrb.gmra.mxu2 %v6564_v25  ;;  %1957 = vmatmul.f32.vlgmr.msrb.gmra.mxu3 %v6564_v25 }
 0x3dd   : > { %2107 = vmatpush.msra.mxu0 %v6522_v34  ;;  %2170 = vmatpush.msra.mxu3 %v6676_v48 }
 0x3de   : > { %2131 = vmatpush.msra.mxu1 %v6682_v29 }
 0x3df   : > { %2108 = vmatpush.msra.mxu0 %v6525_v37  ;;  %2171 = vmatpush.msra.mxu3 %v6686_v59 }
 0x3e1   : > { %2109 = vmatpush.msra.mxu0 %v6528_v51 }
 0x3e3   : > { %2110 = vmatpush.msra.mxu0 %v6535_v39 }
 0x3e5   : > { %2111 = vmatpush.msra.mxu0 %v6538_v13 }
 0x3e7   : > { %2112 = vmatpush.msra.mxu0 %v6541_v19 }
 0x3e9   : > { %2113 = vmatpush.msra.mxu0 %v6546_v22 }
 0x3eb   : > { %2114 = vmatpush.msra.mxu0 %v6549_v44  ;;  %v6734_v44 = vld [vmem:[#allocation7 + $0x10] sm:$0xff] }
 0x3ec   : > { %8497 = vst [vmem:[#allocation55_spill] sm:$0xff] %v6734_v44 }
 0x3ed   : > { %2115 = vmatpush.msra.mxu0 %v6552_v3 }
 0x3ef   : > { %2116 = vmatpush.msra.mxu0 %v6555_v2 }
 0x3f1   : > { %2321 = vmatpush.msrb.mxu0 %v6570_v30 }
 0x3f3   : > { %2322 = vmatpush.msrb.mxu0 %v6582_v7 }
 0x3f5   : > { %2323 = vmatpush.msrb.mxu0 %v6594_v46 }
 0x3f7   : > { %2324 = vmatpush.msrb.mxu0 %v6606_v53 }
 0x3f9   : > { %2325 = vmatpush.msrb.mxu0 %v6516_v55 }
 0x3fb   : > { %2326 = vmatpush.msrb.mxu0 %v6519_v33 }
 0x3fd   : > { %2327 = vmatpush.msrb.mxu0 %v6522_v34 }
 0x3ff   : > { %2328 = vmatpush.msrb.mxu0 %v6525_v37 }
 0x401   : > { %2329 = vmatpush.msrb.mxu0 %v6528_v51 }
 0x403   : > { %2330 = vmatpush.msrb.mxu0 %v6535_v39 }
 0x405   : > { %2331 = vmatpush.msrb.mxu0 %v6538_v13 }
 0x407   : > { %2332 = vmatpush.msrb.mxu0 %v6541_v19  ;;  %v8502_v19 = vld [vmem:[#allocation64_spill] sm:$0xff] }
 0x409   : > { %2333 = vmatpush.msrb.mxu0 %v6546_v22  ;;  %v8506_v22 = vld [vmem:[#allocation55_spill] sm:$0xff] }
 0x40b   : > { %2334 = vmatpush.msrb.mxu0 %v8502_v19  ;;  %v2503_v19 = vld [vmem:[#allocation9 + $0xc8] sm:$0xff] }
 0x40d   : > { %2335 = vmatpush.msrb.mxu0 %v6552_v3  ;;  %v2538_v3 = vld [vmem:[#allocation9 + $0x1e0] sm:$0xff] }
 0x40f   : > { %2336 = vmatpush.msrb.mxu0 %v6555_v2  ;;  %v2537_v2 = vld [vmem:[#allocation9 + $0x1d8] sm:$0xff] }
 0x458   : > { %v1898_v54 = vpop.f32.mrf.mxu0  ;;  %v1918_v20 = vpop.f32.mrf.mxu1 }
 0x459   : > { %v1961_v35 = vadd.f32 %v1898_v54, %v548_v0  ;;  %v1962_v8 = vadd.f32 %v1918_v20, %v589_v5  ;;  %v6692_v0 = vld [vmem:[#allocation7 + $0x88] sm:$0xff]  ;;  %v6694_v5 = vld [vmem:[#allocation7 + $0x90] sm:$0xff]  ;;  %v6696_v54 = vld [vmem:[#allocation7 + $0x98] sm:$0xff] }
 0x45a   : > { %2132 = vmatpush.msra.mxu1 %v6692_v0  ;;  %v8490_v20 = vld [vmem:[#allocation44_spill] sm:$0xff]  ;;  %2152 = vmatpush.msra.mxu2 %v6694_v5 }
 0x45b   : > { %v4846_v1 = vmul.f32 -1.442695, %v1961_v35  ;;  %v4847_v25 = vmul.f32 -1.442695, %v1962_v8  ;;  %v671_v35 = vadd.f32 %v8490_v20, %v8477_v21  ;;  %2172 = vmatpush.msra.mxu3 %v6696_v54  ;;  %v6704_v8 = vld [vmem:[#allocation7 + $0x68] sm:$0xff]  ;;  %v6716_v20 = vld [vmem:[#allocation7 + $0x50] sm:$0xff] }
 0x45c   : > { %8491 = vst [vmem:[#allocation51_spill] sm:$0xff] %v6704_v8  ;;  %2133 = vmatpush.msra.mxu1 %v6704_v8  ;;  %2153 = vmatpush.msra.mxu2 %v6706_v32  ;;  %v6718_v21 = vld [vmem:[#allocation7 + $0x58] sm:$0xff]  ;;  %v6732_v8 = vld [vmem:[#allocation7 + $0x8] sm:$0xff] }
 0x45d   : > { %5068 = vpow2.f32 %v4846_v1  ;;  %2173 = vmatpush.msra.mxu3 %v6708_v56  ;;  %8495 = vst [vmem:[#allocation53_spill] sm:$0xff] %v6716_v20  ;;  %v6728_v56 = vld [vmem:[#allocation7 + $0x38] sm:$0xff] }
 0x45e   : > { %5070 = vpow2.f32 %v4847_v25  ;;  %v6714_v25 = vld [vmem:[#allocation7 + $0x48] sm:$0xff]  ;;  %8496 = vst [vmem:[#allocation54_spill] sm:$0xff] %v6718_v21  ;;  %2154 = vmatpush.msra.mxu2 %v6716_v20 }
 0x45f   : > { %v1958_v11 = vpop.f32.mrf.mxu3  ;;  %8494 = vst [vmem:[#allocation68_spill] sm:$0xff] %v6714_v25  ;;  %2134 = vmatpush.msra.mxu1 %v6714_v25  ;;  %2174 = vmatpush.msra.mxu3 %v6718_v21 }
 0x460   : > { %v1964_v1 = vadd.f32 %v1958_v11, %v671_v35  ;;  %v6724_v11 = vld [vmem:[#allocation7 + $0x28] sm:$0xff]  ;;  %v6726_v35 = vld [vmem:[#allocation7 + $0x30] sm:$0xff] }
 0x461   : > { %2135 = vmatpush.msra.mxu1 %v6724_v11  ;;  %2155 = vmatpush.msra.mxu2 %v6726_v35 }
 0x462   : > { %v4848_v26 = vmul.f32 -1.442695, %v1964_v1  ;;  %v6736_v1 = vld [vmem:[#allocation7 + $0x18] sm:$0xff]  ;;  %2175 = vmatpush.msra.mxu3 %v6728_v56 }
 0x463   : > { %v5069_v32 = vpop.eup %5068  ;;  %2136 = vmatpush.msra.mxu1 %v6732_v8  ;;  %2156 = vmatpush.msra.mxu2 %v6734_v44 }
 0x464   : > { %v5071_v20 = vpop.eup %5070  ;;  %v6738_v25 = vadd.f32 1.0, %v5069_v32  ;;  %5072 = vpow2.f32 %v4848_v26  ;;  %2176 = vmatpush.msra.mxu3 %v6736_v1  ;;  %v1938_v26 = vpop.f32.mrf.mxu2 }
 0x465   : > { %v6742_v21 = vadd.f32 1.0, %v5071_v20  ;;  %2341 = vmatpush.msrb.mxu1 %v6572_v40  ;;  %2361 = vmatpush.msrb.mxu2 %v6574_v27  ;;  %v8498_v20 = vld [vmem:[#allocation34_spill] sm:$0xff] }
 0x466   : > { %5074 = vrcp.f32 %v6738_v25  ;;  %2381 = vmatpush.msrb.mxu3 %v6578_v4  ;;  %v630_v44 = vadd.f32 %v8498_v20, %v8479_v52  ;;  %vm1974_vm15 = vweird.f32 %v6738_v25  ;;  %v2522_v20 = vld [vmem:[#allocation9 + $0x160] sm:$0xff] }
 0x467   : > { %5076 = vrcp.f32 %v6742_v21  ;;  %2342 = vmatpush.msrb.mxu1 %v6584_v10  ;;  %2362 = vmatpush.msrb.mxu2 %v6586_v43  ;;  %v1999_v46 = vand.u32 2147483648, %v6742_v21  ;;  %vm1993_vm0 = vweird.f32 %v6742_v21 }
 0x468   : > { %2382 = vmatpush.msrb.mxu3 %v6590_v15  ;;  %v1963_v27 = vadd.f32 %v1938_v26, %v630_v44  ;;  %v1980_v15 = vand.u32 2147483648, %v6738_v25  ;;  %v2528_v26 = vld [vmem:[#allocation9 + $0x190] sm:$0xff] }
 0x469   : > { %2343 = vmatpush.msrb.mxu1 %v6596_v58  ;;  %2363 = vmatpush.msrb.mxu2 %v6598_v61  ;;  %v1978_v61 = vand.u32 2147483647, %v6738_v25 }
 0x46a   : > { %v5073_v32 = vpop.eup %5072  ;;  %2383 = vmatpush.msrb.mxu3 %v6602_v9  ;;  %v1997_v9 = vand.u32 2147483647, %v6742_v21  ;;  %v1981_v33 = vor.u32 1.1754944e-38, %v1980_v15  ;;  %v2525_v15 = vld [vmem:[#allocation9 + $0x178] sm:$0xff] }
 0x46b   : > { %v6760_v30 = vadd.f32 1.0, %v5073_v32  ;;  %2344 = vmatpush.msrb.mxu1 %v6608_v6  ;;  %2364 = vmatpush.msrb.mxu2 %v6610_v49  ;;  %vm1979_vm3 = vcmp.eq.f32.partialorder %v1978_v61, 8.507059e+37  ;;  %v2529_v32 = vld [vmem:[#allocation9 + $0x198] sm:$0xff]  ;;  %v2518_v61 = vld [vmem:[#allocation9 + $0x140] sm:$0xff] }
 0x46c   : > { %v5075_v40 = vpop.eup %5074  ;;  %2384 = vmatpush.msrb.mxu3 %v6614_v36  ;;  %vm1998_vm4 = vcmp.eq.f32.partialorder %v1997_v9, 8.507059e+37  ;;  %v2520_v9 = vld [vmem:[#allocation9 + $0x150] sm:$0xff] }
 0x46d   : > { %v5077_v4 = vpop.eup %5076  ;;  %v1970_v7 = vmul.f32 %v5075_v40, %v6738_v25  ;;  %5078 = vrcp.f32 %v6760_v30  ;;  %2345 = vmatpush.msrb.mxu1 %v6618_v16  ;;  %2365 = vmatpush.msrb.mxu2 %v6620_v28  ;;  %vm1975_vm13 = vweird.f32 %v5075_v40  ;;  %v2000_v16 = vor.u32 1.1754944e-38, %v1999_v46  ;;  %v2532_v25 = vld [vmem:[#allocation9 + $0x1b0] sm:$0xff] }
 0x46e   : > { %v1989_v10 = vmul.f32 %v5077_v4, %v6742_v21  ;;  %5080 = vtanh.f32 %v1963_v27  ;;  %2385 = vmatpush.msrb.mxu3 %v6622_v31  ;;  %vm1994_vm14 = vweird.f32 %v5077_v4  ;;  %vm1976_vm1 = vmor %vm1974_vm15, %vm1975_vm13  ;;  %v2019_v39 = vand.u32 2147483648, %v6760_v30  ;;  %v8507_v27 = vld [vmem:[#allocation42_spill] sm:$0xff] }
 0x46f   : > { %v1971_v44 = vsub.f32 1.0, %v1970_v7  ;;  %2346 = vmatpush.msrb.mxu1 %v6628_v17  ;;  %2366 = vmatpush.msrb.mxu2 %v6630_v50  ;;  %vm1995_vm2 = vmor %vm1993_vm0, %vm1994_vm14  ;;  %vm2013_vm6 = vweird.f32 %v6760_v30 }
 0x470   : > { %v1990_v43 = vsub.f32 1.0, %v1989_v10  ;;  %2386 = vmatpush.msrb.mxu3 %v6632_v60  ;;  %v8509_v10 = vld [vmem:[#allocation43_spill] sm:$0xff] }
 0x471   : > { %v1972_v58 = vmul.f32 %v5075_v40, %v1971_v44  ;;  %2347 = vmatpush.msrb.mxu1 %v6638_v42  ;;  %2367 = vmatpush.msrb.mxu2 %v6640_v57  ;;  %v8510_v44 = vld [vmem:[#allocation38_spill] sm:$0xff] }
 0x472   : > { %v1991_v55 = vmul.f32 %v5077_v4, %v1990_v43  ;;  %2387 = vmatpush.msrb.mxu3 %v6642_v62  ;;  %v8499_v62 = vld [vmem:[#allocation51_spill] sm:$0xff]  ;;  %v592_v43 = vadd.f32 %v8510_v44, %v8509_v10  ;;  %v2485_v44 = vld [vmem:[#allocation9 + $0x38] sm:$0xff] }
 0x473   : > { %v6785_v53 = vpop.eup %5078  ;;  %v1973_v6 = vadd.f32 %v5075_v40, %v1972_v58  ;;  %2348 = vmatpush.msrb.mxu1 %v6648_v38  ;;  %2368 = vmatpush.msrb.mxu2 %v6650_v12  ;;  %v2020_v38 = vor.u32 1.1754944e-38, %v2019_v39  ;;  %v8500_v12 = vld [vmem:[#allocation66_spill] sm:$0xff] }
 0x474   : > { %v1992_v49 = vadd.f32 %v5077_v4, %v1991_v55  ;;  %v2009_v36 = vmul.f32 %v6785_v53, %v6760_v30  ;;  %v5081_v21 = vpop.eup %5080  ;;  %2388 = vmatpush.msrb.mxu3 %v6652_v24  ;;  %vm2014_vm5 = vweird.f32 %v6785_v53  ;;  %v8501_v24 = vld [vmem:[#allocation67_spill] sm:$0xff]  ;;  %v2506_v39 = vld [vmem:[#allocation9 + $0xe0] sm:$0xff] }
 0x475   : > { %v1977_v28 = vsel %vm1976_vm1, %v5075_v40, %v1973_v6  ;;  %2349 = vmatpush.msrb.mxu1 %v6658_v18  ;;  %2369 = vmatpush.msrb.mxu2 %v6660_v23  ;;  %vm2015_vm7 = vmor %vm2013_vm6, %vm2014_vm5  ;;  %v8503_v18 = vld [vmem:[#allocation68_spill] sm:$0xff]  ;;  %v2519_v55 = vld [vmem:[#allocation9 + $0x148] sm:$0xff] }
 0x476   : > { %v1982_v34 = vsel %vm1979_vm3, %v1981_v33, %v1977_v28  ;;  %v1996_v31 = vsel %vm1995_vm2, %v5077_v4, %v1992_v49  ;;  %v2010_v17 = vsub.f32 1.0, %v2009_v36  ;;  %2389 = vmatpush.msrb.mxu3 %v6662_v14  ;;  %v2524_v40 = vld [vmem:[#allocation9 + $0x170] sm:$0xff]  ;;  %v2521_v33 = vld [vmem:[#allocation9 + $0x158] sm:$0xff]  ;;  %v2514_v49 = vld [vmem:[#allocation9 + $0x120] sm:$0xff] }
 0x477   : > { %v2001_v50 = vsel %vm1998_vm4, %v2000_v16, %v1996_v31  ;;  %v2024_v60 = vmul.f32 %v5081_v21, %v1982_v34  ;;  %2350 = vmatpush.msrb.mxu1 %v6672_v63  ;;  %2370 = vmatpush.msrb.mxu2 %v6674_v47  ;;  %v8504_v63 = vld [vmem:[#allocation53_spill] sm:$0xff]  ;;  %v8505_v47 = vld [vmem:[#allocation54_spill] sm:$0xff]  ;;  %v8508_v4 = vld [vmem:[#allocation28_spill] sm:$0xff] }
 0x478   : > { %v2023_v42 = vmul.f32 %v2001_v50, %v6561_v45  ;;  %v2011_v37 = vmul.f32 %v6785_v53, %v2010_v17  ;;  %2390 = vmatpush.msrb.mxu3 %v6676_v48  ;;  %v2017_v45 = vand.u32 2147483647, %v6760_v30  ;;  %v2523_v30 = vld [vmem:[#allocation9 + $0x168] sm:$0xff]  ;;  %v551_v7 = vadd.f32 %v8508_v4, %v8507_v27  ;;  %v2516_v16 = vld [vmem:[#allocation9 + $0x130] sm:$0xff]  ;;  %v2517_v34 = vld [vmem:[#allocation9 + $0x138] sm:$0xff] }
 0x479   : > { %2351 = vmatpush.msrb.mxu1 %v6682_v29  ;;  %2371 = vmatpush.msrb.mxu2 %v6684_v41  ;;  %v2539_v29 = vld [vmem:[#allocation9 + $0x1e8] sm:$0xff]  ;;  %v2540_v41 = vld [vmem:[#allocation9 + $0x1f0] sm:$0xff]  ;;  %v2510_v31 = vld [vmem:[#allocation9 + $0x100] sm:$0xff] }
 0x47a   : > { %v6809_v57 = vadd.f32 %v2024_v60, %v2023_v42  ;;  %v2012_v51 = vadd.f32 %v6785_v53, %v2011_v37  ;;  %2391 = vmatpush.msrb.mxu3 %v6686_v59  ;;  %vm2018_vm8 = vcmp.eq.f32.partialorder %v2017_v45, 8.507059e+37  ;;  %v2534_v59 = vld [vmem:[#allocation9 + $0x1c0] sm:$0xff]  ;;  %v2515_v36 = vld [vmem:[#allocation9 + $0x128] sm:$0xff]  ;;  %v2512_v50 = vld [vmem:[#allocation9 + $0x110] sm:$0xff] }
 0x47b   : > { %2352 = vmatpush.msrb.mxu1 %v6692_v0  ;;  %2372 = vmatpush.msrb.mxu2 %v6694_v5  ;;  %v2535_v0 = vld [vmem:[#allocation9 + $0x1c8] sm:$0xff]  ;;  %v2536_v5 = vld [vmem:[#allocation9 + $0x1d0] sm:$0xff]  ;;  %v2513_v60 = vld [vmem:[#allocation9 + $0x118] sm:$0xff] }
 0x47c   : > { %5082 = vtanh.f32 %v6809_v57  ;;  %2392 = vmatpush.msrb.mxu3 %v6696_v54  ;;  %v2016_v13 = vsel %vm2015_vm7, %v6785_v53, %v2012_v51  ;;  %v2530_v54 = vld [vmem:[#allocation9 + $0x1a0] sm:$0xff]  ;;  %v2511_v17 = vld [vmem:[#allocation9 + $0x108] sm:$0xff]  ;;  %v8512_v37 = vld [vmem:[#allocation45_spill] sm:$0xff] }
 0x47d   : > { %2353 = vmatpush.msrb.mxu1 %v8499_v62  ;;  %2373 = vmatpush.msrb.mxu2 %v8500_v12  ;;  %v2021_v14 = vsel %vm2018_vm8, %v2020_v38, %v2016_v13  ;;  %v8511_v42 = vld [vmem:[#allocation47_spill] sm:$0xff]  ;;  %v2508_v13 = vld [vmem:[#allocation9 + $0xf0] sm:$0xff]  ;;  %v2509_v38 = vld [vmem:[#allocation9 + $0xf8] sm:$0xff] }
 0x47e   : > { %2393 = vmatpush.msrb.mxu3 %v8501_v24  ;;  %v674_v51 = vadd.f32 %v8512_v37, %v8511_v42  ;;  %v2507_v45 = vld [vmem:[#allocation9 + $0xe8] sm:$0xff]  ;;  %v2502_v24 = vld [vmem:[#allocation9 + $0xc0] sm:$0xff] }
 0x47f   : > { %2354 = vmatpush.msrb.mxu1 %v8503_v18  ;;  %2374 = vmatpush.msrb.mxu2 %v8504_v63  ;;  %v2504_v18 = vld [vmem:[#allocation9 + $0xd0] sm:$0xff]  ;;  %v2498_v63 = vld [vmem:[#allocation9 + $0xa0] sm:$0xff]  ;;  %v2483_v4 = vld [vmem:[#allocation9 + $0x28] sm:$0xff] }
 0x480   : > { %2394 = vmatpush.msrb.mxu3 %v8505_v47  ;;  %v2499_v47 = vld [vmem:[#allocation9 + $0xa8] sm:$0xff] }
 0x481   : > { %2355 = vmatpush.msrb.mxu1 %v6724_v11  ;;  %2375 = vmatpush.msrb.mxu2 %v6726_v35  ;;  %v2533_v11 = vld [vmem:[#allocation9 + $0x1b8] sm:$0xff]  ;;  %v2526_v35 = vld [vmem:[#allocation9 + $0x180] sm:$0xff] }
 0x482   : > { %v5083_v23 = vpop.eup %5082  ;;  %2395 = vmatpush.msrb.mxu3 %v6728_v56  ;;  %v2541_v56 = vld [vmem:[#allocation9 + $0x1f8] sm:$0xff] }
 0x483   : > { %v6836_v48 = vmul.f32 %v5083_v23, %v2021_v14  ;;  %2356 = vmatpush.msrb.mxu1 %v6732_v8  ;;  %2376 = vmatpush.msrb.mxu2 %v8506_v22  ;;  %v2531_v8 = vld [vmem:[#allocation9 + $0x1a8] sm:$0xff]  ;;  %v2505_v23 = vld [vmem:[#allocation9 + $0xd8] sm:$0xff]  ;;  %v2500_v22 = vld [vmem:[#allocation9 + $0xb0] sm:$0xff] }
 0x484   : > { %2396 = vmatpush.msrb.mxu3 %v6736_v1  ;;  %v2527_v1 = vld [vmem:[#allocation9 + $0x188] sm:$0xff] }
 0x485   : > { %2117 = vmatmul.f32.vlgmr.msra.gmra.mxu0 %v6836_v48  ;;  %2137 = vmatmul.f32.vlgmr.msra.gmra.mxu1 %v6836_v48 }
 0x486   : > { %2157 = vmatmul.f32.vlgmr.msra.gmra.mxu2 %v6836_v48  ;;  %2177 = vmatmul.f32.vlgmr.msra.gmra.mxu3 %v6836_v48 }
 0x487   : > { %2552 = vmatpush.msra.mxu0 %v2538_v3  ;;  %2593 = vmatpush.msra.mxu1 %v2539_v29  ;;  %v2501_v29 = vld [vmem:[#allocation9 + $0xb8] sm:$0xff] }
 0x488   : > { %2634 = vmatpush.msra.mxu2 %v2540_v41  ;;  %2675 = vmatpush.msra.mxu3 %v2541_v56  ;;  %v2494_v41 = vld [vmem:[#allocation9 + $0x80] sm:$0xff]  ;;  %v2495_v56 = vld [vmem:[#allocation9 + $0x88] sm:$0xff] }
 0x489   : > { %2553 = vmatpush.msra.mxu0 %v2534_v59  ;;  %2594 = vmatpush.msra.mxu1 %v2535_v0 }
 0x48a   : > { %2635 = vmatpush.msra.mxu2 %v2536_v5  ;;  %2676 = vmatpush.msra.mxu3 %v2537_v2  ;;  %v2496_v5 = vld [vmem:[#allocation9 + $0x90] sm:$0xff]  ;;  %v2497_v2 = vld [vmem:[#allocation9 + $0x98] sm:$0xff] }
 0x48b   : > { %2554 = vmatpush.msra.mxu0 %v2530_v54  ;;  %2595 = vmatpush.msra.mxu1 %v2531_v8  ;;  %v2490_v8 = vld [vmem:[#allocation9 + $0x60] sm:$0xff] }
 0x48c   : > { %2636 = vmatpush.msra.mxu2 %v2532_v25  ;;  %2677 = vmatpush.msra.mxu3 %v2533_v11  ;;  %v2491_v25 = vld [vmem:[#allocation9 + $0x68] sm:$0xff]  ;;  %v2492_v11 = vld [vmem:[#allocation9 + $0x70] sm:$0xff] }
 0x48d   : > { %2555 = vmatpush.msra.mxu0 %v2526_v35  ;;  %2596 = vmatpush.msra.mxu1 %v2527_v1  ;;  %v2493_v35 = vld [vmem:[#allocation9 + $0x78] sm:$0xff]  ;;  %v2486_v1 = vld [vmem:[#allocation9 + $0x40] sm:$0xff] }
 0x48e   : > { %2637 = vmatpush.msra.mxu2 %v2528_v26  ;;  %2678 = vmatpush.msra.mxu3 %v2529_v32  ;;  %v2487_v26 = vld [vmem:[#allocation9 + $0x48] sm:$0xff]  ;;  %v2488_v32 = vld [vmem:[#allocation9 + $0x50] sm:$0xff] }
 0x48f   : > { %2556 = vmatpush.msra.mxu0 %v2522_v20  ;;  %2597 = vmatpush.msra.mxu1 %v2523_v30  ;;  %v2489_v20 = vld [vmem:[#allocation9 + $0x58] sm:$0xff]  ;;  %v2482_v30 = vld [vmem:[#allocation9 + $0x20] sm:$0xff] }
 0x490   : > { %2638 = vmatpush.msra.mxu2 %v2524_v40  ;;  %2679 = vmatpush.msra.mxu3 %v2525_v15  ;;  %v8513_v15 = vld [vmem:[#allocation36_spill] sm:$0xff] }
 0x491   : > { %2557 = vmatpush.msra.mxu0 %v2518_v61  ;;  %2598 = vmatpush.msra.mxu1 %v2519_v55  ;;  %v2479_v61 = vld [vmem:[#allocation9 + $0x8] sm:$0xff] }
 0x492   : > { %2639 = vmatpush.msra.mxu2 %v2520_v9  ;;  %2680 = vmatpush.msra.mxu3 %v2521_v33  ;;  %v2480_v9 = vld [vmem:[#allocation9 + $0x10] sm:$0xff] }
 0x493   : > { %2558 = vmatpush.msra.mxu0 %v2514_v49  ;;  %2599 = vmatpush.msra.mxu1 %v2515_v36 }
 0x494   : > { %2640 = vmatpush.msra.mxu2 %v2516_v16  ;;  %2681 = vmatpush.msra.mxu3 %v2517_v34 }
 0x495   : > { %2559 = vmatpush.msra.mxu0 %v2510_v31  ;;  %2600 = vmatpush.msra.mxu1 %v2511_v17 }
 0x496   : > { %2641 = vmatpush.msra.mxu2 %v2512_v50  ;;  %2682 = vmatpush.msra.mxu3 %v2513_v60 }
 0x497   : > { %2560 = vmatpush.msra.mxu0 %v2506_v39  ;;  %2601 = vmatpush.msra.mxu1 %v2507_v45 }
 0x498   : > { %2642 = vmatpush.msra.mxu2 %v2508_v13  ;;  %2683 = vmatpush.msra.mxu3 %v2509_v38 }
 0x499   : > { %2561 = vmatpush.msra.mxu0 %v2502_v24  ;;  %2602 = vmatpush.msra.mxu1 %v2503_v19 }
 0x49a   : > { %2643 = vmatpush.msra.mxu2 %v2504_v18  ;;  %2684 = vmatpush.msra.mxu3 %v2505_v23 }
 0x49b   : > { %2562 = vmatpush.msra.mxu0 %v2498_v63  ;;  %2603 = vmatpush.msra.mxu1 %v2499_v47 }
 0x49c   : > { %2644 = vmatpush.msra.mxu2 %v2500_v22  ;;  %2685 = vmatpush.msra.mxu3 %v2501_v29 }
 0x49d   : > { %2563 = vmatpush.msra.mxu0 %v2494_v41  ;;  %2604 = vmatpush.msra.mxu1 %v2495_v56 }
 0x49e   : > { %2645 = vmatpush.msra.mxu2 %v2496_v5  ;;  %2686 = vmatpush.msra.mxu3 %v2497_v2 }
 0x49f   : > { %2564 = vmatpush.msra.mxu0 %v2490_v8  ;;  %2605 = vmatpush.msra.mxu1 %v2491_v25  ;;  %v8515_v8 = vld [vmem:[#allocation52_spill] sm:$0xff]  ;;  %v8516_v25 = vld [vmem:[#allocation62_spill] sm:$0xff] }
 0x4a0   : > { %2646 = vmatpush.msra.mxu2 %v2492_v11  ;;  %2687 = vmatpush.msra.mxu3 %v2493_v35  ;;  %v6888_v11 = vld [vmem:[#allocation10 + $0x1e0] sm:$0xff]  ;;  %v6890_v35 = vld [vmem:[#allocation10 + $0x1e8] sm:$0xff] }
 0x4a1   : > { %2565 = vmatpush.msra.mxu0 %v2486_v1  ;;  %2606 = vmatpush.msra.mxu1 %v2487_v26  ;;  %v6892_v1 = vld [vmem:[#allocation10 + $0x1c0] sm:$0xff]  ;;  %v6896_v26 = vld [vmem:[#allocation10 + $0x1c8] sm:$0xff] }
 0x4a2   : > { %2647 = vmatpush.msra.mxu2 %v2488_v32  ;;  %2688 = vmatpush.msra.mxu3 %v2489_v20  ;;  %v6898_v32 = vld [vmem:[#allocation10 + $0x1f8] sm:$0xff]  ;;  %v6901_v20 = vld [vmem:[#allocation10 + $0x1a0] sm:$0xff] }
 0x4a3   : > { %2566 = vmatpush.msra.mxu0 %v2482_v30  ;;  %2607 = vmatpush.msra.mxu1 %v2483_v4  ;;  %v6903_v30 = vld [vmem:[#allocation10 + $0x1a8] sm:$0xff] }
 0x4a4   : > { %2689 = vmatpush.msra.mxu3 %v2485_v44  ;;  %v8517_v4 = vld [vmem:[#allocation63_spill] sm:$0xff]  ;;  %v6924_v44 = vld [vmem:[#allocation10 + $0x1f0] sm:$0xff] }
 0x4a5   : > { %2608 = vmatpush.msra.mxu1 %v2479_v61  ;;  %v6941_v61 = vld [vmem:[#allocation10 + $0x168] sm:$0xff] }
 0x502   : > { %v2118_v46 = vpop.f32.mrf.mxu0  ;;  %v2138_v58 = vpop.f32.mrf.mxu1 }
 0x503   : > { %v2181_v53 = vadd.f32 %v2118_v46, %v551_v7  ;;  %v2182_v6 = vadd.f32 %v2138_v58, %v592_v43  ;;  %v2484_v7 = vld [vmem:[#allocation9 + $0x30] sm:$0xff]  ;;  %v633_v46 = vadd.f32 %v8513_v15, %v8479_v52  ;;  %v2478_v58 = vld [vmem:[#allocation9] sm:$0xff]  ;;  %v6929_v15 = vld [vmem:[#allocation10 + $0x1b8] sm:$0xff] }
 0x504   : > { %2648 = vmatpush.msra.mxu2 %v2484_v7  ;;  %2567 = vmatpush.msra.mxu0 %v2478_v58  ;;  %v8518_v7 = vld [vmem:[#allocation65_spill] sm:$0xff]  ;;  %v6934_v58 = vld [vmem:[#allocation10 + $0x188] sm:$0xff] }
 0x505   : > { %v4849_v28 = vmul.f32 -1.442695, %v2181_v53  ;;  %v4850_v21 = vmul.f32 -1.442695, %v2182_v6  ;;  %v2481_v53 = vld [vmem:[#allocation9 + $0x18] sm:$0xff] }
 0x506   : > { %2649 = vmatpush.msra.mxu2 %v2480_v9  ;;  %2690 = vmatpush.msra.mxu3 %v2481_v53  ;;  %v6945_v9 = vld [vmem:[#allocation10 + $0x1b0] sm:$0xff] }
 0x507   : > { %5084 = vpow2.f32 %v4849_v28  ;;  %v6949_v53 = vld [vmem:[#allocation10 + $0x190] sm:$0xff] }
 0x508   : > { %5086 = vpow2.f32 %v4850_v21 }
 0x509   : > { %v2178_v62 = vpop.f32.mrf.mxu3  ;;  %v2158_v40 = vpop.f32.mrf.mxu2 }
 0x50a   : > { %v2184_v12 = vadd.f32 %v2178_v62, %v674_v51  ;;  %v2183_v33 = vadd.f32 %v2158_v40, %v633_v46  ;;  %v6905_v40 = vld [vmem:[#allocation10 + $0x1d8] sm:$0xff]  ;;  %v6932_v46 = vld [vmem:[#allocation10 + $0x180] sm:$0xff] }
 0x50c   : > { %v4851_v14 = vmul.f32 -1.442695, %v2184_v12 }
 0x50d   : > { %v5085_v3 = vpop.eup %5084 }
 0x50e   : > { %v5087_v59 = vpop.eup %5086  ;;  %v6856_v0 = vadd.f32 1.0, %v5085_v3  ;;  %5088 = vpow2.f32 %v4851_v14 }
 0x50f   : > { %v6858_v54 = vadd.f32 1.0, %v5087_v59 }
 0x510   : > { %5090 = vrcp.f32 %v6856_v0  ;;  %v2200_v34 = vand.u32 2147483648, %v6856_v0  ;;  %v2198_v50 = vand.u32 2147483647, %v6856_v0  ;;  %vm2194_vm11 = vweird.f32 %v6856_v0 }
 0x511   : > { %5092 = vrcp.f32 %v6858_v54  ;;  %v2219_v31 = vand.u32 2147483648, %v6858_v54  ;;  %v2217_v37 = vand.u32 2147483647, %v6858_v54  ;;  %vm2213_vm12 = vweird.f32 %v6858_v54 }
 0x512   : > { %v2201_v45 = vor.u32 1.1754944e-38, %v2200_v34  ;;  %vm2199_vm15 = vcmp.eq.f32.partialorder %v2198_v50, 8.507059e+37  ;;  %v6967_v50 = vld [vmem:[#allocation10 + $0x158] sm:$0xff] }
 0x513   : > { %v2220_v38 = vor.u32 1.1754944e-38, %v2219_v31  ;;  %vm2218_vm0 = vcmp.eq.f32.partialorder %v2217_v37, 8.507059e+37  ;;  %v6963_v31 = vld [vmem:[#allocation10 + $0x140] sm:$0xff] }
 0x514   : > { %v5089_v43 = vpop.eup %5088 }
 0x515   : > { %v2227_v55 = vadd.f32 1.0, %v5089_v43  ;;  %v6927_v43 = vld [vmem:[#allocation10 + $0x1d0] sm:$0xff] }
 0x516   : > { %v5091_v6 = vpop.eup %5090 }
 0x517   : > { %v5093_v49 = vpop.eup %5092  ;;  %v2190_v36 = vmul.f32 %v5091_v6, %v6856_v0  ;;  %5094 = vrcp.f32 %v2227_v55  ;;  %vm2195_vm9 = vweird.f32 %v5091_v6  ;;  %v2239_v41 = vand.u32 2147483648, %v2227_v55 }
 0x518   : > { %v2209_v16 = vmul.f32 %v5093_v49, %v6858_v54  ;;  %5096 = vtanh.f32 %v2183_v33  ;;  %vm2214_vm10 = vweird.f32 %v5093_v49  ;;  %vm2196_vm13 = vmor %vm2194_vm11, %vm2195_vm9  ;;  %vm2233_vm2 = vweird.f32 %v2227_v55  ;;  %v6956_v33 = vld [vmem:[#allocation10 + $0x170] sm:$0xff] }
 0x519   : > { %v2191_v28 = vsub.f32 1.0, %v2190_v36  ;;  %vm2215_vm14 = vmor %vm2213_vm12, %vm2214_vm10  ;;  %v2237_v56 = vand.u32 2147483647, %v2227_v55  ;;  %v2240_v0 = vor.u32 1.1754944e-38, %v2239_v41 }
 0x51a   : > { %v2210_v21 = vsub.f32 1.0, %v2209_v16  ;;  %v8520_v16 = vld [vmem:[#allocation41_spill] sm:$0xff] }
 0x51b   : > { %v2192_v17 = vmul.f32 %v5091_v6, %v2191_v28  ;;  %vm2238_vm4 = vcmp.eq.f32.partialorder %v2237_v56, 8.507059e+37  ;;  %v595_v28 = vadd.f32 %v8520_v16, %v8509_v10  ;;  %v6974_v10 = vld [vmem:[#allocation10 + $0x120] sm:$0xff]  ;;  %v7014_v56 = vld [vmem:[#allocation10 + $0xc8] sm:$0xff] }
 0x51c   : > { %v2211_v60 = vmul.f32 %v5093_v49, %v2210_v21  ;;  %v7043_v16 = vld [vmem:[#allocation10 + $0x68] sm:$0xff] }
 0x51d   : > { %v5095_v51 = vpop.eup %5094  ;;  %v2193_v39 = vadd.f32 %v5091_v6, %v2192_v17  ;;  %v6965_v17 = vld [vmem:[#allocation10 + $0x148] sm:$0xff]  ;;  %8524 = vst [vmem:[#allocation58_spill] sm:$0xff] %v7043_v16 }
 0x51e   : > { %v2212_v13 = vadd.f32 %v5093_v49, %v2211_v60  ;;  %v2229_v62 = vmul.f32 %v5095_v51, %v2227_v55  ;;  %v5097_v24 = vpop.eup %5096  ;;  %vm2234_vm1 = vweird.f32 %v5095_v51  ;;  %v6943_v55 = vld [vmem:[#allocation10 + $0x198] sm:$0xff] }
 0x51f   : > { %v2197_v12 = vsel %vm2196_vm13, %v5091_v6, %v2193_v39  ;;  %vm2235_vm3 = vmor %vm2233_vm2, %vm2234_vm1  ;;  %v6953_v6 = vld [vmem:[#allocation10 + $0x178] sm:$0xff] }
 0x520   : > { %v2202_v19 = vsel %vm2199_vm15, %v2201_v45, %v2197_v12  ;;  %v2216_v18 = vsel %vm2215_vm14, %v5093_v49, %v2212_v13  ;;  %v2230_v23 = vsub.f32 1.0, %v2229_v62  ;;  %v8519_v49 = vld [vmem:[#allocation29_spill] sm:$0xff]  ;;  %v6984_v62 = vld [vmem:[#allocation10 + $0x130] sm:$0xff]  ;;  %v6988_v12 = vld [vmem:[#allocation10 + $0x108] sm:$0xff] }
 0x521   : > { %v2221_v14 = vsel %vm2218_vm0, %v2220_v38, %v2216_v18  ;;  %v2244_v63 = vmul.f32 %v5097_v24, %v2202_v19  ;;  %v554_v36 = vadd.f32 %v8519_v49, %v8507_v27  ;;  %v6972_v27 = vld [vmem:[#allocation10 + $0x150] sm:$0xff]  ;;  %v6979_v39 = vld [vmem:[#allocation10 + $0x138] sm:$0xff]  ;;  %v6986_v38 = vld [vmem:[#allocation10 + $0x100] sm:$0xff] }
 0x522   : > { %v2243_v47 = vmul.f32 %v2221_v14, %v6809_v57  ;;  %v2231_v22 = vmul.f32 %v5095_v51, %v2230_v23  ;;  %v8514_v57 = vld [vmem:[#allocation49_spill] sm:$0xff]  ;;  %v6996_v19 = vld [vmem:[#allocation10 + $0x110] sm:$0xff]  ;;  %v8521_v18 = vld [vmem:[#allocation46_spill] sm:$0xff] }
 0x523   : > { %v6991_v24 = vld [vmem:[#allocation10 + $0x118] sm:$0xff]  ;;  %v677_v23 = vadd.f32 %v8521_v18, %v8511_v42  ;;  %v7000_v14 = vld [vmem:[#allocation10 + $0xe0] sm:$0xff]  ;;  %v7067_v18 = vld [vmem:[#allocation10 + $0x70] sm:$0xff] }
 0x524   : > { %v6873_v3 = vadd.f32 %v2244_v63, %v2243_v47  ;;  %v2232_v29 = vadd.f32 %v5095_v51, %v2231_v22  ;;  %v7002_v63 = vld [vmem:[#allocation10 + $0xe8] sm:$0xff]  ;;  %v7005_v47 = vld [vmem:[#allocation10 + $0xf8] sm:$0xff]  ;;  %v7012_v42 = vld [vmem:[#allocation10 + $0xc0] sm:$0xff]  ;;  %8530 = vst [vmem:[#allocation37_spill] sm:$0xff] %v7067_v18 }
 0x526   : > { %5098 = vtanh.f32 %v6873_v3  ;;  %v2236_v59 = vsel %vm2235_vm3, %v5095_v51, %v2232_v29  ;;  %v6976_v51 = vld [vmem:[#allocation10 + $0x128] sm:$0xff]  ;;  %v7010_v29 = vld [vmem:[#allocation10 + $0xf0] sm:$0xff] }
 0x527   : > { %v2241_v2 = vsel %vm2238_vm4, %v2240_v0, %v2236_v59  ;;  %v7017_v59 = vld [vmem:[#allocation10 + $0xd8] sm:$0xff]  ;;  %v7022_v0 = vld [vmem:[#allocation10 + $0xd0] sm:$0xff] }
 0x52c   : > { %v5099_v5 = vpop.eup %5098 }
 0x52d   : > { %v2247_v54 = vmul.f32 %v5099_v5, %v2241_v2  ;;  %v7024_v2 = vld [vmem:[#allocation10 + $0xa0] sm:$0xff] }
 0x52f   : > { %2337 = vmatmul.f32.vlgmr.msrb.gmra.mxu0 %v2247_v54  ;;  %2357 = vmatmul.f32.vlgmr.msrb.gmra.mxu1 %v2247_v54 }
 0x530   : > { %2377 = vmatmul.f32.vlgmr.msrb.gmra.mxu2 %v2247_v54  ;;  %2397 = vmatmul.f32.vlgmr.msrb.gmra.mxu3 %v2247_v54 }
 0x531   : > { %2816 = vmatpush.msrb.mxu0 %v6888_v11  ;;  %2836 = vmatpush.msrb.mxu1 %v6890_v35 }
 0x532   : > { %2876 = vmatpush.msrb.mxu3 %v6898_v32  ;;  %2856 = vmatpush.msrb.mxu2 %v6924_v44 }
 0x533   : > { %2817 = vmatpush.msrb.mxu0 %v6892_v1  ;;  %2837 = vmatpush.msrb.mxu1 %v6896_v26 }
 0x534   : > { %2877 = vmatpush.msrb.mxu3 %v6905_v40  ;;  %2857 = vmatpush.msrb.mxu2 %v6927_v43 }
 0x535   : > { %2818 = vmatpush.msrb.mxu0 %v6901_v20  ;;  %2838 = vmatpush.msrb.mxu1 %v6903_v30 }
 0x536   : > { %2878 = vmatpush.msrb.mxu3 %v6929_v15  ;;  %2858 = vmatpush.msrb.mxu2 %v6945_v9 }
 0x537   : > { %2568 = vmatmul.f32.vlgmr.msra.gmra.mxu0 %v8514_v57  ;;  %2609 = vmatmul.f32.vlgmr.msra.gmra.mxu1 %v8514_v57 }
 0x538   : > { %2650 = vmatmul.f32.vlgmr.msra.gmra.mxu2 %v8514_v57  ;;  %2691 = vmatmul.f32.vlgmr.msra.gmra.mxu3 %v8514_v57  ;;  %v7029_v57 = vld [vmem:[#allocation10 + $0xb8] sm:$0xff] }
 0x539   : > { %2819 = vmatpush.msrb.mxu0 %v6932_v46  ;;  %2839 = vmatpush.msrb.mxu1 %v6934_v58 }
 0x53a   : > { %2879 = vmatpush.msrb.mxu3 %v6943_v55  ;;  %2859 = vmatpush.msrb.mxu2 %v6949_v53 }
 0x53b   : > { %2840 = vmatpush.msrb.mxu1 %v6941_v61 }
 0x53c   : > { %2880 = vmatpush.msrb.mxu3 %v6953_v6  ;;  %2860 = vmatpush.msrb.mxu2 %v6956_v33 }
 0x53d   : > { %2841 = vmatpush.msrb.mxu1 %v6965_v17 }
 0x53e   : > { %2881 = vmatpush.msrb.mxu3 %v6967_v50  ;;  %2861 = vmatpush.msrb.mxu2 %v6972_v27 }
 0x53f   : > { %2571 = vmatmul.f32.gmra.mxu0 %v8515_v8  ;;  %2612 = vmatmul.f32.gmra.mxu1 %v8515_v8 }
 0x540   : > { %2653 = vmatmul.f32.gmra.mxu2 %v8515_v8  ;;  %2694 = vmatmul.f32.gmra.mxu3 %v8515_v8 }
 0x541   : > { %2842 = vmatpush.msrb.mxu1 %v6976_v51  ;;  %2882 = vmatpush.msrb.mxu3 %v6979_v39 }
 0x542   : > { %2862 = vmatpush.msrb.mxu2 %v6984_v62 }
 0x543   : > { %2843 = vmatpush.msrb.mxu1 %v6988_v12  ;;  %2883 = vmatpush.msrb.mxu3 %v6991_v24 }
 0x544   : > { %2863 = vmatpush.msrb.mxu2 %v6996_v19 }
 0x545   : > { %2844 = vmatpush.msrb.mxu1 %v7002_v63  ;;  %2884 = vmatpush.msrb.mxu3 %v7005_v47 }
 0x546   : > { %2864 = vmatpush.msrb.mxu2 %v7010_v29 }
 0x547   : > { %2574 = vmatmul.f32.gmra.mxu0 %v8516_v25  ;;  %2615 = vmatmul.f32.gmra.mxu1 %v8516_v25 }
 0x548   : > { %2656 = vmatmul.f32.gmra.mxu2 %v8516_v25  ;;  %2697 = vmatmul.f32.gmra.mxu3 %v8516_v25  ;;  %v7034_v25 = vld [vmem:[#allocation10 + $0x80] sm:$0xff] }
 0x549   : > { %2845 = vmatpush.msrb.mxu1 %v7014_v56  ;;  %2885 = vmatpush.msrb.mxu3 %v7017_v59 }
 0x54a   : > { %2865 = vmatpush.msrb.mxu2 %v7022_v0 }
 0x54b   : > { %2886 = vmatpush.msrb.mxu3 %v7029_v57 }
 0x54f   : > { %2577 = vmatmul.f32.gmra.mxu0 %v8517_v4  ;;  %2618 = vmatmul.f32.gmra.mxu1 %v8517_v4 }
 0x550   : > { %2659 = vmatmul.f32.gmra.mxu2 %v8517_v4  ;;  %2700 = vmatmul.f32.gmra.mxu3 %v8517_v4  ;;  %v7036_v4 = vld [vmem:[#allocation10 + $0x88] sm:$0xff] }
 0x551   : > { %8522 = vst [vmem:[#allocation56_spill] sm:$0xff] %v7036_v4 }
 0x557   : > { %2580 = vmatmul.f32.gmra.mxu0 %v8518_v7  ;;  %2621 = vmatmul.f32.gmra.mxu1 %v8518_v7 }
 0x558   : > { %2662 = vmatmul.f32.gmra.mxu2 %v8518_v7  ;;  %2703 = vmatmul.f32.gmra.mxu3 %v8518_v7 }
 0x55f   : > { %2583 = vmatmul.f32.gmra.mxu0 %v6836_v48  ;;  %2624 = vmatmul.f32.gmra.mxu1 %v6836_v48 }
 0x560   : > { %2665 = vmatmul.f32.gmra.mxu2 %v6836_v48  ;;  %2706 = vmatmul.f32.gmra.mxu3 %v6836_v48  ;;  %v6937_v48 = vld [vmem:[#allocation10 + $0x160] sm:$0xff] }
 0x561   : > { %2820 = vmatpush.msrb.mxu0 %v6937_v48 }
 0x563   : > { %2821 = vmatpush.msrb.mxu0 %v6963_v31 }
 0x565   : > { %2822 = vmatpush.msrb.mxu0 %v6974_v10 }
 0x567   : > { %2586 = vmatmul.f32.gmra.mxu0 %v2247_v54  ;;  %2627 = vmatmul.f32.gmra.mxu1 %v2247_v54 }
 0x568   : > { %2668 = vmatmul.f32.gmra.mxu2 %v2247_v54  ;;  %2709 = vmatmul.f32.gmra.mxu3 %v2247_v54  ;;  %v7026_v54 = vld [vmem:[#allocation10 + $0xa8] sm:$0xff] }
 0x569   : > { %2823 = vmatpush.msrb.mxu0 %v6986_v38  ;;  %2846 = vmatpush.msrb.mxu1 %v7026_v54 }
 0x56b   : > { %2824 = vmatpush.msrb.mxu0 %v7000_v14  ;;  %2847 = vmatpush.msrb.mxu1 %v7036_v4 }
 0x56d   : > { %2825 = vmatpush.msrb.mxu0 %v7012_v42  ;;  %2848 = vmatpush.msrb.mxu1 %v7043_v16  ;;  %v8534_v16 = vld [vmem:[#allocation39_spill] sm:$0xff] }
 0x56f   : > { %2826 = vmatpush.msrb.mxu0 %v7024_v2 }
 0x571   : > { %2827 = vmatpush.msrb.mxu0 %v7034_v25 }
 0x5ac   : > { %v2338_v21 = vpop.f32.mrf.mxu0  ;;  %v2358_v34 = vpop.f32.mrf.mxu1 }
 0x5ad   : > { %v2401_v60 = vadd.f32 %v2338_v21, %v554_v36  ;;  %v2402_v37 = vadd.f32 %v2358_v34, %v595_v28  ;;  %v7041_v36 = vld [vmem:[#allocation10 + $0x60] sm:$0xff]  ;;  %v7045_v28 = vld [vmem:[#allocation10 + $0x98] sm:$0xff]  ;;  %v7051_v34 = vld [vmem:[#allocation10 + $0xb0] sm:$0xff] }
 0x5ae   : > { %8523 = vst [vmem:[#allocation57_spill] sm:$0xff] %v7041_v36  ;;  %2887 = vmatpush.msrb.mxu3 %v7045_v28  ;;  %2866 = vmatpush.msrb.mxu2 %v7051_v34 }
 0x5af   : > { %v4852_v45 = vmul.f32 -1.442695, %v2401_v60  ;;  %v4853_v13 = vmul.f32 -1.442695, %v2402_v37  ;;  %8525 = vst [vmem:[#allocation59_spill] sm:$0xff] %v7045_v28  ;;  %v7053_v60 = vld [vmem:[#allocation10 + $0x78] sm:$0xff]  ;;  %2828 = vmatpush.msrb.mxu0 %v7041_v36  ;;  %v636_v36 = vadd.f32 %v8534_v16, %v8479_v52 }
 0x5b0   : > { %8526 = vst [vmem:[#allocation60_spill] sm:$0xff] %v7053_v60  ;;  %v7057_v37 = vld [vmem:[#allocation10 + $0x40] sm:$0xff]  ;;  %2888 = vmatpush.msrb.mxu3 %v7053_v60  ;;  %v7087_v28 = vld [vmem:[#allocation10 + $0x8] sm:$0xff] }
 0x5b1   : > { %5100 = vpow2.f32 %v4852_v45  ;;  %8527 = vst [vmem:[#allocation61_spill] sm:$0xff] %v7057_v37  ;;  %v7059_v45 = vld [vmem:[#allocation10 + $0x48] sm:$0xff]  ;;  %2829 = vmatpush.msrb.mxu0 %v7057_v37  ;;  %v7085_v60 = vld [vmem:[#allocation10] sm:$0xff]  ;;  %v7097_v37 = vld [vmem:[#allocation10 + $0x18] sm:$0xff] }
 0x5b2   : > { %5102 = vpow2.f32 %v4853_v13  ;;  %8528 = vst [vmem:[#allocation31_spill] sm:$0xff] %v7059_v45  ;;  %v7062_v13 = vld [vmem:[#allocation10 + $0x90] sm:$0xff]  ;;  %2849 = vmatpush.msrb.mxu1 %v7059_v45 }
 0x5b3   : > { %v2398_v22 = vpop.f32.mrf.mxu3  ;;  %8529 = vst [vmem:[#allocation50_spill] sm:$0xff] %v7062_v13  ;;  %2867 = vmatpush.msrb.mxu2 %v7062_v13  ;;  %v7089_v13 = vld [vmem:[#allocation10 + $0x38] sm:$0xff]  ;;  %v7095_v45 = vld [vmem:[#allocation10 + $0x30] sm:$0xff] }
 0x5b4   : > { %v2404_v41 = vadd.f32 %v2398_v22, %v677_v23  ;;  %v7069_v23 = vld [vmem:[#allocation10 + $0x58] sm:$0xff]  ;;  %v7073_v22 = vld [vmem:[#allocation10 + $0x20] sm:$0xff]  ;;  %8535 = vst [vmem:[#allocation33_spill] sm:$0xff] %v7085_v60 }
 0x5b5   : > { %8531 = vst [vmem:[#allocation48_spill] sm:$0xff] %v7069_v23  ;;  %2868 = vmatpush.msrb.mxu2 %v7067_v18  ;;  %2889 = vmatpush.msrb.mxu3 %v7069_v23 }
 0x5b6   : > { %v4854_v5 = vmul.f32 -1.442695, %v2404_v41  ;;  %8532 = vst [vmem:[#allocation30_spill] sm:$0xff] %v7073_v22  ;;  %v7075_v41 = vld [vmem:[#allocation10 + $0x28] sm:$0xff]  ;;  %2830 = vmatpush.msrb.mxu0 %v7073_v22 }
 0x5b7   : > { %v5101_v8 = vpop.eup %5100  ;;  %8533 = vst [vmem:[#allocation26_spill] sm:$0xff] %v7075_v41  ;;  %2850 = vmatpush.msrb.mxu1 %v7075_v41  ;;  %2890 = vmatpush.msrb.mxu3 %v7089_v13 }
 0x5b8   : > { %v5103_v7 = vpop.eup %5102  ;;  %v7038_v49 = vadd.f32 1.0, %v5101_v8  ;;  %5104 = vpow2.f32 %v4854_v5  ;;  %v2378_v5 = vpop.f32.mrf.mxu2  ;;  %v7079_v8 = vld [vmem:[#allocation10 + $0x50] sm:$0xff]  ;;  %8536 = vst [vmem:[#allocation40_spill] sm:$0xff] %v7087_v28  ;;  %2831 = vmatpush.msrb.mxu0 %v7085_v60 }
 0x5b9   : > { %v7047_v21 = vadd.f32 1.0, %v5103_v7  ;;  %8537 = vst [vmem:[#allocation32_spill] sm:$0xff] %v7089_v13  ;;  %v2403_v16 = vadd.f32 %v2378_v5, %v636_v36  ;;  %2869 = vmatpush.msrb.mxu2 %v7079_v8  ;;  %2851 = vmatpush.msrb.mxu1 %v7087_v28 }
 0x5ba   : > { %5106 = vrcp.f32 %v7038_v49  ;;  %8538 = vst [vmem:[#allocation27_spill] sm:$0xff] %v7095_v45  ;;  %2891 = vmatpush.msrb.mxu3 %v7097_v37  ;;  %3032 = vmatpush.msra.mxu0 %v6888_v11  ;;  %v2420_v13 = vand.u32 2147483648, %v7038_v49  ;;  %vm2414_vm7 = vweird.f32 %v7038_v49 }
 0x5bb   : > { %5108 = vrcp.f32 %v7047_v21  ;;  %8539 = vst [vmem:[#allocation35_spill] sm:$0xff] %v7097_v37  ;;  %2870 = vmatpush.msrb.mxu2 %v7095_v45  ;;  %3052 = vmatpush.msra.mxu1 %v6890_v35  ;;  %v2439_v28 = vand.u32 2147483648, %v7047_v21  ;;  %v2418_v45 = vand.u32 2147483647, %v7038_v49  ;;  %v2437_v11 = vand.u32 2147483647, %v7047_v21 }
 0x5bc   : > { %3092 = vmatpush.msra.mxu3 %v6898_v32  ;;  %3033 = vmatpush.msra.mxu0 %v6892_v1  ;;  %vm2433_vm8 = vweird.f32 %v7047_v21  ;;  %v2421_v32 = vor.u32 1.1754944e-38, %v2420_v13 }
 0x5bd   : > { %3053 = vmatpush.msra.mxu1 %v6896_v26  ;;  %v2440_v1 = vor.u32 1.1754944e-38, %v2439_v28  ;;  %vm2419_vm11 = vcmp.eq.f32.partialorder %v2418_v45, 8.507059e+37  ;;  %vm2438_vm12 = vcmp.eq.f32.partialorder %v2437_v11, 8.507059e+37 }
 0x5be   : > { %v5105_v7 = vpop.eup %5104  ;;  %3093 = vmatpush.msra.mxu3 %v6905_v40  ;;  %3034 = vmatpush.msra.mxu0 %v6901_v20 }
 0x5bf   : > { %v7091_v4 = vadd.f32 1.0, %v5105_v7  ;;  %v7105_v7 = vld [vmem:[#allocation10 + $0x10] sm:$0xff]  ;;  %3054 = vmatpush.msra.mxu1 %v6903_v30 }
 0x5c0   : > { %v5107_v52 = vpop.eup %5106  ;;  %2871 = vmatpush.msrb.mxu2 %v7105_v7  ;;  %3094 = vmatpush.msra.mxu3 %v6929_v15 }
 0x5c1   : > { %v5109_v23 = vpop.eup %5108  ;;  %v2410_v18 = vmul.f32 %v5107_v52, %v7038_v49  ;;  %5110 = vrcp.f32 %v7091_v4  ;;  %vm2415_vm5 = vweird.f32 %v5107_v52  ;;  %3035 = vmatpush.msra.mxu0 %v6932_v46  ;;  %3055 = vmatpush.msra.mxu1 %v6934_v58  ;;  %vm2453_vm14 = vweird.f32 %v7091_v4 }
 0x5c2   : > { %v2429_v41 = vmul.f32 %v5109_v23, %v7047_v21  ;;  %5112 = vtanh.f32 %v2403_v16  ;;  %3072 = vmatpush.msra.mxu2 %v6924_v44  ;;  %vm2434_vm6 = vweird.f32 %v5109_v23  ;;  %vm2416_vm9 = vmor %vm2414_vm7, %vm2415_vm5  ;;  %3095 = vmatpush.msra.mxu3 %v6943_v55 }
 0x5c3   : > { %v2411_v36 = vsub.f32 1.0, %v2410_v18  ;;  %vm2435_vm10 = vmor %vm2433_vm8, %vm2434_vm6  ;;  %3036 = vmatpush.msra.mxu0 %v6937_v48  ;;  %3056 = vmatpush.msra.mxu1 %v6941_v61 }
 0x5c4   : > { %v2430_v5 = vsub.f32 1.0, %v2429_v41  ;;  %3073 = vmatpush.msra.mxu2 %v6927_v43  ;;  %3096 = vmatpush.msra.mxu3 %v6953_v6 }
 0x5c5   : > { %v2412_v60 = vmul.f32 %v5107_v52, %v2411_v36  ;;  %3037 = vmatpush.msra.mxu0 %v6963_v31  ;;  %3057 = vmatpush.msra.mxu1 %v6965_v17 }
 0x5c6   : > { %v2431_v18 = vmul.f32 %v5109_v23, %v2430_v5  ;;  %3074 = vmatpush.msra.mxu2 %v6945_v9  ;;  %3097 = vmatpush.msra.mxu3 %v6967_v50 }
 0x5c7   : > { %v7121_v35 = vpop.eup %5110  ;;  %v2413_v41 = vadd.f32 %v5107_v52, %v2412_v60  ;;  %3038 = vmatpush.msra.mxu0 %v6974_v10  ;;  %3058 = vmatpush.msra.mxu1 %v6976_v51 }
 0x5c8   : > { %v2432_v16 = vadd.f32 %v5109_v23, %v2431_v18  ;;  %v2449_v36 = vmul.f32 %v7121_v35, %v7091_v4  ;;  %v5113_v40 = vpop.eup %5112  ;;  %3075 = vmatpush.msra.mxu2 %v6949_v53  ;;  %vm2454_vm13 = vweird.f32 %v7121_v35  ;;  %3098 = vmatpush.msra.mxu3 %v6979_v39 }
 0x5c9   : > { %v2417_v26 = vsel %vm2416_vm9, %v5107_v52, %v2413_v41  ;;  %v2457_v52 = vand.u32 2147483647, %v7091_v4  ;;  %vm2455_vm15 = vmor %vm2453_vm14, %vm2454_vm13  ;;  %3039 = vmatpush.msra.mxu0 %v6986_v38  ;;  %3059 = vmatpush.msra.mxu1 %v6988_v12  ;;  %v8540_v41 = vld [vmem:[#allocation56_spill] sm:$0xff] }
 0x5ca   : > { %v2422_v49 = vsel %vm2419_vm11, %v2421_v32, %v2417_v26  ;;  %v2436_v21 = vsel %vm2435_vm10, %v5109_v23, %v2432_v16  ;;  %v2450_v60 = vsub.f32 1.0, %v2449_v36  ;;  %3076 = vmatpush.msra.mxu2 %v6956_v33  ;;  %3099 = vmatpush.msra.mxu3 %v6991_v24  ;;  %v8541_v32 = vld [vmem:[#allocation50_spill] sm:$0xff]  ;;  %v8542_v16 = vld [vmem:[#allocation59_spill] sm:$0xff]  ;;  %v8543_v36 = vld [vmem:[#allocation57_spill] sm:$0xff] }
 0x5cb   : > { %v2441_v20 = vsel %vm2438_vm12, %v2440_v1, %v2436_v21  ;;  %v2464_v30 = vmul.f32 %v5113_v40, %v2422_v49  ;;  %3040 = vmatpush.msra.mxu0 %v7000_v14  ;;  %vm2458_vm0 = vcmp.eq.f32.partialorder %v2457_v52, 8.507059e+37  ;;  %3060 = vmatpush.msra.mxu1 %v7002_v63  ;;  %v8544_v1 = vld [vmem:[#allocation58_spill] sm:$0xff]  ;;  %v8545_v26 = vld [vmem:[#allocation37_spill] sm:$0xff]  ;;  %v8546_v40 = vld [vmem:[#allocation60_spill] sm:$0xff] }
 0x5cc   : > { %v2463_v28 = vmul.f32 %v2441_v20, %v6873_v3  ;;  %v2451_v45 = vmul.f32 %v7121_v35, %v2450_v60  ;;  %3077 = vmatpush.msra.mxu2 %v6972_v27  ;;  %v2459_v3 = vand.u32 2147483648, %v7091_v4  ;;  %3100 = vmatpush.msra.mxu3 %v7005_v47  ;;  %v8547_v49 = vld [vmem:[#allocation61_spill] sm:$0xff]  ;;  %v8548_v21 = vld [vmem:[#allocation31_spill] sm:$0xff]  ;;  %v8549_v60 = vld [vmem:[#allocation48_spill] sm:$0xff] }
 0x5cd   : > { %3041 = vmatpush.msra.mxu0 %v7012_v42  ;;  %3061 = vmatpush.msra.mxu1 %v7014_v56  ;;  %v8550_v20 = vld [vmem:[#allocation26_spill] sm:$0xff] }
 0x5ce   : > { %v7143_v13 = vadd.f32 %v2464_v30, %v2463_v28  ;;  %v2452_v23 = vadd.f32 %v7121_v35, %v2451_v45  ;;  %3078 = vmatpush.msra.mxu2 %v6984_v62  ;;  %v2460_v18 = vor.u32 1.1754944e-38, %v2459_v3  ;;  %3101 = vmatpush.msra.mxu3 %v7017_v59  ;;  %v8551_v30 = vld [vmem:[#allocation27_spill] sm:$0xff]  ;;  %v8552_v28 = vld [vmem:[#allocation32_spill] sm:$0xff]  ;;  %v8553_v45 = vld [vmem:[#allocation33_spill] sm:$0xff] }
 0x5cf   : > { %3042 = vmatpush.msra.mxu0 %v7024_v2  ;;  %3062 = vmatpush.msra.mxu1 %v7026_v54 }
 0x5d0   : > { %5114 = vtanh.f32 %v7143_v13  ;;  %v2456_v5 = vsel %vm2455_vm15, %v7121_v35, %v2452_v23  ;;  %3079 = vmatpush.msra.mxu2 %v6996_v19  ;;  %3102 = vmatpush.msra.mxu3 %v7029_v57  ;;  %v8554_v23 = vld [vmem:[#allocation40_spill] sm:$0xff] }
 0x5d1   : > { %v2461_v11 = vsel %vm2458_vm0, %v2460_v18, %v2456_v5  ;;  %3043 = vmatpush.msra.mxu0 %v7034_v25  ;;  %3063 = vmatpush.msra.mxu1 %v8540_v41 }
 0x5d2   : > { %3080 = vmatpush.msra.mxu2 %v7010_v29  ;;  %3103 = vmatpush.msra.mxu3 %v8542_v16 }
 0x5d3   : > { %3044 = vmatpush.msra.mxu0 %v8543_v36  ;;  %3064 = vmatpush.msra.mxu1 %v8544_v1 }
 0x5d4   : > { %3081 = vmatpush.msra.mxu2 %v7022_v0  ;;  %3104 = vmatpush.msra.mxu3 %v8546_v40 }
 0x5d5   : > { %3045 = vmatpush.msra.mxu0 %v8547_v49  ;;  %3065 = vmatpush.msra.mxu1 %v8548_v21 }
 0x5d6   : > { %v5115_v4 = vpop.eup %5114  ;;  %3082 = vmatpush.msra.mxu2 %v7051_v34  ;;  %3105 = vmatpush.msra.mxu3 %v8549_v60 }
 0x5d7   : > { %v2467_v35 = vmul.f32 %v5115_v4, %v2461_v11  ;;  %3046 = vmatpush.msra.mxu0 %v7073_v22  ;;  %3066 = vmatpush.msra.mxu1 %v8550_v20 }
 0x5d8   : > { %3083 = vmatpush.msra.mxu2 %v8541_v32  ;;  %3106 = vmatpush.msra.mxu3 %v8552_v28 }
 0x5d9   : > { %2589 = vmatmul.f32.gmra.mxu0 %v2467_v35  ;;  %2630 = vmatmul.f32.gmra.mxu1 %v2467_v35 }
 0x5da   : > { %2671 = vmatmul.f32.gmra.mxu2 %v2467_v35  ;;  %2712 = vmatmul.f32.gmra.mxu3 %v2467_v35 }
 0x5db   : > { %3084 = vmatpush.msra.mxu2 %v8545_v26  ;;  %3047 = vmatpush.msra.mxu0 %v8553_v45 }
 0x5dc   : > { %3067 = vmatpush.msra.mxu1 %v8554_v23  ;;  %3107 = vmatpush.msra.mxu3 %v7097_v37 }
 0x5dd   : > { %3085 = vmatpush.msra.mxu2 %v7079_v8 }
 0x5df   : > { %3086 = vmatpush.msra.mxu2 %v8551_v30 }
 0x5e1   : > { %2832 = vmatmul.f32.vlgmr.msrb.gmra.mxu0 %v2467_v35  ;;  %2852 = vmatmul.f32.vlgmr.msrb.gmra.mxu1 %v2467_v35 }
 0x5e2   : > { %2872 = vmatmul.f32.vlgmr.msrb.gmra.mxu2 %v2467_v35  ;;  %2892 = vmatmul.f32.vlgmr.msrb.gmra.mxu3 %v2467_v35 }
 0x5e3   : > { %3087 = vmatpush.msra.mxu2 %v7105_v7 }
 0x5e5   : > { %3288 = vmatpush.msrb.mxu2 %v6924_v44  ;;  %v2569_v44 = vpop.f32.mrf.mxu0 }
 0x5e7   : > { %3289 = vmatpush.msrb.mxu2 %v6927_v43  ;;  %v2610_v43 = vpop.f32.mrf.mxu1 }
 0x5e9   : > { %3290 = vmatpush.msrb.mxu2 %v6945_v9  ;;  %v2692_v9 = vpop.f32.mrf.mxu3 }
 0x5eb   : > { %3291 = vmatpush.msrb.mxu2 %v6949_v53 }
 0x5ed   : > { %3292 = vmatpush.msrb.mxu2 %v6956_v33  ;;  %v7213_v53 = vpop.f32.mrf.mxu0 }
 0x5ef   : > { %3293 = vmatpush.msrb.mxu2 %v6972_v27  ;;  %v7215_v33 = vpop.f32.mrf.mxu1  ;;  %v2651_v27 = vpop.f32.mrf.mxu2 }
 0x5f1   : > { %3294 = vmatpush.msrb.mxu2 %v6984_v62  ;;  %v7217_v62 = vpop.f32.mrf.mxu3 }
 0x5f3   : > { %3295 = vmatpush.msrb.mxu2 %v6996_v19 }
 0x5f5   : > { %3296 = vmatpush.msrb.mxu2 %v7010_v29  ;;  %v7219_v19 = vpop.f32.mrf.mxu0 }
 0x5f6   : > { %8555 = vst [vmem:[#allocation44_spill] sm:$0xff] %v7219_v19 }
 0x5f7   : > { %3297 = vmatpush.msrb.mxu2 %v7022_v0  ;;  %v7221_v29 = vpop.f32.mrf.mxu1  ;;  %v7223_v0 = vpop.f32.mrf.mxu2 }
 0x5f8   : > { %8556 = vst [vmem:[#allocation34_spill] sm:$0xff] %v7221_v29 }
 0x5f9   : > { %3298 = vmatpush.msrb.mxu2 %v7051_v34  ;;  %8557 = vst [vmem:[#allocation51_spill] sm:$0xff] %v7223_v0  ;;  %v7225_v34 = vpop.f32.mrf.mxu3 }
 0x5fa   : > { %8558 = vst [vmem:[#allocation66_spill] sm:$0xff] %v7225_v34 }
 0x5fb   : > { %3299 = vmatpush.msrb.mxu2 %v8541_v32 }
 0x5fd   : > { %3300 = vmatpush.msrb.mxu2 %v8545_v26 }
 0x5ff   : > { %3301 = vmatpush.msrb.mxu2 %v7079_v8  ;;  %v7227_v8 = vpop.f32.mrf.mxu0  ;;  %v7231_v3 = vpop.f32.mrf.mxu2 }
 0x600   : > { %8559 = vst [vmem:[#allocation67_spill] sm:$0xff] %v7227_v8 }
 0x601   : > { %3302 = vmatpush.msrb.mxu2 %v8551_v30  ;;  %8561 = vst [vmem:[#allocation68_spill] sm:$0xff] %v7231_v3  ;;  %v7233_v52 = vpop.f32.mrf.mxu3 }
 0x602   : > { %8562 = vst [vmem:[#allocation53_spill] sm:$0xff] %v7233_v52 }
 0x603   : > { %3303 = vmatpush.msrb.mxu2 %v7105_v7  ;;  %v7229_v7 = vpop.f32.mrf.mxu1 }
 0x604   : > { %8560 = vst [vmem:[#allocation64_spill] sm:$0xff] %v7229_v7 }
 0x607   : > { %v7235_v5 = vpop.f32.mrf.mxu0  ;;  %v7239_v4 = vpop.f32.mrf.mxu2 }
 0x608   : > { %8563 = vst [vmem:[#allocation54_spill] sm:$0xff] %v7235_v5 }
 0x609   : > { %8565 = vst [vmem:[#allocation42_spill] sm:$0xff] %v7239_v4  ;;  %v7241_v11 = vpop.f32.mrf.mxu3 }
 0x60a   : > { %8566 = vst [vmem:[#allocation28_spill] sm:$0xff] %v7241_v11  ;;  %v2542_v11 = vld [vmem:[%s8252_s6] sm:$0xf] }
 0x60b   : > { %v7237_v18 = vpop.f32.mrf.mxu1  ;;  %v7276_v29 = vperm.slane %v2542_v11, 3 }
 0x60c   : > { %8564 = vst [vmem:[#allocation55_spill] sm:$0xff] %v7237_v18 }
 0x60d   : > { %8581 = vst [vmem:[#allocation56_spill] sm:$0xff] %v7276_v29  ;;  %v2693_v19 = vadd.f32 %v2692_v9, %v7276_v29 }
 0x60f   : > { %v7243_v35 = vpop.f32.mrf.mxu0  ;;  %v7247_v26 = vpop.f32.mrf.mxu2 }
 0x610   : > { %8567 = vst [vmem:[#allocation43_spill] sm:$0xff] %v7243_v35 }
 0x611   : > { %8569 = vst [vmem:[#allocation47_spill] sm:$0xff] %v7247_v26  ;;  %v7249_v30 = vpop.f32.mrf.mxu3  ;;  %v7268_v26 = vperm.slane %v2542_v11, 1 }
 0x612   : > { %8570 = vst [vmem:[#allocation45_spill] sm:$0xff] %v7249_v30 }
 0x613   : > { %v7245_v32 = vpop.f32.mrf.mxu1  ;;  %8578 = vst [vmem:[#allocation41_spill] sm:$0xff] %v7268_v26 }
 0x614   : > { %8568 = vst [vmem:[#allocation38_spill] sm:$0xff] %v7245_v32  ;;  %v7266_v32 = vperm.slane %v2542_v11, 0 }
 0x616   : > { %8577 = vst [vmem:[#allocation29_spill] sm:$0xff] %v7266_v32 }
 0x617   : > { %v7251_v7 = vpop.f32.mrf.mxu0  ;;  %v7255_v52 = vpop.f32.mrf.mxu2 }
 0x618   : > { %8571 = vst [vmem:[#allocation36_spill] sm:$0xff] %v7251_v7  ;;  %v2570_v7 = vadd.f32 %v2569_v44, %v7266_v32 }
 0x619   : > { %8573 = vst [vmem:[#allocation52_spill] sm:$0xff] %v7255_v52  ;;  %v7257_v5 = vpop.f32.mrf.mxu3 }
 0x61a   : > { %8574 = vst [vmem:[#allocation62_spill] sm:$0xff] %v7257_v5 }
 0x61b   : > { %v7253_v8 = vpop.f32.mrf.mxu1 }
 0x61c   : > { %8572 = vst [vmem:[#allocation49_spill] sm:$0xff] %v7253_v8  ;;  %v2611_v8 = vadd.f32 %v2610_v43, %v7268_v26 }
 0x61f   : > { %v7272_v30 = vpop.f32.mrf.mxu2 }
 0x620   : > { %8579 = vst [vmem:[#allocation46_spill] sm:$0xff] %v7272_v30 }
 0x656   : > { %v7262_v18 = vpop.f32.mrf.mxu0  ;;  %v7264_v35 = vpop.f32.mrf.mxu1 }
 0x657   : > { %8575 = vst [vmem:[#allocation63_spill] sm:$0xff] %v7262_v18 }
 0x658   : > { %8576 = vst [vmem:[#allocation65_spill] sm:$0xff] %v7264_v35 }
 0x65d   : > { %v7274_v52 = vpop.f32.mrf.mxu3  ;;  %v7279_v0 = vpop.f32.mrf.mxu2 }
 0x65e   : > { %8580 = vst [vmem:[#allocation39_spill] sm:$0xff] %v7274_v52  ;;  %v2833_v5 = vpop.f32.mrf.mxu0  ;;  %v2853_v4 = vpop.f32.mrf.mxu1 }
 0x65f   : > { %v2896_v3 = vadd.f32 %v2833_v5, %v2570_v7  ;;  %v2897_v34 = vadd.f32 %v2853_v4, %v2611_v8  ;;  %8582 = vst [vmem:[#allocation50_spill] sm:$0xff] %v7279_v0  ;;  %v7281_v7 = vperm.slane %v2542_v11, 2 }
 0x661   : > { %v4855_v18 = vmul.f32 -1.442695, %v2896_v3  ;;  %v4856_v35 = vmul.f32 -1.442695, %v2897_v34  ;;  %8583 = vst [vmem:[#allocation59_spill] sm:$0xff] %v7281_v7  ;;  %v2652_v3 = vadd.f32 %v2651_v27, %v7281_v7 }
 0x663   : > { %5116 = vpow2.f32 %v4855_v18 }
 0x664   : > { %5118 = vpow2.f32 %v4856_v35 }
 0x665   : > { %v2893_v44 = vpop.f32.mrf.mxu3  ;;  %v2873_v8 = vpop.f32.mrf.mxu2 }
 0x666   : > { %v2899_v43 = vadd.f32 %v2893_v44, %v2693_v19  ;;  %v2898_v18 = vadd.f32 %v2873_v8, %v2652_v3 }
 0x668   : > { %v4857_v37 = vmul.f32 -1.442695, %v2899_v43 }
 0x669   : > { %v5117_v30 = vpop.eup %5116 }
 0x66a   : > { %v5119_v23 = vpop.eup %5118  ;;  %v2903_v52 = vadd.f32 1.0, %v5117_v30  ;;  %5120 = vpow2.f32 %v4857_v37 }
 0x66b   : > { %v2922_v45 = vadd.f32 1.0, %v5119_v23 }
 0x66c   : > { %5122 = vrcp.f32 %v2903_v52  ;;  %v2915_v30 = vand.u32 2147483648, %v2903_v52  ;;  %v2913_v11 = vand.u32 2147483647, %v2903_v52  ;;  %vm2909_vm3 = vweird.f32 %v2903_v52 }
 0x66d   : > { %5124 = vrcp.f32 %v2922_v45  ;;  %v2934_v37 = vand.u32 2147483648, %v2922_v45  ;;  %v2932_v28 = vand.u32 2147483647, %v2922_v45  ;;  %vm2928_vm4 = vweird.f32 %v2922_v45 }
 0x66e   : > { %v2916_v8 = vor.u32 1.1754944e-38, %v2915_v30  ;;  %vm2914_vm7 = vcmp.eq.f32.partialorder %v2913_v11, 8.507059e+37 }
 0x66f   : > { %vm2933_vm8 = vcmp.eq.f32.partialorder %v2932_v28, 8.507059e+37 }
 0x670   : > { %v5121_v34 = vpop.eup %5120 }
 0x671   : > { %v2942_v9 = vadd.f32 1.0, %v5121_v34 }
 0x672   : > { %v5123_v5 = vpop.eup %5122 }
 0x673   : > { %v5125_v4 = vpop.eup %5124  ;;  %v2905_v35 = vmul.f32 %v5123_v5, %v2903_v52  ;;  %5126 = vrcp.f32 %v2942_v9  ;;  %vm2910_vm1 = vweird.f32 %v5123_v5  ;;  %vm2948_vm10 = vweird.f32 %v2942_v9 }
 0x674   : > { %v2924_v19 = vmul.f32 %v5125_v4, %v2922_v45  ;;  %5128 = vtanh.f32 %v2898_v18  ;;  %vm2929_vm2 = vweird.f32 %v5125_v4  ;;  %vm2911_vm5 = vmor %vm2909_vm3, %vm2910_vm1 }
 0x675   : > { %v2906_v44 = vsub.f32 1.0, %v2905_v35  ;;  %vm2930_vm6 = vmor %vm2928_vm4, %vm2929_vm2  ;;  %v2935_v35 = vor.u32 1.1754944e-38, %v2934_v37 }
 0x676   : > { %v2925_v43 = vsub.f32 1.0, %v2924_v19 }
 0x677   : > { %v2907_v23 = vmul.f32 %v5123_v5, %v2906_v44 }
 0x678   : > { %v2926_v0 = vmul.f32 %v5125_v4, %v2925_v43 }
 0x679   : > { %v5127_v20 = vpop.eup %5126  ;;  %v2908_v27 = vadd.f32 %v5123_v5, %v2907_v23 }
 0x67a   : > { %v2927_v34 = vadd.f32 %v5125_v4, %v2926_v0  ;;  %v2944_v3 = vmul.f32 %v5127_v20, %v2942_v9  ;;  %v5129_v18 = vpop.eup %5128  ;;  %vm2949_vm9 = vweird.f32 %v5127_v20  ;;  %v2954_v0 = vand.u32 2147483648, %v2942_v9 }
 0x67b   : > { %v2912_v19 = vsel %vm2911_vm5, %v5123_v5, %v2908_v27  ;;  %v2952_v5 = vand.u32 2147483647, %v2942_v9  ;;  %vm2950_vm11 = vmor %vm2948_vm10, %vm2949_vm9  ;;  %v7312_v9 = vld [vmem:[#allocation10 + $0x1a0] sm:$0xff]  ;;  %v7314_v27 = vld [vmem:[#allocation10 + $0x1a8] sm:$0xff] }
 0x67c   : > { %v2917_v7 = vsel %vm2914_vm7, %v2916_v8, %v2912_v19  ;;  %v2931_v44 = vsel %vm2930_vm6, %v5125_v4, %v2927_v34  ;;  %v2945_v22 = vsub.f32 1.0, %v2944_v3  ;;  %v2955_v37 = vor.u32 1.1754944e-38, %v2954_v0 }
 0x67d   : > { %v2936_v43 = vsel %vm2933_vm8, %v2935_v35, %v2931_v44  ;;  %v2959_v60 = vmul.f32 %v5129_v18, %v2917_v7  ;;  %vm2953_vm12 = vcmp.eq.f32.partialorder %v2952_v5, 8.507059e+37  ;;  %v7307_v7 = vld [vmem:[#allocation10 + $0x1d8] sm:$0xff] }
 0x67e   : > { %v2958_v21 = vmul.f32 %v2936_v43, %v7143_v13  ;;  %v2946_v23 = vmul.f32 %v5127_v20, %v2945_v22  ;;  %v7294_v22 = vld [vmem:[#allocation10 + $0x1e0] sm:$0xff]  ;;  %v7296_v13 = vld [vmem:[#allocation10 + $0x1e8] sm:$0xff] }
 0x67f   : > { %3248 = vmatpush.msrb.mxu0 %v7294_v22  ;;  %3268 = vmatpush.msrb.mxu1 %v7296_v13 }
 0x680   : > { %v7285_v52 = vadd.f32 %v2959_v60, %v2958_v21  ;;  %v2947_v45 = vadd.f32 %v5127_v20, %v2946_v23  ;;  %v7298_v21 = vld [vmem:[#allocation10 + $0x1f8] sm:$0xff]  ;;  %v7303_v60 = vld [vmem:[#allocation10 + $0x1c0] sm:$0xff] }
 0x681   : > { %3308 = vmatpush.msrb.mxu3 %v7298_v21  ;;  %3249 = vmatpush.msrb.mxu0 %v7303_v60 }
 0x682   : > { %5130 = vtanh.f32 %v7285_v52  ;;  %v2951_v30 = vsel %vm2950_vm11, %v5127_v20, %v2947_v45  ;;  %v7305_v20 = vld [vmem:[#allocation10 + $0x1c8] sm:$0xff] }
 0x683   : > { %v2956_v4 = vsel %vm2953_vm12, %v2955_v37, %v2951_v30  ;;  %3269 = vmatpush.msrb.mxu1 %v7305_v20  ;;  %3309 = vmatpush.msrb.mxu3 %v7307_v7 }
 0x684   : > { %3250 = vmatpush.msrb.mxu0 %v7312_v9 }
 0x685   : > { %3270 = vmatpush.msrb.mxu1 %v7314_v27  ;;  %3310 = vmatpush.msrb.mxu3 %v6929_v15  ;;  %v2573_v15 = vadd.f32 %v7213_v53, %v7266_v32 }
 0x686   : > { %3251 = vmatpush.msrb.mxu0 %v6932_v46  ;;  %v2614_v46 = vadd.f32 %v7215_v33, %v7268_v26 }
 0x687   : > { %3271 = vmatpush.msrb.mxu1 %v6934_v58  ;;  %3311 = vmatpush.msrb.mxu3 %v6943_v55 }
 0x688   : > { %v5131_v28 = vpop.eup %5130  ;;  %3252 = vmatpush.msrb.mxu0 %v6937_v48 }
 0x689   : > { %v7288_v11 = vmul.f32 %v5131_v28, %v2956_v4  ;;  %3272 = vmatpush.msrb.mxu1 %v6941_v61  ;;  %3312 = vmatpush.msrb.mxu3 %v6953_v6 }
 0x68a   : > { %3253 = vmatpush.msrb.mxu0 %v6963_v31 }
 0x68b   : > { %8584 = vst [vmem:[#allocation57_spill] sm:$0xff] %v7288_v11  ;;  %3048 = vmatmul.f32.vlgmr.msra.gmra.mxu0 %v7288_v11  ;;  %3068 = vmatmul.f32.vlgmr.msra.gmra.mxu1 %v7288_v11 }
 0x68c   : > { %3088 = vmatmul.f32.vlgmr.msra.gmra.mxu2 %v7288_v11  ;;  %3108 = vmatmul.f32.vlgmr.msra.gmra.mxu3 %v7288_v11  ;;  %v7524_v11 = vld [vmem:[#allocation10 + $0x50] sm:$0xff] }
 0x68d   : > { %3273 = vmatpush.msrb.mxu1 %v6965_v17  ;;  %3313 = vmatpush.msrb.mxu3 %v6967_v50  ;;  %v2696_v17 = vadd.f32 %v7217_v62, %v7276_v29 }
 0x68e   : > { %3254 = vmatpush.msrb.mxu0 %v6974_v10 }
 0x68f   : > { %3274 = vmatpush.msrb.mxu1 %v6976_v51  ;;  %3314 = vmatpush.msrb.mxu3 %v6979_v39  ;;  %v8585_v51 = vld [vmem:[#allocation31_spill] sm:$0xff] }
 0x690   : > { %3255 = vmatpush.msrb.mxu0 %v6986_v38  ;;  %v8586_v38 = vld [vmem:[#allocation48_spill] sm:$0xff] }
 0x691   : > { %3275 = vmatpush.msrb.mxu1 %v6988_v12  ;;  %3315 = vmatpush.msrb.mxu3 %v6991_v24  ;;  %v8587_v24 = vld [vmem:[#allocation30_spill] sm:$0xff] }
 0x692   : > { %3256 = vmatpush.msrb.mxu0 %v7000_v14  ;;  %v8588_v14 = vld [vmem:[#allocation26_spill] sm:$0xff] }
 0x693   : > { %3276 = vmatpush.msrb.mxu1 %v7002_v63  ;;  %3316 = vmatpush.msrb.mxu3 %v7005_v47 }
 0x694   : > { %3257 = vmatpush.msrb.mxu0 %v7012_v42  ;;  %v8589_v42 = vld [vmem:[#allocation32_spill] sm:$0xff] }
 0x695   : > { %3277 = vmatpush.msrb.mxu1 %v7014_v56  ;;  %3317 = vmatpush.msrb.mxu3 %v7017_v59  ;;  %v8590_v59 = vld [vmem:[#allocation33_spill] sm:$0xff] }
 0x696   : > { %3258 = vmatpush.msrb.mxu0 %v7024_v2  ;;  %v8591_v2 = vld [vmem:[#allocation40_spill] sm:$0xff] }
 0x697   : > { %3278 = vmatpush.msrb.mxu1 %v7026_v54  ;;  %3318 = vmatpush.msrb.mxu3 %v7029_v57  ;;  %v8592_v54 = vld [vmem:[#allocation35_spill] sm:$0xff] }
 0x698   : > { %3259 = vmatpush.msrb.mxu0 %v7034_v25 }
 0x699   : > { %3279 = vmatpush.msrb.mxu1 %v8540_v41  ;;  %3319 = vmatpush.msrb.mxu3 %v8542_v16  ;;  %v8593_v41 = vld [vmem:[#allocation59_spill] sm:$0xff] }
 0x69a   : > { %3260 = vmatpush.msrb.mxu0 %v8543_v36  ;;  %v8594_v16 = vld [vmem:[#allocation51_spill] sm:$0xff] }
 0x69b   : > { %3280 = vmatpush.msrb.mxu1 %v8544_v1  ;;  %3320 = vmatpush.msrb.mxu3 %v8546_v40  ;;  %v2655_v36 = vadd.f32 %v8594_v16, %v8593_v41  ;;  %v7416_v16 = vld [vmem:[#allocation10 + $0x178] sm:$0xff] }
 0x69c   : > { %3261 = vmatpush.msrb.mxu0 %v8547_v49  ;;  %8596 = vst [vmem:[#allocation37_spill] sm:$0xff] %v7416_v16 }
 0x69d   : > { %3281 = vmatpush.msrb.mxu1 %v8585_v51  ;;  %3321 = vmatpush.msrb.mxu3 %v8586_v38 }
 0x69e   : > { %3262 = vmatpush.msrb.mxu0 %v8587_v24 }
 0x69f   : > { %3282 = vmatpush.msrb.mxu1 %v8588_v14  ;;  %3322 = vmatpush.msrb.mxu3 %v8589_v42  ;;  %v7387_v14 = vld [vmem:[#allocation10 + $0x1d0] sm:$0xff]  ;;  %v7396_v42 = vld [vmem:[#allocation10 + $0x180] sm:$0xff] }
 0x6a0   : > { %3263 = vmatpush.msrb.mxu0 %v8590_v59  ;;  %v7400_v59 = vld [vmem:[#allocation10 + $0x190] sm:$0xff] }
 0x6a1   : > { %3283 = vmatpush.msrb.mxu1 %v8591_v2  ;;  %3323 = vmatpush.msrb.mxu3 %v8592_v54  ;;  %v7404_v2 = vld [vmem:[#allocation10 + $0x198] sm:$0xff]  ;;  %v7408_v54 = vld [vmem:[#allocation10 + $0x160] sm:$0xff] }
 0x6a2   : > { %3464 = vmatpush.msra.mxu0 %v7294_v22 }
 0x6a3   : > { %3484 = vmatpush.msra.mxu1 %v7296_v13  ;;  %3524 = vmatpush.msra.mxu3 %v7298_v21 }
 0x6a4   : > { %3465 = vmatpush.msra.mxu0 %v7303_v60 }
 0x6a5   : > { %3485 = vmatpush.msra.mxu1 %v7305_v20  ;;  %3525 = vmatpush.msra.mxu3 %v7307_v7 }
 0x6a6   : > { %3466 = vmatpush.msra.mxu0 %v7312_v9 }
 0x6a7   : > { %3486 = vmatpush.msra.mxu1 %v7314_v27 }
 0x6a8   : > { %3467 = vmatpush.msra.mxu0 %v7396_v42 }
 0x6aa   : > { %3468 = vmatpush.msra.mxu0 %v7408_v54 }
 0x708   : > { %v3049_v58 = vpop.f32.mrf.mxu0  ;;  %v3069_v48 = vpop.f32.mrf.mxu1 }
 0x709   : > { %v3112_v61 = vadd.f32 %v3049_v58, %v2573_v15  ;;  %v3113_v55 = vadd.f32 %v3069_v48, %v2614_v46 }
 0x70b   : > { %v4858_v6 = vmul.f32 -1.442695, %v3112_v61  ;;  %v4859_v31 = vmul.f32 -1.442695, %v3113_v55 }
 0x70d   : > { %5132 = vpow2.f32 %v4858_v6 }
 0x70e   : > { %5134 = vpow2.f32 %v4859_v31 }
 0x70f   : > { %v3109_v50 = vpop.f32.mrf.mxu3  ;;  %v3089_v57 = vpop.f32.mrf.mxu2 }
 0x710   : > { %v3115_v10 = vadd.f32 %v3109_v50, %v2696_v17  ;;  %v3114_v49 = vadd.f32 %v3089_v57, %v2655_v36  ;;  %v7410_v57 = vld [vmem:[#allocation10 + $0x168] sm:$0xff]  ;;  %v7420_v36 = vld [vmem:[#allocation10 + $0x140] sm:$0xff] }
 0x711   : > { %3469 = vmatpush.msra.mxu0 %v7420_v36 }
 0x712   : > { %v4860_v39 = vmul.f32 -1.442695, %v3115_v10 }
 0x713   : > { %v5133_v12 = vpop.eup %5132 }
 0x714   : > { %v5135_v63 = vpop.eup %5134  ;;  %v3119_v47 = vadd.f32 1.0, %v5133_v12  ;;  %5136 = vpow2.f32 %v4860_v39 }
 0x715   : > { %v3138_v56 = vadd.f32 1.0, %v5135_v63  ;;  %v7390_v63 = vld [vmem:[#allocation10 + $0x1b0] sm:$0xff] }
 0x716   : > { %5138 = vrcp.f32 %v3119_v47  ;;  %v3131_v3 = vand.u32 2147483648, %v3119_v47  ;;  %v3129_v18 = vand.u32 2147483647, %v3119_v47  ;;  %vm3125_vm15 = vweird.f32 %v3119_v47 }
 0x717   : > { %5140 = vrcp.f32 %v3138_v56  ;;  %v3150_v35 = vand.u32 2147483648, %v3138_v56  ;;  %v3148_v43 = vand.u32 2147483647, %v3138_v56  ;;  %vm3144_vm0 = vweird.f32 %v3138_v56 }
 0x718   : > { %v3132_v0 = vor.u32 1.1754944e-38, %v3131_v3  ;;  %vm3130_vm3 = vcmp.eq.f32.partialorder %v3129_v18, 8.507059e+37  ;;  %v7446_v3 = vld [vmem:[#allocation10 + $0x108] sm:$0xff]  ;;  %v7456_v18 = vld [vmem:[#allocation10 + $0xe0] sm:$0xff] }
 0x719   : > { %v3151_v37 = vor.u32 1.1754944e-38, %v3150_v35  ;;  %vm3149_vm4 = vcmp.eq.f32.partialorder %v3148_v43, 8.507059e+37  ;;  %v7448_v35 = vld [vmem:[#allocation10 + $0x110] sm:$0xff] }
 0x71a   : > { %v5137_v25 = vpop.eup %5136  ;;  %v7460_v43 = vld [vmem:[#allocation10 + $0xf0] sm:$0xff] }
 0x71b   : > { %v3158_v1 = vadd.f32 1.0, %v5137_v25  ;;  %v7412_v25 = vld [vmem:[#allocation10 + $0x170] sm:$0xff] }
 0x71c   : > { %v5139_v40 = vpop.eup %5138 }
 0x71d   : > { %v5141_v53 = vpop.eup %5140  ;;  %v3121_v33 = vmul.f32 %v5139_v40, %v3119_v47  ;;  %5142 = vrcp.f32 %v3158_v1  ;;  %vm3126_vm13 = vweird.f32 %v5139_v40  ;;  %v3170_v50 = vand.u32 2147483648, %v3158_v1  ;;  %v7392_v47 = vld [vmem:[#allocation10 + $0x1b8] sm:$0xff] }
 0x71e   : > { %v3140_v62 = vmul.f32 %v5141_v53, %v3138_v56  ;;  %5144 = vtanh.f32 %v3114_v49  ;;  %vm3145_vm14 = vweird.f32 %v5141_v53  ;;  %vm3127_vm1 = vmor %vm3125_vm15, %vm3126_vm13  ;;  %vm3164_vm6 = vweird.f32 %v3158_v1  ;;  %3526 = vmatpush.msra.mxu3 %v7392_v47  ;;  %v7398_v56 = vld [vmem:[#allocation10 + $0x188] sm:$0xff]  ;;  %v7428_v49 = vld [vmem:[#allocation10 + $0x158] sm:$0xff] }
 0x71f   : > { %v3122_v8 = vsub.f32 1.0, %v3121_v33  ;;  %vm3146_vm2 = vmor %vm3144_vm0, %vm3145_vm14  ;;  %v3168_v10 = vand.u32 2147483647, %v3158_v1  ;;  %v3171_v39 = vor.u32 1.1754944e-38, %v3170_v50  ;;  %3487 = vmatpush.msra.mxu1 %v7398_v56  ;;  %v7434_v33 = vld [vmem:[#allocation10 + $0x128] sm:$0xff] }
 0x720   : > { %v3141_v34 = vsub.f32 1.0, %v3140_v62  ;;  %3527 = vmatpush.msra.mxu3 %v7404_v2  ;;  %8599 = vst [vmem:[#allocation27_spill] sm:$0xff] %v7434_v33  ;;  %v7436_v62 = vld [vmem:[#allocation10 + $0x130] sm:$0xff] }
 0x721   : > { %v3123_v19 = vmul.f32 %v5139_v40, %v3122_v8  ;;  %vm3169_vm8 = vcmp.eq.f32.partialorder %v3168_v10, 8.507059e+37  ;;  %3488 = vmatpush.msra.mxu1 %v7410_v57  ;;  %v7440_v8 = vld [vmem:[#allocation10 + $0x138] sm:$0xff] }
 0x722   : > { %v3142_v44 = vmul.f32 %v5141_v53, %v3141_v34  ;;  %3528 = vmatpush.msra.mxu3 %v7416_v16  ;;  %8600 = vst [vmem:[#allocation31_spill] sm:$0xff] %v7440_v8  ;;  %v7444_v34 = vld [vmem:[#allocation10 + $0x100] sm:$0xff] }
 0x723   : > { %v5143_v23 = vpop.eup %5142  ;;  %v3124_v45 = vadd.f32 %v5139_v40, %v3123_v19  ;;  %v7452_v19 = vld [vmem:[#allocation10 + $0x118] sm:$0xff] }
 0x724   : > { %v3143_v5 = vadd.f32 %v5141_v53, %v3142_v44  ;;  %v3160_v30 = vmul.f32 %v5143_v23, %v3158_v1  ;;  %v5145_v4 = vpop.eup %5144  ;;  %vm3165_vm5 = vweird.f32 %v5143_v23  ;;  %v7422_v1 = vld [vmem:[#allocation10 + $0x148] sm:$0xff]  ;;  %3529 = vmatpush.msra.mxu3 %v7428_v49 }
 0x725   : > { %v3128_v28 = vsel %vm3127_vm1, %v5139_v40, %v3124_v45  ;;  %vm3166_vm7 = vmor %vm3164_vm6, %vm3165_vm5  ;;  %8597 = vst [vmem:[#allocation60_spill] sm:$0xff] %v7422_v1  ;;  %v7424_v40 = vld [vmem:[#allocation10 + $0x150] sm:$0xff]  ;;  %3489 = vmatpush.msra.mxu1 %v7422_v1  ;;  %v7458_v44 = vld [vmem:[#allocation10 + $0xe8] sm:$0xff] }
 0x726   : > { %v3133_v15 = vsel %vm3130_vm3, %v3132_v0, %v3128_v28  ;;  %v3147_v46 = vsel %vm3146_vm2, %v5141_v53, %v3143_v5  ;;  %v3161_v58 = vsub.f32 1.0, %v3160_v30  ;;  %v7432_v53 = vld [vmem:[#allocation10 + $0x120] sm:$0xff]  ;;  %3530 = vmatpush.msra.mxu3 %v7440_v8  ;;  %v7468_v30 = vld [vmem:[#allocation10 + $0xf8] sm:$0xff] }
 0x727   : > { %v3152_v48 = vsel %vm3149_vm4, %v3151_v37, %v3147_v46  ;;  %v3175_v61 = vmul.f32 %v5145_v4, %v3133_v15  ;;  %8598 = vst [vmem:[#allocation61_spill] sm:$0xff] %v7432_v53  ;;  %3470 = vmatpush.msra.mxu0 %v7432_v53  ;;  %3490 = vmatpush.msra.mxu1 %v7434_v33  ;;  %v8602_v0 = vld [vmem:[#allocation34_spill] sm:$0xff]  ;;  %v7474_v15 = vld [vmem:[#allocation10 + $0xc8] sm:$0xff]  ;;  %v7476_v46 = vld [vmem:[#allocation10 + $0xd0] sm:$0xff] }
 0x728   : > { %v3174_v55 = vmul.f32 %v3152_v48, %v7285_v52  ;;  %v3162_v6 = vmul.f32 %v5143_v23, %v3161_v58  ;;  %v7384_v52 = vld [vmem:[#allocation10 + $0x1f0] sm:$0xff]  ;;  %3531 = vmatpush.msra.mxu3 %v7452_v19  ;;  %v2617_v5 = vadd.f32 %v8602_v0, %v7268_v26  ;;  %v7472_v4 = vld [vmem:[#allocation10 + $0xc0] sm:$0xff]  ;;  %v7508_v0 = vld [vmem:[#allocation10 + $0x68] sm:$0xff] }
 0x729   : > { %3504 = vmatpush.msra.mxu2 %v7384_v52  ;;  %3471 = vmatpush.msra.mxu0 %v7444_v34  ;;  %8605 = vst [vmem:[#allocation26_spill] sm:$0xff] %v7508_v0  ;;  %v7532_v26 = vld [vmem:[#allocation10 + $0x28] sm:$0xff] }
 0x72a   : > { %v7375_v31 = vadd.f32 %v3175_v61, %v3174_v55  ;;  %v3163_v17 = vadd.f32 %v5143_v23, %v3162_v6  ;;  %3491 = vmatpush.msra.mxu1 %v7446_v3  ;;  %3532 = vmatpush.msra.mxu3 %v7468_v30  ;;  %v7480_v61 = vld [vmem:[#allocation10 + $0xd8] sm:$0xff]  ;;  %v7484_v55 = vld [vmem:[#allocation10 + $0xa0] sm:$0xff]  ;;  %v7486_v6 = vld [vmem:[#allocation10 + $0xa8] sm:$0xff] }
 0x72b   : > { %3505 = vmatpush.msra.mxu2 %v7387_v14  ;;  %3472 = vmatpush.msra.mxu0 %v7456_v18 }
 0x72c   : > { %5146 = vtanh.f32 %v7375_v31  ;;  %v3167_v51 = vsel %vm3166_vm7, %v5143_v23, %v3163_v17  ;;  %v8601_v23 = vld [vmem:[#allocation44_spill] sm:$0xff]  ;;  %3492 = vmatpush.msra.mxu1 %v7458_v44  ;;  %3533 = vmatpush.msra.mxu3 %v7480_v61 }
 0x72d   : > { %v3172_v12 = vsel %vm3169_vm8, %v3171_v39, %v3167_v51  ;;  %3506 = vmatpush.msra.mxu2 %v7390_v63  ;;  %v2576_v45 = vadd.f32 %v8601_v23, %v7266_v32  ;;  %3473 = vmatpush.msra.mxu0 %v7472_v4  ;;  %v7488_v17 = vld [vmem:[#allocation10 + $0xb0] sm:$0xff]  ;;  %v7492_v51 = vld [vmem:[#allocation10 + $0xb8] sm:$0xff]  ;;  %v7496_v39 = vld [vmem:[#allocation10 + $0x80] sm:$0xff] }
 0x72e   : > { %3493 = vmatpush.msra.mxu1 %v7474_v15  ;;  %3534 = vmatpush.msra.mxu3 %v7492_v51  ;;  %v7504_v23 = vld [vmem:[#allocation10 + $0x98] sm:$0xff]  ;;  %v7536_v32 = vld [vmem:[#allocation10 + $0x30] sm:$0xff] }
 0x72f   : > { %3507 = vmatpush.msra.mxu2 %v7400_v59  ;;  %3474 = vmatpush.msra.mxu0 %v7484_v55  ;;  %8603 = vst [vmem:[#allocation48_spill] sm:$0xff] %v7504_v23 }
 0x730   : > { %3494 = vmatpush.msra.mxu1 %v7486_v6  ;;  %3535 = vmatpush.msra.mxu3 %v7504_v23 }
 0x731   : > { %3508 = vmatpush.msra.mxu2 %v7412_v25  ;;  %3475 = vmatpush.msra.mxu0 %v7496_v39 }
 0x732   : > { %v5147_v38 = vpop.eup %5146 }
 0x733   : > { %v7378_v24 = vmul.f32 %v5147_v38, %v3172_v12  ;;  %3509 = vmatpush.msra.mxu2 %v7424_v40  ;;  %v7498_v38 = vld [vmem:[#allocation10 + $0x88] sm:$0xff]  ;;  %v7500_v12 = vld [vmem:[#allocation10 + $0x90] sm:$0xff] }
 0x734   : > { %3495 = vmatpush.msra.mxu1 %v7498_v38 }
 0x735   : > { %8595 = vst [vmem:[#allocation58_spill] sm:$0xff] %v7378_v24  ;;  %3264 = vmatmul.f32.vlgmr.msrb.gmra.mxu0 %v7378_v24  ;;  %3284 = vmatmul.f32.vlgmr.msrb.gmra.mxu1 %v7378_v24 }
 0x736   : > { %3304 = vmatmul.f32.vlgmr.msrb.gmra.mxu2 %v7378_v24  ;;  %3324 = vmatmul.f32.vlgmr.msrb.gmra.mxu3 %v7378_v24  ;;  %v7522_v24 = vld [vmem:[#allocation10 + $0x48] sm:$0xff] }
 0x737   : > { %3510 = vmatpush.msra.mxu2 %v7436_v62  ;;  %3496 = vmatpush.msra.mxu1 %v7508_v0  ;;  %8610 = vst [vmem:[#allocation35_spill] sm:$0xff] %v7522_v24  ;;  %v7538_v0 = vld [vmem:[#allocation10 + $0x38] sm:$0xff] }
 0x739   : > { %3511 = vmatpush.msra.mxu2 %v7448_v35  ;;  %3497 = vmatpush.msra.mxu1 %v7522_v24  ;;  %v7550_v24 = vld [vmem:[#allocation10 + $0x18] sm:$0xff] }
 0x73b   : > { %3512 = vmatpush.msra.mxu2 %v7460_v43  ;;  %3498 = vmatpush.msra.mxu1 %v7532_v26 }
 0x73d   : > { %3513 = vmatpush.msra.mxu2 %v7476_v46 }
 0x73f   : > { %3514 = vmatpush.msra.mxu2 %v7488_v17 }
 0x741   : > { %3515 = vmatpush.msra.mxu2 %v7500_v12 }
 0x7b2   : > { %v3265_v37 = vpop.f32.mrf.mxu0  ;;  %v3285_v28 = vpop.f32.mrf.mxu1 }
 0x7b3   : > { %v3328_v58 = vadd.f32 %v3265_v37, %v2576_v45  ;;  %v3329_v48 = vadd.f32 %v3285_v28, %v2617_v5  ;;  %v7506_v45 = vld [vmem:[#allocation10 + $0x60] sm:$0xff]  ;;  %v7514_v28 = vld [vmem:[#allocation10 + $0x70] sm:$0xff] }
 0x7b4   : > { %8604 = vst [vmem:[#allocation30_spill] sm:$0xff] %v7506_v45  ;;  %v8606_v5 = vld [vmem:[#allocation66_spill] sm:$0xff]  ;;  %3476 = vmatpush.msra.mxu0 %v7506_v45  ;;  %3516 = vmatpush.msra.mxu2 %v7514_v28 }
 0x7b5   : > { %v4861_v50 = vmul.f32 -1.442695, %v3328_v58  ;;  %v4862_v10 = vmul.f32 -1.442695, %v3329_v48  ;;  %v2699_v37 = vadd.f32 %v8606_v5, %v7276_v29  ;;  %8607 = vst [vmem:[#allocation32_spill] sm:$0xff] %v7514_v28  ;;  %v7516_v58 = vld [vmem:[#allocation10 + $0x78] sm:$0xff] }
 0x7b6   : > { %8608 = vst [vmem:[#allocation33_spill] sm:$0xff] %v7516_v58  ;;  %v7518_v48 = vld [vmem:[#allocation10 + $0x40] sm:$0xff]  ;;  %3536 = vmatpush.msra.mxu3 %v7516_v58  ;;  %3517 = vmatpush.msra.mxu2 %v7524_v11 }
 0x7b7   : > { %5148 = vpow2.f32 %v4861_v50  ;;  %8609 = vst [vmem:[#allocation40_spill] sm:$0xff] %v7518_v48  ;;  %v7530_v29 = vld [vmem:[#allocation10 + $0x20] sm:$0xff]  ;;  %3477 = vmatpush.msra.mxu0 %v7518_v48  ;;  %v7548_v48 = vld [vmem:[#allocation10 + $0x10] sm:$0xff] }
 0x7b8   : > { %5150 = vpow2.f32 %v4862_v10  ;;  %v7526_v10 = vld [vmem:[#allocation10 + $0x58] sm:$0xff]  ;;  %8611 = vst [vmem:[#allocation51_spill] sm:$0xff] %v7548_v48  ;;  %3518 = vmatpush.msra.mxu2 %v7536_v32 }
 0x7b9   : > { %v3325_v50 = vpop.f32.mrf.mxu3  ;;  %3537 = vmatpush.msra.mxu3 %v7526_v10  ;;  %3478 = vmatpush.msra.mxu0 %v7530_v29 }
 0x7ba   : > { %v3331_v5 = vadd.f32 %v3325_v50, %v2699_v37  ;;  %v7542_v37 = vld [vmem:[#allocation10] sm:$0xff]  ;;  %v7544_v50 = vld [vmem:[#allocation10 + $0x8] sm:$0xff]  ;;  %3519 = vmatpush.msra.mxu2 %v7548_v48 }
 0x7bb   : > { %3538 = vmatpush.msra.mxu3 %v7538_v0  ;;  %3479 = vmatpush.msra.mxu0 %v7542_v37 }
 0x7bc   : > { %v4863_v45 = vmul.f32 -1.442695, %v3331_v5  ;;  %3499 = vmatpush.msra.mxu1 %v7544_v50  ;;  %3720 = vmatpush.msrb.mxu2 %v7384_v52 }
 0x7bd   : > { %v5149_v58 = vpop.eup %5148  ;;  %3539 = vmatpush.msra.mxu3 %v7550_v24  ;;  %3680 = vmatpush.msrb.mxu0 %v7294_v22 }
 0x7be   : > { %v5151_v28 = vpop.eup %5150  ;;  %v7552_v23 = vadd.f32 1.0, %v5149_v58  ;;  %5152 = vpow2.f32 %v4863_v45  ;;  %3700 = vmatpush.msrb.mxu1 %v7296_v13  ;;  %v3305_v45 = vpop.f32.mrf.mxu2  ;;  %v8612_v58 = vld [vmem:[#allocation68_spill] sm:$0xff]  ;;  %3721 = vmatpush.msrb.mxu2 %v7387_v14 }
 0x7bf   : > { %v7556_v5 = vadd.f32 1.0, %v5151_v28  ;;  %3740 = vmatpush.msrb.mxu3 %v7298_v21  ;;  %3681 = vmatpush.msrb.mxu0 %v7303_v60  ;;  %v2658_v48 = vadd.f32 %v8612_v58, %v8593_v41 }
 0x7c0   : > { %5154 = vrcp.f32 %v7552_v23  ;;  %3701 = vmatpush.msrb.mxu1 %v7305_v20  ;;  %3722 = vmatpush.msrb.mxu2 %v7390_v63  ;;  %v3345_v58 = vand.u32 2147483647, %v7552_v23  ;;  %vm3341_vm11 = vweird.f32 %v7552_v23 }
 0x7c1   : > { %5156 = vrcp.f32 %v7556_v5  ;;  %3741 = vmatpush.msrb.mxu3 %v7307_v7  ;;  %3682 = vmatpush.msrb.mxu0 %v7312_v9  ;;  %v3330_v21 = vadd.f32 %v3305_v45, %v2658_v48  ;;  %v3347_v48 = vand.u32 2147483648, %v7552_v23  ;;  %v3366_v45 = vand.u32 2147483648, %v7556_v5 }
 0x7c2   : > { %3702 = vmatpush.msrb.mxu1 %v7314_v27  ;;  %3723 = vmatpush.msrb.mxu2 %v7400_v59  ;;  %vm3360_vm12 = vweird.f32 %v7556_v5  ;;  %vm3346_vm15 = vcmp.eq.f32.partialorder %v3345_v58, 8.507059e+37  ;;  %v8615_v58 = vld [vmem:[#allocation26_spill] sm:$0xff] }
 0x7c3   : > { %3742 = vmatpush.msrb.mxu3 %v7392_v47  ;;  %3683 = vmatpush.msrb.mxu0 %v7396_v42 }
 0x7c4   : > { %v5153_v28 = vpop.eup %5152  ;;  %3703 = vmatpush.msrb.mxu1 %v7398_v56  ;;  %3724 = vmatpush.msrb.mxu2 %v7412_v25 }
 0x7c5   : > { %v7574_v22 = vadd.f32 1.0, %v5153_v28  ;;  %3743 = vmatpush.msrb.mxu3 %v7404_v2  ;;  %3684 = vmatpush.msrb.mxu0 %v7408_v54 }
 0x7c6   : > { %v5155_v13 = vpop.eup %5154  ;;  %3704 = vmatpush.msrb.mxu1 %v7410_v57  ;;  %3725 = vmatpush.msrb.mxu2 %v7424_v40 }
 0x7c7   : > { %v5157_v60 = vpop.eup %5156  ;;  %v3337_v20 = vmul.f32 %v5155_v13, %v7552_v23  ;;  %5158 = vrcp.f32 %v7574_v22  ;;  %3744 = vmatpush.msrb.mxu3 %v7416_v16  ;;  %vm3342_vm9 = vweird.f32 %v5155_v13  ;;  %3685 = vmatpush.msrb.mxu0 %v7420_v36  ;;  %v3367_v23 = vor.u32 1.1754944e-38, %v3366_v45  ;;  %v8614_v45 = vld [vmem:[#allocation30_spill] sm:$0xff] }
 0x7c8   : > { %v3356_v7 = vmul.f32 %v5157_v60, %v7556_v5  ;;  %5160 = vtanh.f32 %v3330_v21  ;;  %3705 = vmatpush.msrb.mxu1 %v7422_v1  ;;  %vm3361_vm10 = vweird.f32 %v5157_v60  ;;  %vm3343_vm13 = vmor %vm3341_vm11, %vm3342_vm9  ;;  %3726 = vmatpush.msrb.mxu2 %v7436_v62  ;;  %vm3380_vm2 = vweird.f32 %v7574_v22 }
 0x7c9   : > { %v3338_v9 = vsub.f32 1.0, %v3337_v20  ;;  %3745 = vmatpush.msrb.mxu3 %v7428_v49  ;;  %3686 = vmatpush.msrb.mxu0 %v7432_v53  ;;  %vm3362_vm14 = vmor %vm3360_vm12, %vm3361_vm10 }
 0x7ca   : > { %v3357_v27 = vsub.f32 1.0, %v3356_v7  ;;  %v3364_v7 = vand.u32 2147483647, %v7556_v5  ;;  %3706 = vmatpush.msrb.mxu1 %v7434_v33  ;;  %3727 = vmatpush.msrb.mxu2 %v7448_v35 }
 0x7cb   : > { %v3339_v28 = vmul.f32 %v5155_v13, %v3338_v9  ;;  %v3348_v9 = vor.u32 1.1754944e-38, %v3347_v48  ;;  %3746 = vmatpush.msrb.mxu3 %v7440_v8  ;;  %3687 = vmatpush.msrb.mxu0 %v7444_v34 }
 0x7cc   : > { %v3358_v20 = vmul.f32 %v5157_v60, %v3357_v27  ;;  %3707 = vmatpush.msrb.mxu1 %v7446_v3  ;;  %vm3365_vm0 = vcmp.eq.f32.partialorder %v3364_v7, 8.507059e+37  ;;  %3728 = vmatpush.msrb.mxu2 %v7460_v43 }
 0x7cd   : > { %v7599_v21 = vpop.eup %5158  ;;  %v3340_v16 = vadd.f32 %v5155_v13, %v3339_v28  ;;  %3747 = vmatpush.msrb.mxu3 %v7452_v19  ;;  %3688 = vmatpush.msrb.mxu0 %v7456_v18 }
 0x7ce   : > { %v3359_v27 = vadd.f32 %v5157_v60, %v3358_v20  ;;  %v3376_v1 = vmul.f32 %v7599_v21, %v7574_v22  ;;  %v5161_v5 = vpop.eup %5160  ;;  %3708 = vmatpush.msrb.mxu1 %v7458_v44  ;;  %3729 = vmatpush.msrb.mxu2 %v7476_v46  ;;  %vm3381_vm1 = vweird.f32 %v7599_v21 }
 0x7cf   : > { %v3344_v28 = vsel %vm3343_vm13, %v5155_v13, %v3340_v16  ;;  %3748 = vmatpush.msrb.mxu3 %v7468_v30  ;;  %3689 = vmatpush.msrb.mxu0 %v7472_v4  ;;  %vm3382_vm3 = vmor %vm3380_vm2, %vm3381_vm1 }
 0x7d0   : > { %v3349_v33 = vsel %vm3346_vm15, %v3348_v9, %v3344_v28  ;;  %v3363_v48 = vsel %vm3362_vm14, %v5157_v60, %v3359_v27  ;;  %v3377_v20 = vsub.f32 1.0, %v3376_v1  ;;  %3709 = vmatpush.msrb.mxu1 %v7474_v15  ;;  %3730 = vmatpush.msrb.mxu2 %v7488_v17  ;;  %v8616_v9 = vld [vmem:[#allocation32_spill] sm:$0xff]  ;;  %v8617_v27 = vld [vmem:[#allocation33_spill] sm:$0xff] }
 0x7d1   : > { %v3368_v53 = vsel %vm3365_vm0, %v3367_v23, %v3363_v48  ;;  %v3391_v8 = vmul.f32 %v5161_v5, %v3349_v33  ;;  %3749 = vmatpush.msrb.mxu3 %v7480_v61  ;;  %3690 = vmatpush.msrb.mxu0 %v7484_v55  ;;  %v3384_v33 = vand.u32 2147483647, %v7574_v22  ;;  %v8619_v23 = vld [vmem:[#allocation35_spill] sm:$0xff] }
 0x7d2   : > { %v3390_v16 = vmul.f32 %v3368_v53, %v7375_v31  ;;  %v3378_v13 = vmul.f32 %v7599_v21, %v3377_v20  ;;  %3710 = vmatpush.msrb.mxu1 %v7486_v6  ;;  %v3386_v53 = vand.u32 2147483648, %v7574_v22  ;;  %3731 = vmatpush.msrb.mxu2 %v7500_v12  ;;  %v8618_v22 = vld [vmem:[#allocation40_spill] sm:$0xff]  ;;  %v8621_v48 = vld [vmem:[#allocation51_spill] sm:$0xff] }
 0x7d3   : > { %3750 = vmatpush.msrb.mxu3 %v7492_v51  ;;  %3691 = vmatpush.msrb.mxu0 %v7496_v39  ;;  %vm3385_vm4 = vcmp.eq.f32.partialorder %v3384_v33, 8.507059e+37  ;;  %v8626_v20 = vld [vmem:[#allocation56_spill] sm:$0xff] }
 0x7d4   : > { %v7623_v1 = vadd.f32 %v3391_v8, %v3390_v16  ;;  %v3379_v31 = vadd.f32 %v7599_v21, %v3378_v13  ;;  %3711 = vmatpush.msrb.mxu1 %v7498_v38  ;;  %v8613_v8 = vld [vmem:[#allocation48_spill] sm:$0xff]  ;;  %v3387_v7 = vor.u32 1.1754944e-38, %v3386_v53  ;;  %3732 = vmatpush.msrb.mxu2 %v8616_v9  ;;  %v8627_v16 = vld [vmem:[#allocation53_spill] sm:$0xff] }
 0x7d5   : > { %3751 = vmatpush.msrb.mxu3 %v8613_v8  ;;  %3692 = vmatpush.msrb.mxu0 %v8614_v45 }
 0x7d6   : > { %5162 = vtanh.f32 %v7623_v1  ;;  %v3383_v60 = vsel %vm3382_vm3, %v7599_v21, %v3379_v31  ;;  %3712 = vmatpush.msrb.mxu1 %v8615_v58  ;;  %3733 = vmatpush.msrb.mxu2 %v7524_v11 }
 0x7d7   : > { %3752 = vmatpush.msrb.mxu3 %v8617_v27  ;;  %3693 = vmatpush.msrb.mxu0 %v8618_v22  ;;  %v3388_v5 = vsel %vm3385_vm4, %v3387_v7, %v3383_v60 }
 0x7d8   : > { %3713 = vmatpush.msrb.mxu1 %v8619_v23  ;;  %3734 = vmatpush.msrb.mxu2 %v7536_v32 }
 0x7d9   : > { %3753 = vmatpush.msrb.mxu3 %v7526_v10  ;;  %3694 = vmatpush.msrb.mxu0 %v7530_v29 }
 0x7da   : > { %3714 = vmatpush.msrb.mxu1 %v7532_v26  ;;  %3735 = vmatpush.msrb.mxu2 %v8621_v48 }
 0x7db   : > { %3754 = vmatpush.msrb.mxu3 %v7538_v0  ;;  %3695 = vmatpush.msrb.mxu0 %v7542_v37 }
 0x7dc   : > { %v5163_v28 = vpop.eup %5162  ;;  %3715 = vmatpush.msrb.mxu1 %v7544_v50 }
 0x7dd   : > { %v7650_v21 = vmul.f32 %v5163_v28, %v3388_v5  ;;  %3755 = vmatpush.msrb.mxu3 %v7550_v24  ;;  %v8628_v5 = vld [vmem:[#allocation42_spill] sm:$0xff] }
 0x7df   : > { %8620 = vst [vmem:[#allocation44_spill] sm:$0xff] %v7650_v21  ;;  %3480 = vmatmul.f32.vlgmr.msra.gmra.mxu0 %v7650_v21  ;;  %3500 = vmatmul.f32.vlgmr.msra.gmra.mxu1 %v7650_v21 }
 0x7e0   : > { %3520 = vmatmul.f32.vlgmr.msra.gmra.mxu2 %v7650_v21  ;;  %3540 = vmatmul.f32.vlgmr.msra.gmra.mxu3 %v7650_v21 }
 0x7e1   : > { %3936 = vmatpush.msra.mxu2 %v7384_v52  ;;  %v8622_v52 = vld [vmem:[#allocation29_spill] sm:$0xff] }
 0x7e3   : > { %3937 = vmatpush.msra.mxu2 %v7387_v14  ;;  %v8623_v14 = vld [vmem:[#allocation67_spill] sm:$0xff] }
 0x7e5   : > { %3938 = vmatpush.msra.mxu2 %v7390_v63  ;;  %v2579_v63 = vadd.f32 %v8623_v14, %v8622_v52 }
 0x7e7   : > { %3939 = vmatpush.msra.mxu2 %v7400_v59  ;;  %v8624_v59 = vld [vmem:[#allocation41_spill] sm:$0xff] }
 0x7e9   : > { %3940 = vmatpush.msra.mxu2 %v7412_v25  ;;  %v8625_v25 = vld [vmem:[#allocation64_spill] sm:$0xff] }
 0x7eb   : > { %3941 = vmatpush.msra.mxu2 %v7424_v40  ;;  %v2620_v40 = vadd.f32 %v8625_v25, %v8624_v59 }
 0x7ed   : > { %3942 = vmatpush.msra.mxu2 %v7436_v62 }
 0x7ef   : > { %3943 = vmatpush.msra.mxu2 %v7448_v35 }
 0x7f1   : > { %3944 = vmatpush.msra.mxu2 %v7460_v43 }
 0x7f3   : > { %3945 = vmatpush.msra.mxu2 %v7476_v46 }
 0x7f5   : > { %3946 = vmatpush.msra.mxu2 %v7488_v17 }
 0x7f7   : > { %3947 = vmatpush.msra.mxu2 %v7500_v12 }
 0x7f9   : > { %3948 = vmatpush.msra.mxu2 %v8616_v9 }
 0x7fb   : > { %3949 = vmatpush.msra.mxu2 %v7524_v11  ;;  %v2702_v11 = vadd.f32 %v8627_v16, %v8626_v20 }
 0x7fd   : > { %3950 = vmatpush.msra.mxu2 %v7536_v32 }
 0x7ff   : > { %3951 = vmatpush.msra.mxu2 %v8621_v48  ;;  %v2661_v48 = vadd.f32 %v8628_v5, %v8593_v41 }
 0x85c   : > { %v3481_v62 = vpop.f32.mrf.mxu0  ;;  %v3501_v35 = vpop.f32.mrf.mxu1 }
 0x85d   : > { %v3544_v43 = vadd.f32 %v3481_v62, %v2579_v63  ;;  %v3545_v46 = vadd.f32 %v3501_v35, %v2620_v40 }
 0x85f   : > { %v4864_v17 = vmul.f32 -1.442695, %v3544_v43  ;;  %v4865_v12 = vmul.f32 -1.442695, %v3545_v46 }
 0x861   : > { %5164 = vpow2.f32 %v4864_v17 }
 0x862   : > { %5166 = vpow2.f32 %v4865_v12 }
 0x863   : > { %v3541_v32 = vpop.f32.mrf.mxu3  ;;  %v3521_v9 = vpop.f32.mrf.mxu2 }
 0x864   : > { %v3547_v13 = vadd.f32 %v3541_v32, %v2702_v11  ;;  %v3546_v25 = vadd.f32 %v3521_v9, %v2661_v48 }
 0x866   : > { %v4866_v31 = vmul.f32 -1.442695, %v3547_v13 }
 0x867   : > { %v5165_v53 = vpop.eup %5164 }
 0x868   : > { %v5167_v33 = vpop.eup %5166  ;;  %v3551_v60 = vadd.f32 1.0, %v5165_v53  ;;  %5168 = vpow2.f32 %v4866_v31 }
 0x869   : > { %v3570_v7 = vadd.f32 1.0, %v5167_v33 }
 0x86a   : > { %5170 = vrcp.f32 %v3551_v60  ;;  %v3563_v17 = vand.u32 2147483648, %v3551_v60  ;;  %v3561_v11 = vand.u32 2147483647, %v3551_v60  ;;  %vm3557_vm7 = vweird.f32 %v3551_v60 }
 0x86b   : > { %5172 = vrcp.f32 %v3570_v7  ;;  %v3582_v12 = vand.u32 2147483648, %v3570_v7  ;;  %v3580_v13 = vand.u32 2147483647, %v3570_v7  ;;  %vm3576_vm8 = vweird.f32 %v3570_v7 }
 0x86c   : > { %v3564_v33 = vor.u32 1.1754944e-38, %v3563_v17  ;;  %vm3562_vm11 = vcmp.eq.f32.partialorder %v3561_v11, 8.507059e+37 }
 0x86d   : > { %v3583_v5 = vor.u32 1.1754944e-38, %v3582_v12  ;;  %vm3581_vm12 = vcmp.eq.f32.partialorder %v3580_v13, 8.507059e+37 }
 0x86e   : > { %v5169_v28 = vpop.eup %5168 }
 0x86f   : > { %v3590_v14 = vadd.f32 1.0, %v5169_v28 }
 0x870   : > { %v5171_v63 = vpop.eup %5170 }
 0x871   : > { %v5173_v40 = vpop.eup %5172  ;;  %v3553_v62 = vmul.f32 %v5171_v63, %v3551_v60  ;;  %5174 = vrcp.f32 %v3590_v14  ;;  %vm3558_vm5 = vweird.f32 %v5171_v63  ;;  %v3602_v17 = vand.u32 2147483648, %v3590_v14 }
 0x872   : > { %v3572_v35 = vmul.f32 %v5173_v40, %v3570_v7  ;;  %5176 = vtanh.f32 %v3546_v25  ;;  %vm3577_vm6 = vweird.f32 %v5173_v40  ;;  %vm3559_vm9 = vmor %vm3557_vm7, %vm3558_vm5  ;;  %vm3596_vm14 = vweird.f32 %v3590_v14 }
 0x873   : > { %v3554_v43 = vsub.f32 1.0, %v3553_v62  ;;  %vm3578_vm10 = vmor %vm3576_vm8, %vm3577_vm6  ;;  %v3603_v11 = vor.u32 1.1754944e-38, %v3602_v17 }
 0x874   : > { %v3573_v46 = vsub.f32 1.0, %v3572_v35 }
 0x875   : > { %v3555_v16 = vmul.f32 %v5171_v63, %v3554_v43 }
 0x876   : > { %v3574_v32 = vmul.f32 %v5173_v40, %v3573_v46 }
 0x877   : > { %v5175_v31 = vpop.eup %5174  ;;  %v3556_v53 = vadd.f32 %v5171_v63, %v3555_v16 }
 0x878   : > { %v3575_v9 = vadd.f32 %v5173_v40, %v3574_v32  ;;  %v3592_v28 = vmul.f32 %v5175_v31, %v3590_v14  ;;  %v5177_v25 = vpop.eup %5176  ;;  %vm3597_vm13 = vweird.f32 %v5175_v31 }
 0x879   : > { %v3560_v48 = vsel %vm3559_vm9, %v5171_v63, %v3556_v53  ;;  %v3600_v63 = vand.u32 2147483647, %v3590_v14  ;;  %vm3598_vm15 = vmor %vm3596_vm14, %vm3597_vm13  ;;  %v7707_v14 = vld [vmem:[#allocation10 + $0x1c0] sm:$0xff]  ;;  %v7711_v53 = vld [vmem:[#allocation10 + $0x1d8] sm:$0xff] }
 0x87a   : > { %v3565_v62 = vsel %vm3562_vm11, %v3564_v33, %v3560_v48  ;;  %v3579_v35 = vsel %vm3578_vm10, %v5173_v40, %v3575_v9  ;;  %v3593_v43 = vsub.f32 1.0, %v3592_v28  ;;  %v7716_v33 = vld [vmem:[#allocation10 + $0x1a0] sm:$0xff]  ;;  %v7718_v9 = vld [vmem:[#allocation10 + $0x1a8] sm:$0xff]  ;;  %v8630_v28 = vld [vmem:[#allocation37_spill] sm:$0xff] }
 0x87b   : > { %v3584_v46 = vsel %vm3581_vm12, %v3583_v5, %v3579_v35  ;;  %v3607_v21 = vmul.f32 %v5177_v25, %v3565_v62  ;;  %vm3601_vm0 = vcmp.eq.f32.partialorder %v3600_v63, 8.507059e+37  ;;  %v8631_v5 = vld [vmem:[#allocation60_spill] sm:$0xff]  ;;  %v8632_v48 = vld [vmem:[#allocation61_spill] sm:$0xff] }
 0x87c   : > { %v3606_v41 = vmul.f32 %v3584_v46, %v7623_v1  ;;  %v3594_v16 = vmul.f32 %v5175_v31, %v3593_v43  ;;  %v7700_v1 = vld [vmem:[#allocation10 + $0x1e8] sm:$0xff] }
 0x87d   : > { %3916 = vmatpush.msra.mxu1 %v7700_v1 }
 0x87e   : > { %v7689_v60 = vadd.f32 %v3607_v21, %v3606_v41  ;;  %v3595_v7 = vadd.f32 %v5175_v31, %v3594_v16  ;;  %v7698_v41 = vld [vmem:[#allocation10 + $0x1e0] sm:$0xff]  ;;  %v7702_v21 = vld [vmem:[#allocation10 + $0x1f8] sm:$0xff] }
 0x87f   : > { %3896 = vmatpush.msra.mxu0 %v7698_v41  ;;  %3956 = vmatpush.msra.mxu3 %v7702_v21 }
 0x880   : > { %5178 = vtanh.f32 %v7689_v60  ;;  %v3599_v12 = vsel %vm3598_vm15, %v5175_v31, %v3595_v7  ;;  %v7709_v31 = vld [vmem:[#allocation10 + $0x1c8] sm:$0xff] }
 0x881   : > { %v3604_v32 = vsel %vm3601_vm0, %v3603_v11, %v3599_v12  ;;  %3897 = vmatpush.msra.mxu0 %v7707_v14  ;;  %3917 = vmatpush.msra.mxu1 %v7709_v31 }
 0x882   : > { %3957 = vmatpush.msra.mxu3 %v7711_v53 }
 0x883   : > { %3898 = vmatpush.msra.mxu0 %v7716_v33  ;;  %3918 = vmatpush.msra.mxu1 %v7718_v9 }
 0x884   : > { %3958 = vmatpush.msra.mxu3 %v7392_v47  ;;  %v8633_v47 = vld [vmem:[#allocation27_spill] sm:$0xff] }
 0x885   : > { %3899 = vmatpush.msra.mxu0 %v7396_v42  ;;  %3919 = vmatpush.msra.mxu1 %v7398_v56  ;;  %v8634_v42 = vld [vmem:[#allocation31_spill] sm:$0xff]  ;;  %v8635_v56 = vld [vmem:[#allocation54_spill] sm:$0xff] }
 0x886   : > { %v5179_v40 = vpop.eup %5178  ;;  %3959 = vmatpush.msra.mxu3 %v7404_v2  ;;  %v2582_v2 = vadd.f32 %v8635_v56, %v8622_v52 }
 0x887   : > { %v7692_v13 = vmul.f32 %v5179_v40, %v3604_v32  ;;  %3900 = vmatpush.msra.mxu0 %v7408_v54  ;;  %3920 = vmatpush.msra.mxu1 %v7410_v57  ;;  %v8636_v54 = vld [vmem:[#allocation55_spill] sm:$0xff] }
 0x888   : > { %3960 = vmatpush.msra.mxu3 %v8630_v28  ;;  %v2623_v57 = vadd.f32 %v8636_v54, %v8624_v59 }
 0x889   : > { %8629 = vst [vmem:[#allocation34_spill] sm:$0xff] %v7692_v13  ;;  %3696 = vmatmul.f32.vlgmr.msrb.gmra.mxu0 %v7692_v13  ;;  %3716 = vmatmul.f32.vlgmr.msrb.gmra.mxu1 %v7692_v13 }
 0x88a   : > { %3736 = vmatmul.f32.vlgmr.msrb.gmra.mxu2 %v7692_v13  ;;  %3756 = vmatmul.f32.vlgmr.msrb.gmra.mxu3 %v7692_v13  ;;  %v7928_v13 = vld [vmem:[#allocation10 + $0x50] sm:$0xff] }
 0x88b   : > { %3901 = vmatpush.msra.mxu0 %v7420_v36  ;;  %3921 = vmatpush.msra.mxu1 %v8631_v5 }
 0x88c   : > { %3961 = vmatpush.msra.mxu3 %v7428_v49 }
 0x88d   : > { %3902 = vmatpush.msra.mxu0 %v8632_v48  ;;  %3922 = vmatpush.msra.mxu1 %v8633_v47 }
 0x88e   : > { %3962 = vmatpush.msra.mxu3 %v8634_v42 }
 0x88f   : > { %3903 = vmatpush.msra.mxu0 %v7444_v34  ;;  %3923 = vmatpush.msra.mxu1 %v7446_v3 }
 0x890   : > { %3963 = vmatpush.msra.mxu3 %v7452_v19 }
 0x891   : > { %3904 = vmatpush.msra.mxu0 %v7456_v18  ;;  %3924 = vmatpush.msra.mxu1 %v7458_v44  ;;  %v8637_v18 = vld [vmem:[#allocation28_spill] sm:$0xff] }
 0x892   : > { %3964 = vmatpush.msra.mxu3 %v7468_v30  ;;  %v2705_v44 = vadd.f32 %v8637_v18, %v8626_v20 }
 0x893   : > { %3905 = vmatpush.msra.mxu0 %v7472_v4  ;;  %3925 = vmatpush.msra.mxu1 %v7474_v15 }
 0x894   : > { %3965 = vmatpush.msra.mxu3 %v7480_v61 }
 0x895   : > { %3906 = vmatpush.msra.mxu0 %v7484_v55  ;;  %3926 = vmatpush.msra.mxu1 %v7486_v6 }
 0x896   : > { %3966 = vmatpush.msra.mxu3 %v7492_v51 }
 0x897   : > { %3907 = vmatpush.msra.mxu0 %v7496_v39  ;;  %3927 = vmatpush.msra.mxu1 %v7498_v38  ;;  %v8638_v39 = vld [vmem:[#allocation59_spill] sm:$0xff] }
 0x898   : > { %3967 = vmatpush.msra.mxu3 %v8613_v8  ;;  %v8639_v38 = vld [vmem:[#allocation47_spill] sm:$0xff] }
 0x899   : > { %3908 = vmatpush.msra.mxu0 %v8614_v45  ;;  %3928 = vmatpush.msra.mxu1 %v8615_v58 }
 0x89a   : > { %3968 = vmatpush.msra.mxu3 %v8617_v27 }
 0x89b   : > { %3909 = vmatpush.msra.mxu0 %v8618_v22  ;;  %3929 = vmatpush.msra.mxu1 %v8619_v23 }
 0x89c   : > { %3969 = vmatpush.msra.mxu3 %v7526_v10 }
 0x89d   : > { %3910 = vmatpush.msra.mxu0 %v7530_v29  ;;  %3930 = vmatpush.msra.mxu1 %v7532_v26 }
 0x89e   : > { %3970 = vmatpush.msra.mxu3 %v7538_v0  ;;  %v2664_v0 = vadd.f32 %v8639_v38, %v8638_v39  ;;  %v7820_v38 = vld [vmem:[#allocation10 + $0x178] sm:$0xff] }
 0x89f   : > { %3911 = vmatpush.msra.mxu0 %v7542_v37  ;;  %3931 = vmatpush.msra.mxu1 %v7544_v50 }
 0x8a0   : > { %3971 = vmatpush.msra.mxu3 %v7550_v24 }
 0x8a1   : > { %4112 = vmatpush.msrb.mxu0 %v7698_v41  ;;  %4132 = vmatpush.msrb.mxu1 %v7700_v1 }
 0x8a2   : > { %4172 = vmatpush.msrb.mxu3 %v7702_v21 }
 0x8a3   : > { %4113 = vmatpush.msrb.mxu0 %v7707_v14  ;;  %4133 = vmatpush.msrb.mxu1 %v7709_v31 }
 0x8a4   : > { %4173 = vmatpush.msrb.mxu3 %v7711_v53 }
 0x8a5   : > { %4114 = vmatpush.msrb.mxu0 %v7716_v33  ;;  %4134 = vmatpush.msrb.mxu1 %v7718_v9 }
 0x906   : > { %v3697_v36 = vpop.f32.mrf.mxu0  ;;  %v3717_v49 = vpop.f32.mrf.mxu1 }
 0x907   : > { %v3760_v25 = vadd.f32 %v3697_v36, %v2582_v2  ;;  %v3761_v34 = vadd.f32 %v3717_v49, %v2623_v57 }
 0x909   : > { %v4867_v3 = vmul.f32 -1.442695, %v3760_v25  ;;  %v4868_v19 = vmul.f32 -1.442695, %v3761_v34 }
 0x90b   : > { %5180 = vpow2.f32 %v4867_v3 }
 0x90c   : > { %5182 = vpow2.f32 %v4868_v19 }
 0x90d   : > { %v3757_v30 = vpop.f32.mrf.mxu3  ;;  %v3737_v29 = vpop.f32.mrf.mxu2 }
 0x90e   : > { %v3763_v4 = vadd.f32 %v3757_v30, %v2705_v44  ;;  %v3762_v37 = vadd.f32 %v3737_v29, %v2664_v0  ;;  %v7791_v44 = vld [vmem:[#allocation10 + $0x1d0] sm:$0xff]  ;;  %v7814_v29 = vld [vmem:[#allocation10 + $0x168] sm:$0xff]  ;;  %v7824_v0 = vld [vmem:[#allocation10 + $0x140] sm:$0xff] }
 0x90f   : > { %v7794_v30 = vld [vmem:[#allocation10 + $0x1b0] sm:$0xff] }
 0x910   : > { %v4869_v15 = vmul.f32 -1.442695, %v3763_v4  ;;  %v7796_v4 = vld [vmem:[#allocation10 + $0x1b8] sm:$0xff] }
 0x911   : > { %v5181_v61 = vpop.eup %5180  ;;  %4174 = vmatpush.msrb.mxu3 %v7796_v4 }
 0x912   : > { %v5183_v55 = vpop.eup %5182  ;;  %v3767_v6 = vadd.f32 1.0, %v5181_v61  ;;  %5184 = vpow2.f32 %v4869_v15  ;;  %v7800_v15 = vld [vmem:[#allocation10 + $0x180] sm:$0xff]  ;;  %v7802_v61 = vld [vmem:[#allocation10 + $0x188] sm:$0xff] }
 0x913   : > { %v3786_v51 = vadd.f32 1.0, %v5183_v55  ;;  %v7804_v55 = vld [vmem:[#allocation10 + $0x190] sm:$0xff]  ;;  %4115 = vmatpush.msrb.mxu0 %v7800_v15  ;;  %4135 = vmatpush.msrb.mxu1 %v7802_v61 }
 0x914   : > { %5186 = vrcp.f32 %v3767_v6  ;;  %v3779_v22 = vand.u32 2147483648, %v3767_v6  ;;  %v3777_v35 = vand.u32 2147483647, %v3767_v6  ;;  %vm3773_vm3 = vweird.f32 %v3767_v6 }
 0x915   : > { %5188 = vrcp.f32 %v3786_v51  ;;  %v3798_v23 = vand.u32 2147483648, %v3786_v51  ;;  %v3796_v46 = vand.u32 2147483647, %v3786_v51  ;;  %vm3792_vm4 = vweird.f32 %v3786_v51  ;;  %4136 = vmatpush.msrb.mxu1 %v7814_v29 }
 0x916   : > { %v3780_v17 = vor.u32 1.1754944e-38, %v3779_v22  ;;  %vm3778_vm7 = vcmp.eq.f32.partialorder %v3777_v35, 8.507059e+37  ;;  %v7850_v22 = vld [vmem:[#allocation10 + $0x108] sm:$0xff]  ;;  %v7860_v35 = vld [vmem:[#allocation10 + $0xe0] sm:$0xff] }
 0x917   : > { %v3799_v11 = vor.u32 1.1754944e-38, %v3798_v23  ;;  %vm3797_vm8 = vcmp.eq.f32.partialorder %v3796_v46, 8.507059e+37  ;;  %v7852_v23 = vld [vmem:[#allocation10 + $0x110] sm:$0xff] }
 0x918   : > { %v5185_v26 = vpop.eup %5184  ;;  %v7864_v46 = vld [vmem:[#allocation10 + $0xf0] sm:$0xff] }
 0x919   : > { %v3806_v24 = vadd.f32 1.0, %v5185_v26  ;;  %v7816_v26 = vld [vmem:[#allocation10 + $0x170] sm:$0xff] }
 0x91a   : > { %v5187_v10 = vpop.eup %5186 }
 0x91b   : > { %v5189_v50 = vpop.eup %5188  ;;  %v3769_v8 = vmul.f32 %v5187_v10, %v3767_v6  ;;  %5190 = vrcp.f32 %v3806_v24  ;;  %vm3774_vm1 = vweird.f32 %v5187_v10  ;;  %v3818_v36 = vand.u32 2147483648, %v3806_v24  ;;  %v7808_v6 = vld [vmem:[#allocation10 + $0x198] sm:$0xff] }
 0x91c   : > { %v3788_v45 = vmul.f32 %v5189_v50, %v3786_v51  ;;  %5192 = vtanh.f32 %v3762_v37  ;;  %vm3793_vm2 = vweird.f32 %v5189_v50  ;;  %vm3775_vm5 = vmor %vm3773_vm3, %vm3774_vm1  ;;  %vm3812_vm10 = vweird.f32 %v3806_v24  ;;  %4175 = vmatpush.msrb.mxu3 %v7808_v6  ;;  %v7812_v51 = vld [vmem:[#allocation10 + $0x160] sm:$0xff]  ;;  %v7832_v37 = vld [vmem:[#allocation10 + $0x158] sm:$0xff] }
 0x91d   : > { %v3770_v58 = vsub.f32 1.0, %v3769_v8  ;;  %vm3794_vm6 = vmor %vm3792_vm4, %vm3793_vm2  ;;  %v3816_v49 = vand.u32 2147483647, %v3806_v24  ;;  %v3819_v34 = vor.u32 1.1754944e-38, %v3818_v36  ;;  %4116 = vmatpush.msrb.mxu0 %v7812_v51  ;;  %v7838_v8 = vld [vmem:[#allocation10 + $0x128] sm:$0xff] }
 0x91e   : > { %v3789_v27 = vsub.f32 1.0, %v3788_v45  ;;  %4176 = vmatpush.msrb.mxu3 %v7820_v38  ;;  %v7840_v45 = vld [vmem:[#allocation10 + $0x130] sm:$0xff] }
 0x91f   : > { %v3771_v62 = vmul.f32 %v5187_v10, %v3770_v58  ;;  %vm3817_vm12 = vcmp.eq.f32.partialorder %v3816_v49, 8.507059e+37  ;;  %4117 = vmatpush.msrb.mxu0 %v7824_v0  ;;  %v7844_v58 = vld [vmem:[#allocation10 + $0x138] sm:$0xff] }
 0x920   : > { %v3790_v43 = vmul.f32 %v5189_v50, %v3789_v27  ;;  %4177 = vmatpush.msrb.mxu3 %v7832_v37  ;;  %v7848_v27 = vld [vmem:[#allocation10 + $0x100] sm:$0xff] }
 0x921   : > { %v5191_v16 = vpop.eup %5190  ;;  %v3772_v7 = vadd.f32 %v5187_v10, %v3771_v62  ;;  %v7856_v62 = vld [vmem:[#allocation10 + $0x118] sm:$0xff] }
 0x922   : > { %v3791_v63 = vadd.f32 %v5189_v50, %v3790_v43  ;;  %v3808_v12 = vmul.f32 %v5191_v16, %v3806_v24  ;;  %v5193_v32 = vpop.eup %5192  ;;  %vm3813_vm9 = vweird.f32 %v5191_v16  ;;  %v7826_v24 = vld [vmem:[#allocation10 + $0x148] sm:$0xff]  ;;  %4178 = vmatpush.msrb.mxu3 %v7844_v58 }
 0x923   : > { %v3776_v40 = vsel %vm3775_vm5, %v5187_v10, %v3772_v7  ;;  %vm3814_vm11 = vmor %vm3812_vm10, %vm3813_vm9  ;;  %v7828_v10 = vld [vmem:[#allocation10 + $0x150] sm:$0xff]  ;;  %4137 = vmatpush.msrb.mxu1 %v7826_v24  ;;  %v7862_v43 = vld [vmem:[#allocation10 + $0xe8] sm:$0xff] }
 0x924   : > { %v3781_v28 = vsel %vm3778_vm7, %v3780_v17, %v3776_v40  ;;  %v3795_v5 = vsel %vm3794_vm6, %v5189_v50, %v3791_v63  ;;  %v3809_v48 = vsub.f32 1.0, %v3808_v12  ;;  %v7836_v50 = vld [vmem:[#allocation10 + $0x120] sm:$0xff]  ;;  %4179 = vmatpush.msrb.mxu3 %v7856_v62  ;;  %v7872_v12 = vld [vmem:[#allocation10 + $0xf8] sm:$0xff] }
 0x925   : > { %v3800_v47 = vsel %vm3797_vm8, %v3799_v11, %v3795_v5  ;;  %v3823_v42 = vmul.f32 %v5193_v32, %v3781_v28  ;;  %4118 = vmatpush.msrb.mxu0 %v7836_v50  ;;  %4138 = vmatpush.msrb.mxu1 %v7838_v8  ;;  %v8642_v17 = vld [vmem:[#allocation38_spill] sm:$0xff]  ;;  %v7878_v28 = vld [vmem:[#allocation10 + $0xc8] sm:$0xff]  ;;  %v7880_v5 = vld [vmem:[#allocation10 + $0xd0] sm:$0xff] }
 0x926   : > { %v3822_v56 = vmul.f32 %v3800_v47, %v7689_v60  ;;  %v3810_v2 = vmul.f32 %v5191_v16, %v3809_v48  ;;  %v7788_v60 = vld [vmem:[#allocation10 + $0x1f0] sm:$0xff]  ;;  %v2626_v63 = vadd.f32 %v8642_v17, %v8624_v59  ;;  %4180 = vmatpush.msrb.mxu3 %v7872_v12  ;;  %v7876_v32 = vld [vmem:[#allocation10 + $0xc0] sm:$0xff]  ;;  %v7912_v17 = vld [vmem:[#allocation10 + $0x68] sm:$0xff] }
 0x927   : > { %4152 = vmatpush.msrb.mxu2 %v7788_v60  ;;  %4119 = vmatpush.msrb.mxu0 %v7848_v27  ;;  %8645 = vst [vmem:[#allocation30_spill] sm:$0xff] %v7912_v17  ;;  %v7936_v59 = vld [vmem:[#allocation10 + $0x28] sm:$0xff] }
 0x928   : > { %v7779_v54 = vadd.f32 %v3823_v42, %v3822_v56  ;;  %v3811_v57 = vadd.f32 %v5191_v16, %v3810_v2  ;;  %4139 = vmatpush.msrb.mxu1 %v7850_v22  ;;  %v7884_v42 = vld [vmem:[#allocation10 + $0xd8] sm:$0xff]  ;;  %v7888_v56 = vld [vmem:[#allocation10 + $0xa0] sm:$0xff]  ;;  %v7890_v2 = vld [vmem:[#allocation10 + $0xa8] sm:$0xff] }
 0x929   : > { %4153 = vmatpush.msrb.mxu2 %v7791_v44  ;;  %4120 = vmatpush.msrb.mxu0 %v7860_v35 }
 0x92a   : > { %5194 = vtanh.f32 %v7779_v54  ;;  %v3815_v25 = vsel %vm3814_vm11, %v5191_v16, %v3811_v57  ;;  %v8641_v16 = vld [vmem:[#allocation43_spill] sm:$0xff]  ;;  %4140 = vmatpush.msrb.mxu1 %v7862_v43  ;;  %4181 = vmatpush.msrb.mxu3 %v7884_v42  ;;  %v7892_v57 = vld [vmem:[#allocation10 + $0xb0] sm:$0xff] }
 0x92b   : > { %v3820_v19 = vsel %vm3817_vm12, %v3819_v34, %v3815_v25  ;;  %4154 = vmatpush.msrb.mxu2 %v7794_v30  ;;  %v2585_v7 = vadd.f32 %v8641_v16, %v8622_v52  ;;  %4121 = vmatpush.msrb.mxu0 %v7876_v32  ;;  %v7896_v25 = vld [vmem:[#allocation10 + $0xb8] sm:$0xff]  ;;  %v7900_v34 = vld [vmem:[#allocation10 + $0x80] sm:$0xff]  ;;  %v7940_v52 = vld [vmem:[#allocation10 + $0x30] sm:$0xff] }
 0x92c   : > { %4141 = vmatpush.msrb.mxu1 %v7878_v28  ;;  %4182 = vmatpush.msrb.mxu3 %v7896_v25  ;;  %v7908_v16 = vld [vmem:[#allocation10 + $0x98] sm:$0xff] }
 0x92d   : > { %4155 = vmatpush.msrb.mxu2 %v7804_v55  ;;  %4122 = vmatpush.msrb.mxu0 %v7888_v56  ;;  %8643 = vst [vmem:[#allocation68_spill] sm:$0xff] %v7908_v16 }
 0x92e   : > { %4142 = vmatpush.msrb.mxu1 %v7890_v2  ;;  %4183 = vmatpush.msrb.mxu3 %v7908_v16 }
 0x92f   : > { %4156 = vmatpush.msrb.mxu2 %v7816_v26  ;;  %4123 = vmatpush.msrb.mxu0 %v7900_v34 }
 0x930   : > { %v5195_v3 = vpop.eup %5194 }
 0x931   : > { %v7782_v18 = vmul.f32 %v5195_v3, %v3820_v19  ;;  %4157 = vmatpush.msrb.mxu2 %v7828_v10  ;;  %v7902_v3 = vld [vmem:[#allocation10 + $0x88] sm:$0xff]  ;;  %v7904_v19 = vld [vmem:[#allocation10 + $0x90] sm:$0xff] }
 0x932   : > { %4143 = vmatpush.msrb.mxu1 %v7902_v3 }
 0x933   : > { %8640 = vst [vmem:[#allocation66_spill] sm:$0xff] %v7782_v18  ;;  %3912 = vmatmul.f32.vlgmr.msra.gmra.mxu0 %v7782_v18  ;;  %3932 = vmatmul.f32.vlgmr.msra.gmra.mxu1 %v7782_v18 }
 0x934   : > { %3952 = vmatmul.f32.vlgmr.msra.gmra.mxu2 %v7782_v18  ;;  %3972 = vmatmul.f32.vlgmr.msra.gmra.mxu3 %v7782_v18  ;;  %v7926_v18 = vld [vmem:[#allocation10 + $0x48] sm:$0xff] }
 0x935   : > { %4158 = vmatpush.msrb.mxu2 %v7840_v45  ;;  %4144 = vmatpush.msrb.mxu1 %v7912_v17  ;;  %8650 = vst [vmem:[#allocation40_spill] sm:$0xff] %v7926_v18  ;;  %v7942_v17 = vld [vmem:[#allocation10 + $0x38] sm:$0xff] }
 0x937   : > { %4159 = vmatpush.msrb.mxu2 %v7852_v23  ;;  %4145 = vmatpush.msrb.mxu1 %v7926_v18  ;;  %v7954_v18 = vld [vmem:[#allocation10 + $0x18] sm:$0xff] }
 0x939   : > { %4160 = vmatpush.msrb.mxu2 %v7864_v46  ;;  %4146 = vmatpush.msrb.mxu1 %v7936_v59 }
 0x93b   : > { %4161 = vmatpush.msrb.mxu2 %v7880_v5 }
 0x93d   : > { %4162 = vmatpush.msrb.mxu2 %v7892_v57 }
 0x93f   : > { %4163 = vmatpush.msrb.mxu2 %v7904_v19 }
 0x9b0   : > { %v3913_v11 = vpop.f32.mrf.mxu0  ;;  %v3933_v40 = vpop.f32.mrf.mxu1 }
 0x9b1   : > { %v3976_v48 = vadd.f32 %v3913_v11, %v2585_v7  ;;  %v3977_v47 = vadd.f32 %v3933_v40, %v2626_v63  ;;  %v7910_v7 = vld [vmem:[#allocation10 + $0x60] sm:$0xff]  ;;  %v8646_v63 = vld [vmem:[#allocation45_spill] sm:$0xff]  ;;  %v7918_v40 = vld [vmem:[#allocation10 + $0x70] sm:$0xff] }
 0x9b2   : > { %8644 = vst [vmem:[#allocation48_spill] sm:$0xff] %v7910_v7  ;;  %v2708_v11 = vadd.f32 %v8646_v63, %v8626_v20  ;;  %4124 = vmatpush.msrb.mxu0 %v7910_v7  ;;  %4164 = vmatpush.msrb.mxu2 %v7918_v40  ;;  %v7934_v20 = vld [vmem:[#allocation10 + $0x20] sm:$0xff] }
 0x9b3   : > { %v4870_v36 = vmul.f32 -1.442695, %v3976_v48  ;;  %v4871_v49 = vmul.f32 -1.442695, %v3977_v47  ;;  %8647 = vst [vmem:[#allocation26_spill] sm:$0xff] %v7918_v40  ;;  %v7920_v48 = vld [vmem:[#allocation10 + $0x78] sm:$0xff] }
 0x9b4   : > { %8648 = vst [vmem:[#allocation32_spill] sm:$0xff] %v7920_v48  ;;  %v7922_v47 = vld [vmem:[#allocation10 + $0x40] sm:$0xff]  ;;  %4184 = vmatpush.msrb.mxu3 %v7920_v48  ;;  %4165 = vmatpush.msrb.mxu2 %v7928_v13 }
 0x9b5   : > { %5196 = vpow2.f32 %v4870_v36  ;;  %8649 = vst [vmem:[#allocation33_spill] sm:$0xff] %v7922_v47  ;;  %4125 = vmatpush.msrb.mxu0 %v7922_v47  ;;  %v7952_v47 = vld [vmem:[#allocation10 + $0x10] sm:$0xff] }
 0x9b6   : > { %5198 = vpow2.f32 %v4871_v49  ;;  %v7930_v49 = vld [vmem:[#allocation10 + $0x58] sm:$0xff]  ;;  %8651 = vst [vmem:[#allocation35_spill] sm:$0xff] %v7952_v47  ;;  %4166 = vmatpush.msrb.mxu2 %v7940_v52 }
 0x9b7   : > { %v3973_v36 = vpop.f32.mrf.mxu3  ;;  %4185 = vmatpush.msrb.mxu3 %v7930_v49  ;;  %4126 = vmatpush.msrb.mxu0 %v7934_v20 }
 0x9b8   : > { %v3979_v63 = vadd.f32 %v3973_v36, %v2708_v11  ;;  %v7946_v11 = vld [vmem:[#allocation10] sm:$0xff]  ;;  %v7948_v36 = vld [vmem:[#allocation10 + $0x8] sm:$0xff]  ;;  %4167 = vmatpush.msrb.mxu2 %v7952_v47 }
 0x9b9   : > { %4186 = vmatpush.msrb.mxu3 %v7942_v17  ;;  %4127 = vmatpush.msrb.mxu0 %v7946_v11 }
 0x9ba   : > { %v4872_v7 = vmul.f32 -1.442695, %v3979_v63  ;;  %4147 = vmatpush.msrb.mxu1 %v7948_v36  ;;  %4368 = vmatpush.msra.mxu2 %v7788_v60 }
 0x9bb   : > { %v5197_v48 = vpop.eup %5196  ;;  %4187 = vmatpush.msrb.mxu3 %v7954_v18  ;;  %4328 = vmatpush.msra.mxu0 %v7698_v41 }
 0x9bc   : > { %v5199_v40 = vpop.eup %5198  ;;  %v7956_v16 = vadd.f32 1.0, %v5197_v48  ;;  %5200 = vpow2.f32 %v4872_v7  ;;  %4348 = vmatpush.msra.mxu1 %v7700_v1  ;;  %v3953_v7 = vpop.f32.mrf.mxu2  ;;  %v8652_v48 = vld [vmem:[#allocation52_spill] sm:$0xff]  ;;  %4369 = vmatpush.msra.mxu2 %v7791_v44 }
 0x9bd   : > { %v7960_v63 = vadd.f32 1.0, %v5199_v40  ;;  %4388 = vmatpush.msra.mxu3 %v7702_v21  ;;  %4329 = vmatpush.msra.mxu0 %v7707_v14  ;;  %v2667_v47 = vadd.f32 %v8652_v48, %v8638_v39  ;;  %v4493_v48 = vld [vmem:[%s8253_s7 + $0x48] sm:$0xff] }
 0x9be   : > { %5202 = vrcp.f32 %v7956_v16  ;;  %4349 = vmatpush.msra.mxu1 %v7709_v31  ;;  %4370 = vmatpush.msra.mxu2 %v7794_v30  ;;  %v3995_v60 = vand.u32 2147483648, %v7956_v16  ;;  %vm3989_vm15 = vweird.f32 %v7956_v16 }
 0x9bf   : > { %5204 = vrcp.f32 %v7960_v63  ;;  %4389 = vmatpush.msra.mxu3 %v7711_v53  ;;  %4330 = vmatpush.msra.mxu0 %v7716_v33  ;;  %v3978_v21 = vadd.f32 %v3953_v7, %v2667_v47  ;;  %v4014_v44 = vand.u32 2147483648, %v7960_v63  ;;  %vm4008_vm0 = vweird.f32 %v7960_v63  ;;  %v8664_v47 = vld [vmem:[#allocation49_spill] sm:$0xff] }
 0x9c0   : > { %4350 = vmatpush.msra.mxu1 %v7718_v9  ;;  %4371 = vmatpush.msra.mxu2 %v7804_v55 }
 0x9c1   : > { %4390 = vmatpush.msra.mxu3 %v7796_v4  ;;  %4331 = vmatpush.msra.mxu0 %v7800_v15  ;;  %v3993_v4 = vand.u32 2147483647, %v7956_v16 }
 0x9c2   : > { %v5201_v40 = vpop.eup %5200  ;;  %4351 = vmatpush.msra.mxu1 %v7802_v61  ;;  %4372 = vmatpush.msra.mxu2 %v7816_v26  ;;  %v4012_v61 = vand.u32 2147483647, %v7960_v63 }
 0x9c3   : > { %v7978_v41 = vadd.f32 1.0, %v5201_v40  ;;  %4391 = vmatpush.msra.mxu3 %v7808_v6  ;;  %4332 = vmatpush.msra.mxu0 %v7812_v51  ;;  %v3996_v51 = vor.u32 1.1754944e-38, %v3995_v60  ;;  %vm3994_vm3 = vcmp.eq.f32.partialorder %v3993_v4, 8.507059e+37 }
 0x9c4   : > { %v5203_v1 = vpop.eup %5202  ;;  %4352 = vmatpush.msra.mxu1 %v7814_v29  ;;  %4373 = vmatpush.msra.mxu2 %v7828_v10  ;;  %vm4013_vm4 = vcmp.eq.f32.partialorder %v4012_v61, 8.507059e+37 }
 0x9c5   : > { %v5205_v14 = vpop.eup %5204  ;;  %v3985_v31 = vmul.f32 %v5203_v1, %v7956_v16  ;;  %5206 = vrcp.f32 %v7978_v41  ;;  %4392 = vmatpush.msra.mxu3 %v7820_v38  ;;  %vm3990_vm13 = vweird.f32 %v5203_v1  ;;  %4333 = vmatpush.msra.mxu0 %v7824_v0  ;;  %v4015_v38 = vor.u32 1.1754944e-38, %v4014_v44 }
 0x9c6   : > { %v4004_v53 = vmul.f32 %v5205_v14, %v7960_v63  ;;  %5208 = vtanh.f32 %v3978_v21  ;;  %4353 = vmatpush.msra.mxu1 %v7826_v24  ;;  %vm4009_vm14 = vweird.f32 %v5205_v14  ;;  %vm3991_vm1 = vmor %vm3989_vm15, %vm3990_vm13  ;;  %4374 = vmatpush.msra.mxu2 %v7840_v45  ;;  %vm4028_vm6 = vweird.f32 %v7978_v41  ;;  %v4494_v63 = vld [vmem:[%s8253_s7 + $0x50] sm:$0xff]  ;;  %v4492_v21 = vld [vmem:[%s8253_s7 + $0x40] sm:$0xff] }
 0x9c7   : > { %v3986_v33 = vsub.f32 1.0, %v3985_v31  ;;  %4393 = vmatpush.msra.mxu3 %v7832_v37  ;;  %4334 = vmatpush.msra.mxu0 %v7836_v50  ;;  %vm4010_vm2 = vmor %vm4008_vm0, %vm4009_vm14  ;;  %v8665_v31 = vld [vmem:[#allocation56_spill] sm:$0xff] }
 0x9c8   : > { %v4005_v9 = vsub.f32 1.0, %v4004_v53  ;;  %4354 = vmatpush.msra.mxu1 %v7838_v8  ;;  %4375 = vmatpush.msra.mxu2 %v7852_v23  ;;  %v4034_v23 = vand.u32 2147483648, %v7978_v41  ;;  %v8666_v53 = vld [vmem:[#allocation62_spill] sm:$0xff] }
 0x9c9   : > { %v3987_v30 = vmul.f32 %v5203_v1, %v3986_v33  ;;  %4394 = vmatpush.msra.mxu3 %v7844_v58  ;;  %4335 = vmatpush.msra.mxu0 %v7848_v27  ;;  %v2711_v33 = vadd.f32 %v8666_v53, %v8665_v31  ;;  %v8669_v53 = vld [vmem:[#allocation58_spill] sm:$0xff] }
 0x9ca   : > { %v4006_v15 = vmul.f32 %v5205_v14, %v4005_v9  ;;  %4355 = vmatpush.msra.mxu1 %v7850_v22  ;;  %4376 = vmatpush.msra.mxu2 %v7864_v46  ;;  %v8654_v46 = vld [vmem:[#allocation48_spill] sm:$0xff] }
 0x9cb   : > { %v8003_v55 = vpop.eup %5206  ;;  %v3988_v6 = vadd.f32 %v5203_v1, %v3987_v30  ;;  %4395 = vmatpush.msra.mxu3 %v7856_v62  ;;  %4336 = vmatpush.msra.mxu0 %v7860_v35  ;;  %v4032_v62 = vand.u32 2147483647, %v7978_v41  ;;  %v8653_v35 = vld [vmem:[#allocation68_spill] sm:$0xff]  ;;  %v4489_v30 = vld [vmem:[%s8253_s7 + $0x28] sm:$0xff] }
 0x9cc   : > { %v4007_v29 = vadd.f32 %v5205_v14, %v4006_v15  ;;  %v4024_v26 = vmul.f32 %v8003_v55, %v7978_v41  ;;  %v5209_v24 = vpop.eup %5208  ;;  %4356 = vmatpush.msra.mxu1 %v7862_v43  ;;  %4377 = vmatpush.msra.mxu2 %v7880_v5  ;;  %vm4029_vm5 = vweird.f32 %v8003_v55  ;;  %v8657_v5 = vld [vmem:[#allocation32_spill] sm:$0xff]  ;;  %v4488_v15 = vld [vmem:[%s8253_s7 + $0x20] sm:$0xff] }
 0x9cd   : > { %v3992_v0 = vsel %vm3991_vm1, %v5203_v1, %v3988_v6  ;;  %4396 = vmatpush.msra.mxu3 %v7872_v12  ;;  %4337 = vmatpush.msra.mxu0 %v7876_v32  ;;  %vm4030_vm7 = vmor %vm4028_vm6, %vm4029_vm5  ;;  %v8655_v12 = vld [vmem:[#allocation30_spill] sm:$0xff]  ;;  %v4035_v32 = vor.u32 1.1754944e-38, %v4034_v23  ;;  %vm4033_vm8 = vcmp.eq.f32.partialorder %v4032_v62, 8.507059e+37  ;;  %v4490_v9 = vld [vmem:[%s8253_s7 + $0x30] sm:$0xff] }
 0x9ce   : > { %v3997_v10 = vsel %vm3994_vm3, %v3996_v51, %v3992_v0  ;;  %v4011_v37 = vsel %vm4010_vm2, %v5205_v14, %v4007_v29  ;;  %v4025_v50 = vsub.f32 1.0, %v4024_v26  ;;  %4357 = vmatpush.msra.mxu1 %v7878_v28  ;;  %4378 = vmatpush.msra.mxu2 %v7892_v57  ;;  %v8656_v28 = vld [vmem:[#allocation26_spill] sm:$0xff]  ;;  %v4491_v14 = vld [vmem:[%s8253_s7 + $0x38] sm:$0xff]  ;;  %v4486_v26 = vld [vmem:[%s8253_s7 + $0x10] sm:$0xff] }
 0x9cf   : > { %v4016_v8 = vsel %vm4013_vm4, %v4015_v38, %v4011_v37  ;;  %v4039_v45 = vmul.f32 %v5209_v24, %v3997_v10  ;;  %4397 = vmatpush.msra.mxu3 %v7884_v42  ;;  %4338 = vmatpush.msra.mxu0 %v7888_v56  ;;  %v8658_v42 = vld [vmem:[#allocation33_spill] sm:$0xff]  ;;  %v8659_v56 = vld [vmem:[#allocation40_spill] sm:$0xff]  ;;  %v4485_v38 = vld [vmem:[%s8253_s7 + $0x8] sm:$0xff] }
 0x9d0   : > { %v4038_v58 = vmul.f32 %v4016_v8, %v7779_v54  ;;  %v4026_v27 = vmul.f32 %v8003_v55, %v4025_v50  ;;  %4358 = vmatpush.msra.mxu1 %v7890_v2  ;;  %4379 = vmatpush.msra.mxu2 %v7904_v19  ;;  %v8662_v19 = vld [vmem:[#allocation36_spill] sm:$0xff]  ;;  %v4487_v29 = vld [vmem:[%s8253_s7 + $0x18] sm:$0xff]  ;;  %v8667_v10 = vld [vmem:[#allocation46_spill] sm:$0xff] }
 0x9d1   : > { %4398 = vmatpush.msra.mxu3 %v7896_v25  ;;  %4339 = vmatpush.msra.mxu0 %v7900_v34  ;;  %v4496_v34 = vld [vmem:[%s8253_s7 + $0x60] sm:$0xff]  ;;  %v2670_v37 = vadd.f32 %v8667_v10, %v8638_v39 }
 0x9d2   : > { %v8027_v22 = vadd.f32 %v4039_v45, %v4038_v58  ;;  %v4027_v54 = vadd.f32 %v8003_v55, %v4026_v27  ;;  %4359 = vmatpush.msra.mxu1 %v7902_v3  ;;  %4380 = vmatpush.msra.mxu2 %v8656_v28  ;;  %v8661_v3 = vld [vmem:[#allocation29_spill] sm:$0xff]  ;;  %v4484_v50 = vld [vmem:[%s8253_s7] sm:$0xff] }
 0x9d3   : > { %4399 = vmatpush.msra.mxu3 %v8653_v35  ;;  %4340 = vmatpush.msra.mxu0 %v8654_v46  ;;  %v2588_v16 = vadd.f32 %v8662_v19, %v8661_v3 }
 0x9d4   : > { %5210 = vtanh.f32 %v8027_v22  ;;  %v4031_v43 = vsel %vm4030_vm7, %v8003_v55, %v4027_v54  ;;  %4360 = vmatpush.msra.mxu1 %v8655_v12  ;;  %4381 = vmatpush.msra.mxu2 %v7928_v13  ;;  %v8660_v13 = vld [vmem:[#allocation35_spill] sm:$0xff] }
 0x9d5   : > { %4400 = vmatpush.msra.mxu3 %v8657_v5  ;;  %4341 = vmatpush.msra.mxu0 %v8658_v42  ;;  %v4036_v57 = vsel %vm4033_vm8, %v4035_v32, %v4031_v43 }
 0x9d6   : > { %4361 = vmatpush.msra.mxu1 %v8659_v56  ;;  %4382 = vmatpush.msra.mxu2 %v7940_v52  ;;  %v4499_v52 = vld [vmem:[%s8253_s7 + $0x78] sm:$0xff] }
 0x9d7   : > { %4401 = vmatpush.msra.mxu3 %v7930_v49  ;;  %4342 = vmatpush.msra.mxu0 %v7934_v20  ;;  %v4497_v20 = vld [vmem:[%s8253_s7 + $0x68] sm:$0xff] }
 0x9d8   : > { %4362 = vmatpush.msra.mxu1 %v7936_v59  ;;  %4383 = vmatpush.msra.mxu2 %v8660_v13  ;;  %v4498_v59 = vld [vmem:[%s8253_s7 + $0x70] sm:$0xff] }
 0x9d9   : > { %4402 = vmatpush.msra.mxu3 %v7942_v17  ;;  %4343 = vmatpush.msra.mxu0 %v7946_v11  ;;  %v8663_v17 = vld [vmem:[#allocation41_spill] sm:$0xff] }
 0x9da   : > { %v5211_v2 = vpop.eup %5210  ;;  %4363 = vmatpush.msra.mxu1 %v7948_v36  ;;  %v2629_v49 = vadd.f32 %v8664_v47, %v8663_v17 }
 0x9db   : > { %v8054_v25 = vmul.f32 %v5211_v2, %v4036_v57  ;;  %4403 = vmatpush.msra.mxu3 %v7954_v18  ;;  %v4495_v18 = vld [vmem:[%s8253_s7 + $0x58] sm:$0xff] }
 0x9dd   : > { %4128 = vmatmul.f32.vlgmr.msrb.gmra.mxu0 %v8054_v25  ;;  %4148 = vmatmul.f32.vlgmr.msrb.gmra.mxu1 %v8054_v25 }
 0x9de   : > { %4168 = vmatmul.f32.vlgmr.msrb.gmra.mxu2 %v8054_v25  ;;  %4188 = vmatmul.f32.vlgmr.msrb.gmra.mxu3 %v8054_v25 }
 0x9df   : > { %4504 = vmatpush.msrb.mxu0 %v4499_v52 }
 0x9e1   : > { %4505 = vmatpush.msrb.mxu0 %v4498_v59 }
 0x9e3   : > { %4506 = vmatpush.msrb.mxu0 %v4497_v20 }
 0x9e5   : > { %4507 = vmatpush.msrb.mxu0 %v4496_v34 }
 0x9e7   : > { %4508 = vmatpush.msrb.mxu0 %v4495_v18 }
 0x9e9   : > { %4509 = vmatpush.msrb.mxu0 %v4494_v63 }
 0x9eb   : > { %4510 = vmatpush.msrb.mxu0 %v4493_v48 }
 0x9ed   : > { %4511 = vmatpush.msrb.mxu0 %v4492_v21 }
 0x9ef   : > { %4512 = vmatpush.msrb.mxu0 %v4491_v14 }
 0x9f1   : > { %4513 = vmatpush.msrb.mxu0 %v4490_v9  ;;  %v8671_v9 = vld [vmem:[#allocation34_spill] sm:$0xff] }
 0x9f3   : > { %4514 = vmatpush.msrb.mxu0 %v4489_v30 }
 0x9f5   : > { %4515 = vmatpush.msrb.mxu0 %v4488_v15 }
 0x9f7   : > { %4516 = vmatpush.msrb.mxu0 %v4487_v29 }
 0x9f9   : > { %4517 = vmatpush.msrb.mxu0 %v4486_v26 }
 0x9fb   : > { %4518 = vmatpush.msrb.mxu0 %v4485_v38 }
 0x9fd   : > { %4519 = vmatpush.msrb.mxu0 %v4484_v50 }
 0xa5a   : > { %v4129_v11 = vpop.f32.mrf.mxu0  ;;  %v4149_v36 = vpop.f32.mrf.mxu1 }
 0xa5b   : > { %v4192_v7 = vadd.f32 %v4129_v11, %v2588_v16  ;;  %v4193_v40 = vadd.f32 %v4149_v36, %v2629_v49 }
 0xa5d   : > { %v4873_v41 = vmul.f32 -1.442695, %v4192_v7  ;;  %v4874_v1 = vmul.f32 -1.442695, %v4193_v40 }
 0xa5f   : > { %5212 = vpow2.f32 %v4873_v41 }
 0xa60   : > { %5214 = vpow2.f32 %v4874_v1 }
 0xa61   : > { %v4189_v60 = vpop.f32.mrf.mxu3  ;;  %v4169_v0 = vpop.f32.mrf.mxu2 }
 0xa62   : > { %v4195_v44 = vadd.f32 %v4189_v60, %v2711_v33  ;;  %v4194_v58 = vadd.f32 %v4169_v0, %v2670_v37  ;;  %v8670_v33 = vld [vmem:[#allocation44_spill] sm:$0xff]  ;;  %v8672_v60 = vld [vmem:[#allocation66_spill] sm:$0xff] }
 0xa64   : > { %v4875_v4 = vmul.f32 -1.442695, %v4195_v44  ;;  %v8673_v44 = vld [vmem:[#allocation63_spill] sm:$0xff] }
 0xa65   : > { %v5213_v61 = vpop.eup %5212  ;;  %v2591_v30 = vadd.f32 %v8673_v44, %v8661_v3  ;;  %v8675_v3 = vld [vmem:[#allocation39_spill] sm:$0xff] }
 0xa66   : > { %v5215_v55 = vpop.eup %5214  ;;  %v4199_v6 = vadd.f32 1.0, %v5213_v61  ;;  %5216 = vpow2.f32 %v4875_v4  ;;  %v8674_v4 = vld [vmem:[#allocation65_spill] sm:$0xff]  ;;  %v2714_v38 = vadd.f32 %v8675_v3, %v8665_v31 }
 0xa67   : > { %v4218_v51 = vadd.f32 1.0, %v5215_v55  ;;  %v2632_v15 = vadd.f32 %v8674_v4, %v8663_v17 }
 0xa68   : > { %5218 = vrcp.f32 %v4199_v6  ;;  %v4211_v43 = vand.u32 2147483648, %v4199_v6  ;;  %v4209_v32 = vand.u32 2147483647, %v4199_v6  ;;  %vm4205_vm11 = vweird.f32 %v4199_v6 }
 0xa69   : > { %5220 = vrcp.f32 %v4218_v51  ;;  %v4230_v46 = vand.u32 2147483648, %v4218_v51  ;;  %v4228_v5 = vand.u32 2147483647, %v4218_v51  ;;  %vm4224_vm12 = vweird.f32 %v4218_v51 }
 0xa6a   : > { %v4212_v2 = vor.u32 1.1754944e-38, %v4211_v43  ;;  %vm4210_vm15 = vcmp.eq.f32.partialorder %v4209_v32, 8.507059e+37 }
 0xa6b   : > { %v4231_v52 = vor.u32 1.1754944e-38, %v4230_v46  ;;  %vm4229_vm0 = vcmp.eq.f32.partialorder %v4228_v5, 8.507059e+37 }
 0xa6c   : > { %v5217_v24 = vpop.eup %5216 }
 0xa6d   : > { %v4238_v8 = vadd.f32 1.0, %v5217_v24 }
 0xa6e   : > { %v5219_v45 = vpop.eup %5218 }
 0xa6f   : > { %v5221_v27 = vpop.eup %5220  ;;  %v4201_v54 = vmul.f32 %v5219_v45, %v4199_v6  ;;  %5222 = vrcp.f32 %v4238_v8  ;;  %vm4206_vm9 = vweird.f32 %v5219_v45  ;;  %v4250_v7 = vand.u32 2147483648, %v4238_v8 }
 0xa70   : > { %v4220_v23 = vmul.f32 %v5221_v27, %v4218_v51  ;;  %5224 = vtanh.f32 %v4194_v58  ;;  %vm4225_vm10 = vweird.f32 %v5221_v27  ;;  %vm4207_vm13 = vmor %vm4205_vm11, %vm4206_vm9  ;;  %vm4244_vm2 = vweird.f32 %v4238_v8 }
 0xa71   : > { %v4202_v62 = vsub.f32 1.0, %v4201_v54  ;;  %vm4226_vm14 = vmor %vm4224_vm12, %vm4225_vm10  ;;  %v4248_v40 = vand.u32 2147483647, %v4238_v8  ;;  %v4251_v41 = vor.u32 1.1754944e-38, %v4250_v7 }
 0xa72   : > { %v4221_v35 = vsub.f32 1.0, %v4220_v23 }
 0xa73   : > { %v4203_v12 = vmul.f32 %v5219_v45, %v4202_v62  ;;  %vm4249_vm4 = vcmp.eq.f32.partialorder %v4248_v40, 8.507059e+37  ;;  %v8676_v62 = vld [vmem:[#allocation50_spill] sm:$0xff] }
 0xa74   : > { %v4222_v28 = vmul.f32 %v5221_v27, %v4221_v35  ;;  %v2673_v35 = vadd.f32 %v8676_v62, %v8638_v39 }
 0xa75   : > { %v5223_v42 = vpop.eup %5222  ;;  %v4204_v56 = vadd.f32 %v5219_v45, %v4203_v12 }
 0xa76   : > { %v4223_v57 = vadd.f32 %v5221_v27, %v4222_v28  ;;  %v4240_v13 = vmul.f32 %v5223_v42, %v4238_v8  ;;  %v5225_v20 = vpop.eup %5224  ;;  %vm4245_vm1 = vweird.f32 %v5223_v42 }
 0xa77   : > { %v4208_v59 = vsel %vm4207_vm13, %v5219_v45, %v4204_v56  ;;  %vm4246_vm3 = vmor %vm4244_vm2, %vm4245_vm1 }
 0xa78   : > { %v4213_v34 = vsel %vm4210_vm15, %v4212_v2, %v4208_v59  ;;  %v4227_v18 = vsel %vm4226_vm14, %v5221_v27, %v4223_v57  ;;  %v4241_v19 = vsub.f32 1.0, %v4240_v13 }
 0xa79   : > { %v4232_v16 = vsel %vm4229_vm0, %v4231_v52, %v4227_v18  ;;  %v4255_v47 = vmul.f32 %v5225_v20, %v4213_v34 }
 0xa7a   : > { %v4254_v49 = vmul.f32 %v4232_v16, %v8027_v22  ;;  %v4242_v11 = vmul.f32 %v5223_v42, %v4241_v19  ;;  %v8668_v22 = vld [vmem:[#allocation57_spill] sm:$0xff] }
 0xa7c   : > { %v8125_v36 = vadd.f32 %v4255_v47, %v4254_v49  ;;  %v4243_v63 = vadd.f32 %v5223_v42, %v4242_v11 }
 0xa7e   : > { %5226 = vtanh.f32 %v8125_v36  ;;  %v4247_v48 = vsel %vm4246_vm3, %v5223_v42, %v4243_v63 }
 0xa7f   : > { %v4252_v21 = vsel %vm4249_vm4, %v4251_v41, %v4247_v48 }
 0xa84   : > { %v5227_v1 = vpop.eup %5226 }
 0xa85   : > { %v4258_v14 = vmul.f32 %v5227_v1, %v4252_v21 }
 0xa87   : > { %4344 = vmatmul.f32.vlgmr.msra.gmra.mxu0 %v4258_v14  ;;  %4364 = vmatmul.f32.vlgmr.msra.gmra.mxu1 %v4258_v14 }
 0xa88   : > { %4384 = vmatmul.f32.vlgmr.msra.gmra.mxu2 %v4258_v14  ;;  %4404 = vmatmul.f32.vlgmr.msra.gmra.mxu3 %v4258_v14 }
 0xa8f   : > { %4520 = vmatmul.f32.vlgmr.msrb.gmra.mxu0 %v8668_v22 }
 0xa97   : > { %4523 = vmatmul.f32.gmra.mxu0 %v8669_v53 }
 0xa9f   : > { %4526 = vmatmul.f32.gmra.mxu0 %v8670_v33 }
 0xaa7   : > { %4529 = vmatmul.f32.gmra.mxu0 %v8671_v9 }
 0xaaf   : > { %4532 = vmatmul.f32.gmra.mxu0 %v8672_v60 }
 0xab7   : > { %4535 = vmatmul.f32.gmra.mxu0 %v8054_v25  ;;  %v8145_v25 = vld [vmem:[%s8254_s8] ss:$0 sm:$0xff] }
 0xabf   : > { %4538 = vmatmul.f32.gmra.mxu0 %v4258_v14 }
 0xb04   : > { %v4345_v61 = vpop.f32.mrf.mxu0  ;;  %v4365_v55 = vpop.f32.mrf.mxu1 }
 0xb05   : > { %v4408_v6 = vadd.f32 %v4345_v61, %v2591_v30  ;;  %v4409_v51 = vadd.f32 %v4365_v55, %v2632_v15 }
 0xb07   : > { %v4876_v29 = vmul.f32 -1.442695, %v4408_v6  ;;  %v4877_v26 = vmul.f32 -1.442695, %v4409_v51 }
 0xb09   : > { %5228 = vpow2.f32 %v4876_v29 }
 0xb0a   : > { %5230 = vpow2.f32 %v4877_v26 }
 0xb0b   : > { %v4405_v17 = vpop.f32.mrf.mxu3  ;;  %v4385_v27 = vpop.f32.mrf.mxu2 }
 0xb0c   : > { %v4411_v0 = vadd.f32 %v4405_v17, %v2714_v38  ;;  %v4521_v24 = vpop.f32.mrf.mxu0  ;;  %v4410_v12 = vadd.f32 %v4385_v27, %v2673_v35 }
 0xb0d   : > { %v4522_v10 = vadd.f32 %v8145_v25, %v4521_v24 }
 0xb0e   : > { %v4878_v37 = vmul.f32 -1.442695, %v4411_v0 }
 0xb0f   : > { %v5229_v50 = vpop.eup %5228  ;;  %4545 = vst [vmem:[%s8150_s12] sm:$0xff] %v4522_v10 }
 0xb10   : > { %v5231_v8 = vpop.eup %5230  ;;  %v4415_v45 = vadd.f32 1.0, %v5229_v50  ;;  %5232 = vpow2.f32 %v4878_v37 }
 0xb11   : > { %v4434_v58 = vadd.f32 1.0, %v5231_v8 }
 0xb12   : > { %5234 = vrcp.f32 %v4415_v45  ;;  %v4425_v2 = vand.u32 2147483647, %v4415_v45  ;;  %v4427_v57 = vand.u32 2147483648, %v4415_v45  ;;  %vm4421_vm7 = vweird.f32 %v4415_v45 }
 0xb13   : > { %5236 = vrcp.f32 %v4434_v58  ;;  %v4446_v52 = vand.u32 2147483648, %v4434_v58  ;;  %v4444_v34 = vand.u32 2147483647, %v4434_v58  ;;  %vm4440_vm8 = vweird.f32 %v4434_v58 }
 0xb14   : > { %v4524_v31 = vpop.f32.mrf.mxu0  ;;  %v4428_v16 = vor.u32 1.1754944e-38, %v4427_v57  ;;  %vm4426_vm11 = vcmp.eq.f32.partialorder %v4425_v2, 8.507059e+37 }
 0xb15   : > { %v4525_v54 = vadd.f32 %v8145_v25, %v4524_v31  ;;  %v4447_v11 = vor.u32 1.1754944e-38, %v4446_v52  ;;  %vm4445_vm12 = vcmp.eq.f32.partialorder %v4444_v34, 8.507059e+37 }
 0xb16   : > { %v5233_v23 = vpop.eup %5232 }
 0xb17   : > { %v4454_v43 = vadd.f32 1.0, %v5233_v23  ;;  %4546 = vst [vmem:[%s8150_s12 + $0x8] sm:$0xff] %v4525_v54 }
 0xb18   : > { %v5235_v46 = vpop.eup %5234 }
 0xb19   : > { %v5237_v32 = vpop.eup %5236  ;;  %v4417_v28 = vmul.f32 %v5235_v46, %v4415_v45  ;;  %5238 = vrcp.f32 %v4454_v43  ;;  %vm4422_vm5 = vweird.f32 %v5235_v46  ;;  %v4466_v44 = vand.u32 2147483648, %v4454_v43 }
 0xb1a   : > { %v4436_v5 = vmul.f32 %v5237_v32, %v4434_v58  ;;  %5240 = vtanh.f32 %v4410_v12  ;;  %vm4441_vm6 = vweird.f32 %v5237_v32  ;;  %vm4423_vm9 = vmor %vm4421_vm7, %vm4422_vm5  ;;  %vm4460_vm14 = vweird.f32 %v4454_v43 }
 0xb1b   : > { %v4418_v42 = vsub.f32 1.0, %v4417_v28  ;;  %vm4442_vm10 = vmor %vm4440_vm8, %vm4441_vm6  ;;  %v4467_v15 = vor.u32 1.1754944e-38, %v4466_v44 }
 0xb1c   : > { %v4437_v56 = vsub.f32 1.0, %v4436_v5  ;;  %v4527_v13 = vpop.f32.mrf.mxu0 }
 0xb1d   : > { %v4419_v59 = vmul.f32 %v5235_v46, %v4418_v42  ;;  %v4528_v39 = vadd.f32 %v8145_v25, %v4527_v13 }
 0xb1e   : > { %v4438_v20 = vmul.f32 %v5237_v32, %v4437_v56 }
 0xb1f   : > { %v5239_v18 = vpop.eup %5238  ;;  %v4420_v19 = vadd.f32 %v5235_v46, %v4419_v59  ;;  %4547 = vst [vmem:[%s8150_s12 + $0x10] sm:$0xff] %v4528_v39 }
 0xb20   : > { %v4439_v47 = vadd.f32 %v5237_v32, %v4438_v20  ;;  %v4456_v49 = vmul.f32 %v5239_v18, %v4454_v43  ;;  %v5241_v7 = vpop.eup %5240  ;;  %vm4461_vm13 = vweird.f32 %v5239_v18 }
 0xb21   : > { %v4424_v63 = vsel %vm4423_vm9, %v5235_v46, %v4420_v19  ;;  %vm4462_vm15 = vmor %vm4460_vm14, %vm4461_vm13 }
 0xb22   : > { %v4429_v40 = vsel %vm4426_vm11, %v4428_v16, %v4424_v63  ;;  %v4443_v48 = vsel %vm4442_vm10, %v5237_v32, %v4439_v47  ;;  %v4457_v41 = vsub.f32 1.0, %v4456_v49 }
 0xb23   : > { %v4448_v1 = vsel %vm4445_vm12, %v4447_v11, %v4443_v48  ;;  %v4471_v21 = vmul.f32 %v5241_v7, %v4429_v40 }
 0xb24   : > { %v4470_v14 = vmul.f32 %v4448_v1, %v8125_v36  ;;  %v4530_v22 = vpop.f32.mrf.mxu0  ;;  %v4458_v53 = vmul.f32 %v5239_v18, %v4457_v41  ;;  %v4464_v36 = vand.u32 2147483647, %v4454_v43 }
 0xb25   : > { %v4531_v33 = vadd.f32 %v8145_v25, %v4530_v22 }
 0xb26   : > { %v4472_v9 = vadd.f32 %v4471_v21, %v4470_v14  ;;  %v4459_v60 = vadd.f32 %v5239_v18, %v4458_v53  ;;  %vm4465_vm0 = vcmp.eq.f32.partialorder %v4464_v36, 8.507059e+37 }
 0xb27   : > { %4548 = vst [vmem:[%s8150_s12 + $0x18] sm:$0xff] %v4531_v33 }
 0xb28   : > { %5242 = vtanh.f32 %v4472_v9  ;;  %4554 = vst [vmem:[%s8165_s24] sm:$0xff] %v4472_v9  ;;  %v4463_v30 = vsel %vm4462_vm15, %v5239_v18, %v4459_v60 }
 0xb29   : > { %v4468_v6 = vsel %vm4465_vm0, %v4467_v15, %v4463_v30 }
 0xb2c   : > { %v4533_v4 = vpop.f32.mrf.mxu0 }
 0xb2d   : > { %v4534_v61 = vadd.f32 %v8145_v25, %v4533_v4 }
 0xb2e   : > { %v5243_v55 = vpop.eup %5242 }
 0xb2f   : > { %4549 = vst [vmem:[%s8150_s12 + $0x20] sm:$0xff] %v4534_v61  ;;  %v4474_v51 = vmul.f32 %v5243_v55, %v4468_v6 }
 0xb31   : > { %4541 = vmatmul.f32.gmra.mxu0 %v4474_v51  ;;  %4553 = vst [vmem:[%s455_s17] sm:$0xff] %v4474_v51  ;;  %s5384_s17 = scalar_lea.hbm %s8256_s10, 16 }
 0xb32   : > { %p5386_p4 = scmp.lt.s32.totalorder %s5384_s17, %s5380_s13 }
 0xb34   : > { %v4536_v29 = vpop.f32.mrf.mxu0  ;;  %p5387_p7 = por %p5386_p4, %p5385_p3 }
 0xb36   : > { %p5388_p8 = pnand %p5387_p7, %p5383_p2 }
 0xb38   : > { %5391 = shalt.err (!%p5388_p8)
}
 0xb39   : > { %4909 = dma.vmem_to_hbm [thread:$0]  (%p5609_p5), %s4596_s19, 128, %s4598_s22, %s8180_s16   ;;  %v4537_v26 = vadd.f32 %v8145_v25, %v4536_v29 }
 0xb3a   : > { %s4611_s25 = sshll.u32 %s4607_s29, 4  ;;  %s4609_s2 = sshll.u32 %s8165_s24, 4  ;;  %s4610_s2 = int_to_ptr.vmem [resolvable:$true] %s4609_s2  ;;  %s4612_s25 = int_to_ptr.hbm [resolvable:$true] %s4611_s25 }
 0xb3b   : > { %4550 = vst [vmem:[%s8150_s12 + $0x28] sm:$0xff] %v4537_v26  ;;  %s5406_s0 = sshra.s32 %s4612_s25, 4  ;;  %s5412_s13 = scalar_lea.hbm %s8257_s11, 16  ;;  %s5407_s0 = int_to_ptr.hbm [resolvable:$true] %s5406_s0 }
 0xb3c   : > { %s5408_s23 = scalar_lea.hbm %s5407_s0, 8  ;;  %p5413_p12 = scmp.lt.s32.totalorder %s5407_s0, %s8257_s11 }
 0xb3d   : > { %p5409_p9 = scmp.ne.s32.totalorder %s5407_s0, %s5408_s23  ;;  %p5414_p13 = scmp.lt.s32.totalorder %s5412_s13, %s5408_s23 }
 0xb3f   : > { %p5410_p10 = pnand %p5409_p9, %p5609_p5  ;;  %p5415_p0 = por %p5414_p13, %p5413_p12 }
 0xb41   : > { %p5411_p11 = pneg %p5410_p10 }
 0xb43   : > { %p5416_p1 = pnand %p5415_p0, %p5411_p11 }
 0xb45   : > { %5419 = shalt.err (!%p5416_p1)
}
 0xb46   : > { %4910 = dma.vmem_to_hbm [thread:$0]  (%p5609_p5), %s4610_s2, 128, %s4612_s25, %s8180_s16   ;;  %v4539_v3 = vpop.f32.mrf.mxu0 }
 0xb47   : > { %v4540_v38 = vadd.f32 %v8145_v25, %v4539_v3  ;;  %s4889_s24 = sshll.u32 %s5590_s21, 6  ;;  %s4578_s17 = sshll.u32 %s8150_s12, 4  ;;  %s4579_s17 = int_to_ptr.vmem [resolvable:$true] %s4578_s17 }
 0xb48   : > { %s4577_s15 = scalar_lea.hbm %s8255_s9, %s4889_s24  ;;  %s4556_s0 = scalar_lea.sflag [#allocation6], %s8139_s28 }
 0xb49   : > { %4551 = vst [vmem:[%s8150_s12 + $0x30] sm:$0xff] %v4540_v38  ;;  %s4580_s1 = sshll.u32 %s4577_s15, 4  ;;  %s5440_s23 = scalar_lea.hbm %s8255_s9, 128  ;;  %s4581_s1 = int_to_ptr.hbm [resolvable:$true] %s4580_s1 }
 0xb4a   : > { %s5434_s16 = sshra.s32 %s4581_s1, 4  ;;  %s5435_s16 = int_to_ptr.hbm [resolvable:$true] %s5434_s16 }
 0xb4b   : > { %s5436_s25 = scalar_lea.hbm %s5435_s16, 64  ;;  %p5441_p7 = scmp.lt.s32.totalorder %s5435_s16, %s8255_s9 }
 0xb4c   : > { %p5437_p2 = scmp.ne.s32.totalorder %s5435_s16, %s5436_s25  ;;  %p5442_p8 = scmp.lt.s32.totalorder %s5440_s23, %s5436_s25 }
 0xb4e   : > { %p5438_p3 = pnand %p5437_p2, %p5609_p5  ;;  %p5443_p9 = por %p5442_p8, %p5441_p7 }
 0xb50   : > { %p5439_p4 = pneg %p5438_p3 }
 0xb52   : > { %p5444_p10 = pnand %p5443_p9, %p5439_p4 }
 0xbae   : > { %v4542_v17 = vpop.f32.mrf.mxu0 }
 0xbaf   : > { %v4543_v0 = vadd.f32 %v8145_v25, %v4542_v17 }
 0xbb1   : > { %4552 = vst [vmem:[%s8150_s12 + $0x38] sm:$0xff] %v4543_v0 }
 0xbb2   : > { %5447 = shalt.err (!%p5444_p10)
}
 0xbb3   : > { %s5507_s28 = smov 128   ;;  %s5508_s12 = smov 8  }
 0xbb4   : > { %4908 = dma.vmem_to_hbm [thread:$0]  (%p5609_p5), %s4579_s17, 1024, %s4581_s1, %s4556_s0, %s5507_s28, %s5507_s28, %s5508_s12  }
 0xbb5 PF: > { %s8677_s13 = sld [smem:[#allocation21_spill]]  ;;  %p4945_p11 = scmp.ge.s32.totalorder %s5498_s20, 2 }
 0xbb7   : > { %p4928_p12 = pnand %p4945_p11, %p5613_p6 }
 0xbb9   : > { %p4929_p13 = pneg %p4928_p12 }
 0xbbb   : > { %s4623_s19 = sand.u32 1, %s8677_s13  }
 0xbbc   : > { %s4624_s24 = scalar_lea.sflag [#allocation6], %s4623_s19 }
 0xbbd   : > { %5477 = dma.done.wait (%p4929_p13), %s4624_s24, 1024  }
 0xbbe   : > { %5479 = vsyncadd (%p4929_p13), %s4624_s24, 4294966272  ;;  %s8679_s22 = sadd.s32 4294967294, %s5498_s20  }
 0xbbf   : > { %s4633_s29 = sand.u32 1, %s8679_s22  }
 0xbc0   : > { %s4634_s15 = scalar_lea.sflag [#allocation14], %s4633_s29 }
 0xbc1   : > { %5481 = dma.done.wait (%p4929_p13), %s4634_s15, 256  }
 0xbc2   : > { %5483 = vsyncadd (%p4929_p13), %s4634_s15, 4294967040  ;;  %s8680_s20 = sld [smem:[#allocation23_spill]]  ;;  %s8683_s17 = smov %s5490_s18 }
 0xbc3   : > { %s8681_s27 = sld [smem:[#allocation22_spill]] }
 0xbc4   : > { %s8682_s19 = sld [smem:[#allocation24_spill]] }
 0xbc8   : > { %p28_p5 = scmp.ge.s32.totalorder %s8680_s20, 4  }
 0xbc9   : > { %s8684_s18 = smov %s8681_s27 }
 0xbca   :  { %30 = sbr.rel (!%p28_p5) target bundleno = 12 (0xc), region = 155 }
 0xbcf   :  { %4650 = vsyncpa [#allocation5], 1 }
 0xbd0   :  { %4652 = vsyncpa [#allocation5 + $0x1], 1 }
 0xbd1   :  { %4653 = vsyncpa [#allocation8], 1 }
 0xbd2   :  { %4654 = vsyncpa [#allocation11], 1 }
 0xbd3   :  { %4655 = vsyncpa [#allocation6], 1 }
 0xbd4   :  { %4657 = vsyncpa [#allocation6 + $0x1], 1 }
 0xbd5   :  { %4658 = vsyncpa [#allocation14], 1 }
 0xbd6   :  { %4660 = vsyncpa [#allocation14 + $0x1], 1 }

</bundles_post_ra>
